<compile_context>
chip_gen: v7x
topology: tpu7x:2x2x1
jax: 0.10.0
libtpu: 0.0.40
codegen_flags: <defaults>
</compile_context>

<pallas_src>
import jax
import jax.numpy as jnp
from jax.experimental import pallas as pl
from jax.experimental.pallas import tpu as pltpu

# ----------------------------- model hyper-params (small, consistent) --------
N = 2            # batch
C_IN = 4         # input channels
L_TS = 16        # time-series length (must be divisible by 4)
FILTERS = 32     # conv filters
KERNEL = 4       # conv kernel size
HIDDEN = 16      # LSTM hidden size per direction (BILSTM -> 2*HIDDEN features)
NUM_CLASSES = 5
BN_EPS = 1e-5
CP1 = 128        # classifier hidden-1 (100) zero-padded to a lane multiple
CP2 = 256        # classifier hidden-2 (200) zero-padded to a lane multiple


# ----------------------------- fused Pallas kernel ---------------------------

def cnn_lstm_fused_kernel(xph_ref,
                          c1w_ref, c1b_ref, c1s_ref, c1t_ref,
                          c2w_ref, c2b_ref, c2s_ref, c2t_ref,
                          wihf_ref, whhf_ref, blf_ref,
                          wihr_ref, whhr_ref, blr_ref,
                          cw1_ref, cb1_ref, cs_ref, ct_ref,
                          cw2_ref, cb2_ref, cw3_ref, cb3_ref,
                          o_ref, d20_ref, d21_ref, feat_ref):
    """Whole CNNLSTM forward pass in one invocation.

    xph_ref : (N, 4, Lp4/4, Cin)  polyphase-split 'same'-padded input,
              xph[n, s, m, :] = x_pad[n, 4m+s, :]
    c?w_ref : (K, Cin_or_F, F) conv taps (PyTorch weight transposed); c?b/s/t: (1,F)
              bias and folded eval-BN scale/shift.
    wih/whh : (F,4H)/(H,4H) fused LSTM gate weights (order i,f,g,o); bl = b_ih+b_hh.
    cw1..cb3: classifier weights, hidden dims zero-padded to 128/256 lanes.
    o_ref   : (N, num_classes) logits.
    d20/d21 : VMEM scratch (N, L4+K//2, F): de-interleaved padded conv2 input streams.
    feat_ref: VMEM scratch (N, L4*2H): torch.flatten(1) feature matrix for classifier.
    """
    n_batch = o_ref.shape[0]
    K = c1w_ref.shape[0]
    F = c1w_ref.shape[2]
    H = whhf_ref.shape[0]
    L4 = d20_ref.shape[1] - K // 2          # length after both MaxPool1d(2) stages
    f32 = jnp.float32

    # hoisted parameter loads (tiny, reused across the unrolled loops)
    w1_taps = [c1w_ref[k] for k in range(K)]
    w2_taps = [c2w_ref[k] for k in range(K)]
    b1, s1, t1 = c1b_ref[...], c1s_ref[...], c1t_ref[...]
    b2, s2, t2 = c2b_ref[...], c2s_ref[...], c2t_ref[...]

    d20_ref[...] = jnp.zeros_like(d20_ref)
    d21_ref[...] = jnp.zeros_like(d21_ref)

    # ------------- feature extraction (both conv blocks), per batch element ---
    a2 = []                                 # a2[t] : (L4, F) = LSTM input at time t
    for n in range(n_batch):
        phases = [xph_ref[n, s] for s in range(4)]          # each (Lp4/4, Cin)

        # conv1 in polyphase form: P[r][q] = conv1_out[4q + r]
        P = []
        for r in range(4):
            acc = jnp.zeros((L4, F), f32)
            for k in range(K):
                u = r + k                                    # x_pad index offset
                acc = acc + jnp.dot(phases[u % 4][u // 4:u // 4 + L4, :],
                                    w1_taps[k], preferred_element_type=f32)
            P.append(acc)

        # ReLU + MaxPool1d(2) + BatchNorm1d(eval); split by pooled-index parity
        y_even = jnp.maximum(jnp.maximum(P[0], P[1]) + b1, 0.0) * s1 + t1  # y[0,2,4,6]
        y_odd = jnp.maximum(jnp.maximum(P[2], P[3]) + b1, 0.0) * s1 + t1   # y[1,3,5,7]

        # conv2 'same'-padded de-interleaved streams:
        #   d20[m] = ypad[2m]   = [0,  y1, y3, y5, y7, 0]
        #   d21[m] = ypad[2m+1] = [y0, y2, y4, y6, 0,  0]
        d20_ref[n, 1:1 + L4, :] = y_odd
        d21_ref[n, 0:L4, :] = y_even
        d = (d20_ref[n], d21_ref[n])

        # conv2 at even / odd output positions (MaxPool window mates)
        acc_e = jnp.zeros((L4, F), f32)
        acc_o = jnp.zeros((L4, F), f32)
        for k in range(K):
            acc_e = acc_e + jnp.dot(d[k % 2][k // 2:k // 2 + L4, :],
                                    w2_taps[k], preferred_element_type=f32)
            acc_o = acc_o + jnp.dot(d[(k + 1) % 2][(k + 1) // 2:(k + 1) // 2 + L4, :],
                                    w2_taps[k], preferred_element_type=f32)
        a2.append(jnp.maximum(jnp.maximum(acc_e, acc_o) + b2, 0.0) * s2 + t2)

    # ------------- bidirectional LSTM (time axis = original batch) + Tanh -----
    def run_direction(wih_ref, whh_ref, b_ref, reverse):
        wih, whh, bl = wih_ref[...], whh_ref[...], b_ref[...]
        outs = [None] * n_batch
        h = jnp.zeros((L4, H), f32)
        c = jnp.zeros((L4, H), f32)
        order = range(n_batch - 1, -1, -1) if reverse else range(n_batch)
        for t in order:
            z = (jnp.dot(a2[t], wih, preferred_element_type=f32)
                 + jnp.dot(h, whh, preferred_element_type=f32) + bl)   # (L4, 4H)
            i_g = jax.nn.sigmoid(z[:, 0:H])
            f_g = jax.nn.sigmoid(z[:, H:2 * H])
            g_g = jnp.tanh(z[:, 2 * H:3 * H])
            o_g = jax.nn.sigmoid(z[:, 3 * H:4 * H])
            c = f_g * c + i_g * g_g
            h = o_g * jnp.tanh(c)
            outs[t] = jnp.tanh(h)            # fused model_act (Tanh)
        return outs

    outs_f = run_direction(wihf_ref, whhf_ref, blf_ref, reverse=False)
    outs_r = run_direction(wihr_ref, whhr_ref, blr_ref, reverse=True)

    # ------------- flatten(1) + classifier -------------------------------------
    # torch.flatten(1): feature index for timestep t is b*2H + c (c<H forward,
    # c>=H reverse).  Pack once into a lane-dense (N, L4*2H) matrix in VMEM scratch
    # (static slices only), then the classifier is three full-width matmuls and a
    # single full-tile output store.
    for t in range(n_batch):
        for b in range(L4):
            feat_ref[t:t + 1, b * 2 * H:b * 2 * H + H] = outs_f[t][b:b + 1, :]
            feat_ref[t:t + 1, b * 2 * H + H:(b + 1) * 2 * H] = outs_r[t][b:b + 1, :]

    feat = feat_ref[...]                                              # (N, L4*2H)
    h1 = ((jnp.dot(feat, cw1_ref[...], preferred_element_type=f32) + cb1_ref[...])
          * cs_ref[...] + ct_ref[...])                                # Linear + BN(eval)
    h2 = jnp.dot(h1, cw2_ref[...], preferred_element_type=f32) + cb2_ref[...]
    o_ref[...] = (jnp.dot(h2, cw3_ref[...], preferred_element_type=f32)
                  + cb3_ref[...])


# ----------------------------- wrapper ---------------------------------------

def _fs(shape):
    nd = len(shape)
    return pl.BlockSpec(shape, lambda i, _nd=nd: (0,) * _nd)


def cnn_lstm_forward(x_ncl, p, probits=False):
    n, cin, L = x_ncl.shape
    K = p["c1_w"].shape[0]
    F = p["c1_w"].shape[2]
    ncls = p["cw3"].shape[1]
    din = p["cw1"].shape[0]                 # = 2*H*(L//4), torch flatten(1) width
    L4 = L // 4
    assert L % 4 == 0 and K == 4

    # NCL -> NLC, PyTorch 'same' left pad, pad length to a multiple of 4 and split
    # into 4 phases so the kernel never needs strided / interleaved access.
    x = jnp.transpose(x_ncl, (0, 2, 1)).astype(jnp.float32)            # (N, L, Cin)
    left = (K - 1) // 2
    lp4 = ((L + K - 1 + 3) // 4) * 4
    x_pad = jnp.pad(x, ((0, 0), (left, lp4 - L - left), (0, 0)))       # (N, lp4, Cin)
    x_ph = x_pad.reshape(n, lp4 // 4, 4, cin).transpose(0, 2, 1, 3)    # (N, 4, lp4/4, Cin)

    args = (x_ph,
            p["c1_w"], p["c1_b"], p["c1_s"], p["c1_t"],
            p["c2_w"], p["c2_b"], p["c2_s"], p["c2_t"],
            p["wih_f"], p["whh_f"], p["bl_f"],
            p["wih_r"], p["whh_r"], p["bl_r"],
            p["cw1"], p["cb1"], p["cs"], p["ct"],
            p["cw2"], p["cb2"], p["cw3"], p["cb3"])

    logits = pl.pallas_call(
        cnn_lstm_fused_kernel,
        out_shape=jax.ShapeDtypeStruct((n, ncls), jnp.float32),
        grid=(1,),
        in_specs=[_fs(a.shape) for a in args],
        out_specs=_fs((n, ncls)),
        scratch_shapes=[pltpu.VMEM((n, L4 + K // 2, F), jnp.float32),
                        pltpu.VMEM((n, L4 + K // 2, F), jnp.float32),
                        pltpu.VMEM((n, din), jnp.float32)],
        compiler_params=pltpu.CompilerParams(
            dimension_semantics=("arbitrary",),
            vmem_limit_bytes=16 * 1024 * 1024),
    )(*args)

    if probits:
        return jax.nn.softmax(logits, axis=1)
    return logits


# ----------------------------- parameters ------------------------------------

def init_raw_params(key):
    """Random parameters in the PyTorch layouts of the original module."""
    ks = iter(jax.random.split(key, 40))

    def nrm(shape, scale=0.1):
        return scale * jax.random.normal(next(ks), shape, dtype=jnp.float32)

    r = {}
    r["conv1_w"] = nrm((FILTERS, C_IN, KERNEL)); r["conv1_b"] = nrm((FILTERS,))
    r["bn1_g"] = 1.0 + nrm((FILTERS,)); r["bn1_b"] = nrm((FILTERS,))
    r["bn1_m"] = nrm((FILTERS,)); r["bn1_v"] = 1.0 + jnp.abs(nrm((FILTERS,)))
    r["conv2_w"] = nrm((FILTERS, FILTERS, KERNEL)); r["conv2_b"] = nrm((FILTERS,))
    r["bn2_g"] = 1.0 + nrm((FILTERS,)); r["bn2_b"] = nrm((FILTERS,))
    r["bn2_m"] = nrm((FILTERS,)); r["bn2_v"] = 1.0 + jnp.abs(nrm((FILTERS,)))
    for d in ("f", "r"):                                   # BiLSTM, gate order i,f,g,o
        r[f"w_ih_{d}"] = nrm((4 * HIDDEN, FILTERS))
        r[f"w_hh_{d}"] = nrm((4 * HIDDEN, HIDDEN))
        r[f"b_ih_{d}"] = nrm((4 * HIDDEN,))
        r[f"b_hh_{d}"] = nrm((4 * HIDDEN,))
    din = 2 * HIDDEN * (L_TS // 4)
    r["fc1_w"] = nrm((100, din)); r["fc1_b"] = nrm((100,))
    r["bn3_g"] = 1.0 + nrm((100,)); r["bn3_b"] = nrm((100,))
    r["bn3_m"] = nrm((100,)); r["bn3_v"] = 1.0 + jnp.abs(nrm((100,)))
    r["fc2_w"] = nrm((200, 100)); r["fc2_b"] = nrm((200,))
    r["fc3_w"] = nrm((NUM_CLASSES, 200)); r["fc3_b"] = nrm((NUM_CLASSES,))
    return r


def prepare_params(r):
    """One-time conversion: transposes, eval-BN folding, LSTM gate fusion, lane padding."""
    def bn_fold(g, b, m, v):
        s = g * jax.lax.rsqrt(v + BN_EPS)
        return s, b - m * s

    p = {}
    p["c1_w"] = jnp.transpose(r["conv1_w"], (2, 1, 0))                 # (K, Cin, F)
    p["c1_b"] = r["conv1_b"].reshape(1, -1)
    s, t = bn_fold(r["bn1_g"], r["bn1_b"], r["bn1_m"], r["bn1_v"])
    p["c1_s"], p["c1_t"] = s.reshape(1, -1), t.reshape(1, -1)
    p["c2_w"] = jnp.transpose(r["conv2_w"], (2, 1, 0))                 # (K, F, F)
    p["c2_b"] = r["conv2_b"].reshape(1, -1)
    s, t = bn_fold(r["bn2_g"], r["bn2_b"], r["bn2_m"], r["bn2_v"])
    p["c2_s"], p["c2_t"] = s.reshape(1, -1), t.reshape(1, -1)
    for d in ("f", "r"):
        p[f"wih_{d}"] = r[f"w_ih_{d}"].T                               # (F, 4H)
        p[f"whh_{d}"] = r[f"w_hh_{d}"].T                               # (H, 4H)
        p[f"bl_{d}"] = (r[f"b_ih_{d}"] + r[f"b_hh_{d}"]).reshape(1, -1)
    # classifier: pad hidden dims 100 -> 128, 200 -> 256 (zero pad keeps math exact)
    w1 = r["fc1_w"].T                                                  # (din, 100)
    p["cw1"] = jnp.pad(w1, ((0, 0), (0, CP1 - w1.shape[1])))
    p["cb1"] = jnp.pad(r["fc1_b"], (0, CP1 - 100)).reshape(1, -1)
    s, t = bn_fold(r["bn3_g"], r["bn3_b"], r["bn3_m"], r["bn3_v"])
    p["cs"] = jnp.pad(s, (0, CP1 - 100)).reshape(1, -1)
    p["ct"] = jnp.pad(t, (0, CP1 - 100)).reshape(1, -1)
    w2 = r["fc2_w"].T                                                  # (100, 200)
    p["cw2"] = jnp.pad(w2, ((0, CP1 - 100), (0, CP2 - 200)))
    p["cb2"] = jnp.pad(r["fc2_b"], (0, CP2 - 200)).reshape(1, -1)
    w3 = r["fc3_w"].T                                                  # (200, ncls)
    p["cw3"] = jnp.pad(w3, ((0, CP2 - 200), (0, 0)))
    p["cb3"] = r["fc3_b"].reshape(1, -1)
    return p


# ----------------------------- plain-JAX reference (check only) ---------------

def reference_forward(x_ncl, r, probits=False):
    """Straightforward JAX re-implementation of CNNLSTM.forward (eval mode)."""
    def conv_block(x, w, b, g, beta, m, v):
        n, ci, L = x.shape
        co, _, K = w.shape
        left = (K - 1) // 2
        xp = jnp.pad(x, ((0, 0), (0, 0), (left, K - 1 - left)))
        y = jnp.zeros((n, co, L), jnp.float32)
        for k in range(K):
            y = y + jnp.einsum('nil,oi->nol', xp[:, :, k:k + L], w[:, :, k])
        y = jnp.maximum(y + b[None, :, None], 0.0)                     # bias + ReLU
        y = jnp.max(y.reshape(n, co, L // 2, 2), axis=-1)              # MaxPool1d(2)
        s = g * jax.lax.rsqrt(v + BN_EPS)
        return y * s[None, :, None] + (beta - m * s)[None, :, None]

    x = x_ncl.astype(jnp.float32)
    x = conv_block(x, r["conv1_w"], r["conv1_b"], r["bn1_g"], r["bn1_b"], r["bn1_m"], r["bn1_v"])
    x = conv_block(x, r["conv2_w"], r["conv2_b"], r["bn2_g"], r["bn2_b"], r["bn2_m"], r["bn2_v"])

    seq = jnp.transpose(x, (0, 2, 1))            # torch permute(0,2,1): (T=N, B=L4, F)
    T, B, _ = seq.shape
    H = r["w_hh_f"].shape[1]

    def run(w_ih, w_hh, b_ih, b_hh, reverse):
        h = jnp.zeros((B, H), jnp.float32)
        c = jnp.zeros((B, H), jnp.float32)
        outs = [None] * T
        order = range(T - 1, -1, -1) if reverse else range(T)
        for t in order:
            z = seq[t] @ w_ih.T + h @ w_hh.T + b_ih + b_hh
            i = jax.nn.sigmoid(z[:, 0:H]); f = jax.nn.sigmoid(z[:, H:2 * H])
            g = jnp.tanh(z[:, 2 * H:3 * H]); o = jax.nn.sigmoid(z[:, 3 * H:4 * H])
            c = f * c + i * g
            h = o * jnp.tanh(c)
            outs[t] = h
        return jnp.stack(outs, axis=0)

    hf = run(r["w_ih_f"], r["w_hh_f"], r["b_ih_f"], r["b_hh_f"], False)
    hr = run(r["w_ih_r"], r["w_hh_r"], r["b_ih_r"], r["b_hh_r"], True)
    y = jnp.tanh(jnp.concatenate([hf, hr], axis=-1)).reshape(T, -1)    # Tanh + flatten(1)

    s = r["bn3_g"] * jax.lax.rsqrt(r["bn3_v"] + BN_EPS)
    h1 = (y @ r["fc1_w"].T + r["fc1_b"]) * s + (r["bn3_b"] - r["bn3_m"] * s)
    h2 = h1 @ r["fc2_w"].T + r["fc2_b"]
    logits = h2 @ r["fc3_w"].T + r["fc3_b"]
    return jax.nn.softmax(logits, axis=1) if probits else logits


# ----------------------------- main --------------------------------------------

if __name__ == "__main__":
    key = jax.random.PRNGKey(0)
    k_x, k_p = jax.random.split(key)
    x = jax.random.normal(k_x, (N, C_IN, L_TS), dtype=jnp.float32)     # PyTorch NCL layout
    raw = init_raw_params(k_p)
    params = prepare_params(raw)           # BN folding / transposes / padding done ONCE

    fwd = jax.jit(cnn_lstm_forward)
    logits = fwd(x, params)
    jax.block_until_ready(logits)

    assert logits.shape == (N, NUM_CLASSES)
    assert bool(jnp.all(jnp.isfinite(logits)))

    ref = reference_forward(x, raw)
    err = float(jnp.max(jnp.abs(logits - ref)))
    assert err < 1e-3, f"kernel/reference mismatch: max abs err = {err}"
    print("KERNEL_OK")
</pallas_src>

<mosaic_0001>
module attributes {stable_mosaic.version = 11 : i64} {
  func.func @cnn_lstm_fused_kernel(%arg0: i32, %arg1: memref<2x4x5x4xf32, #tpu.memory_space<vmem>>, %arg2: memref<4x4x32xf32, #tpu.memory_space<vmem>>, %arg3: memref<1x32xf32, #tpu.memory_space<vmem>>, %arg4: memref<1x32xf32, #tpu.memory_space<vmem>>, %arg5: memref<1x32xf32, #tpu.memory_space<vmem>>, %arg6: memref<4x32x32xf32, #tpu.memory_space<vmem>>, %arg7: memref<1x32xf32, #tpu.memory_space<vmem>>, %arg8: memref<1x32xf32, #tpu.memory_space<vmem>>, %arg9: memref<1x32xf32, #tpu.memory_space<vmem>>, %arg10: memref<32x64xf32, #tpu.memory_space<vmem>>, %arg11: memref<16x64xf32, #tpu.memory_space<vmem>>, %arg12: memref<1x64xf32, #tpu.memory_space<vmem>>, %arg13: memref<32x64xf32, #tpu.memory_space<vmem>>, %arg14: memref<16x64xf32, #tpu.memory_space<vmem>>, %arg15: memref<1x64xf32, #tpu.memory_space<vmem>>, %arg16: memref<128x128xf32, #tpu.memory_space<vmem>>, %arg17: memref<1x128xf32, #tpu.memory_space<vmem>>, %arg18: memref<1x128xf32, #tpu.memory_space<vmem>>, %arg19: memref<1x128xf32, #tpu.memory_space<vmem>>, %arg20: memref<128x256xf32, #tpu.memory_space<vmem>>, %arg21: memref<1x256xf32, #tpu.memory_space<vmem>>, %arg22: memref<256x5xf32, #tpu.memory_space<vmem>>, %arg23: memref<1x5xf32, #tpu.memory_space<vmem>>, %arg24: memref<2x5xf32, #tpu.memory_space<vmem>>, %arg25: memref<2x6x32xf32, #tpu.memory_space<vmem>>, %arg26: memref<2x6x32xf32, #tpu.memory_space<vmem>>, %arg27: memref<2x128xf32, #tpu.memory_space<vmem>>) attributes {dimension_semantics = [#tpu.dimension_semantics<arbitrary>], iteration_bounds = array<i64: 1>, scalar_prefetch = 0 : i64, scratch_operands = 3 : i64, tpu.core_type = #tpu.core_type<tc>, window_params = [{pipeline_mode = #tpu.pipeline_mode<synchronous>, transform_indices = @transform_0, window_bounds = array<i64: 2, 4, 5, 4>}, {pipeline_mode = #tpu.pipeline_mode<synchronous>, transform_indices = @transform_1, window_bounds = array<i64: 4, 4, 32>}, {pipeline_mode = #tpu.pipeline_mode<synchronous>, transform_indices = @transform_2, window_bounds = array<i64: 1, 32>}, {pipeline_mode = #tpu.pipeline_mode<synchronous>, transform_indices = @transform_3, window_bounds = array<i64: 1, 32>}, {pipeline_mode = #tpu.pipeline_mode<synchronous>, transform_indices = @transform_4, window_bounds = array<i64: 1, 32>}, {pipeline_mode = #tpu.pipeline_mode<synchronous>, transform_indices = @transform_5, window_bounds = array<i64: 4, 32, 32>}, {pipeline_mode = #tpu.pipeline_mode<synchronous>, transform_indices = @transform_6, window_bounds = array<i64: 1, 32>}, {pipeline_mode = #tpu.pipeline_mode<synchronous>, transform_indices = @transform_7, window_bounds = array<i64: 1, 32>}, {pipeline_mode = #tpu.pipeline_mode<synchronous>, transform_indices = @transform_8, window_bounds = array<i64: 1, 32>}, {pipeline_mode = #tpu.pipeline_mode<synchronous>, transform_indices = @transform_9, window_bounds = array<i64: 32, 64>}, {pipeline_mode = #tpu.pipeline_mode<synchronous>, transform_indices = @transform_10, window_bounds = array<i64: 16, 64>}, {pipeline_mode = #tpu.pipeline_mode<synchronous>, transform_indices = @transform_11, window_bounds = array<i64: 1, 64>}, {pipeline_mode = #tpu.pipeline_mode<synchronous>, transform_indices = @transform_12, window_bounds = array<i64: 32, 64>}, {pipeline_mode = #tpu.pipeline_mode<synchronous>, transform_indices = @transform_13, window_bounds = array<i64: 16, 64>}, {pipeline_mode = #tpu.pipeline_mode<synchronous>, transform_indices = @transform_14, window_bounds = array<i64: 1, 64>}, {pipeline_mode = #tpu.pipeline_mode<synchronous>, transform_indices = @transform_15, window_bounds = array<i64: 128, 128>}, {pipeline_mode = #tpu.pipeline_mode<synchronous>, transform_indices = @transform_16, window_bounds = array<i64: 1, 128>}, {pipeline_mode = #tpu.pipeline_mode<synchronous>, transform_indices = @transform_17, window_bounds = array<i64: 1, 128>}, {pipeline_mode = #tpu.pipeline_mode<synchronous>, transform_indices = @transform_18, window_bounds = array<i64: 1, 128>}, {pipeline_mode = #tpu.pipeline_mode<synchronous>, transform_indices = @transform_19, window_bounds = array<i64: 128, 256>}, {pipeline_mode = #tpu.pipeline_mode<synchronous>, transform_indices = @transform_20, window_bounds = array<i64: 1, 256>}, {pipeline_mode = #tpu.pipeline_mode<synchronous>, transform_indices = @transform_21, window_bounds = array<i64: 256, 5>}, {pipeline_mode = #tpu.pipeline_mode<synchronous>, transform_indices = @transform_22, window_bounds = array<i64: 1, 5>}, {pipeline_mode = #tpu.pipeline_mode<synchronous>, transform_indices = @transform_23, window_bounds = array<i64: 2, 5>}]} {
    %c0 = arith.constant 0 : index
    %c0_0 = arith.constant 0 : index
    %c0_1 = arith.constant 0 : index
    %0 = vector.load %arg2[%c0, %c0_0, %c0_1] : memref<4x4x32xf32, #tpu.memory_space<vmem>>, vector<1x4x32xf32>
    %1 = vector.shape_cast %0 : vector<1x4x32xf32> to vector<4x32xf32>
    %c1 = arith.constant 1 : index
    %c0_2 = arith.constant 0 : index
    %c0_3 = arith.constant 0 : index
    %2 = vector.load %arg2[%c1, %c0_2, %c0_3] : memref<4x4x32xf32, #tpu.memory_space<vmem>>, vector<1x4x32xf32>
    %3 = vector.shape_cast %2 : vector<1x4x32xf32> to vector<4x32xf32>
    %c2 = arith.constant 2 : index
    %c0_4 = arith.constant 0 : index
    %c0_5 = arith.constant 0 : index
    %4 = vector.load %arg2[%c2, %c0_4, %c0_5] : memref<4x4x32xf32, #tpu.memory_space<vmem>>, vector<1x4x32xf32>
    %5 = vector.shape_cast %4 : vector<1x4x32xf32> to vector<4x32xf32>
    %c3 = arith.constant 3 : index
    %c0_6 = arith.constant 0 : index
    %c0_7 = arith.constant 0 : index
    %6 = vector.load %arg2[%c3, %c0_6, %c0_7] : memref<4x4x32xf32, #tpu.memory_space<vmem>>, vector<1x4x32xf32>
    %7 = vector.shape_cast %6 : vector<1x4x32xf32> to vector<4x32xf32>
    %c0_8 = arith.constant 0 : index
    %c0_9 = arith.constant 0 : index
    %c0_10 = arith.constant 0 : index
    %8 = vector.load %arg6[%c0_8, %c0_9, %c0_10] : memref<4x32x32xf32, #tpu.memory_space<vmem>>, vector<1x32x32xf32>
    %9 = vector.shape_cast %8 : vector<1x32x32xf32> to vector<32x32xf32>
    %c1_11 = arith.constant 1 : index
    %c0_12 = arith.constant 0 : index
    %c0_13 = arith.constant 0 : index
    %10 = vector.load %arg6[%c1_11, %c0_12, %c0_13] : memref<4x32x32xf32, #tpu.memory_space<vmem>>, vector<1x32x32xf32>
    %11 = vector.shape_cast %10 : vector<1x32x32xf32> to vector<32x32xf32>
    %c2_14 = arith.constant 2 : index
    %c0_15 = arith.constant 0 : index
    %c0_16 = arith.constant 0 : index
    %12 = vector.load %arg6[%c2_14, %c0_15, %c0_16] : memref<4x32x32xf32, #tpu.memory_space<vmem>>, vector<1x32x32xf32>
    %13 = vector.shape_cast %12 : vector<1x32x32xf32> to vector<32x32xf32>
    %c3_17 = arith.constant 3 : index
    %c0_18 = arith.constant 0 : index
    %c0_19 = arith.constant 0 : index
    %14 = vector.load %arg6[%c3_17, %c0_18, %c0_19] : memref<4x32x32xf32, #tpu.memory_space<vmem>>, vector<1x32x32xf32>
    %15 = vector.shape_cast %14 : vector<1x32x32xf32> to vector<32x32xf32>
    %c0_20 = arith.constant 0 : index
    %c0_21 = arith.constant 0 : index
    %16 = vector.load %arg3[%c0_20, %c0_21] : memref<1x32xf32, #tpu.memory_space<vmem>>, vector<1x32xf32>
    %c0_22 = arith.constant 0 : index
    %c0_23 = arith.constant 0 : index
    %17 = vector.load %arg4[%c0_22, %c0_23] : memref<1x32xf32, #tpu.memory_space<vmem>>, vector<1x32xf32>
    %c0_24 = arith.constant 0 : index
    %c0_25 = arith.constant 0 : index
    %18 = vector.load %arg5[%c0_24, %c0_25] : memref<1x32xf32, #tpu.memory_space<vmem>>, vector<1x32xf32>
    %c0_26 = arith.constant 0 : index
    %c0_27 = arith.constant 0 : index
    %19 = vector.load %arg7[%c0_26, %c0_27] : memref<1x32xf32, #tpu.memory_space<vmem>>, vector<1x32xf32>
    %c0_28 = arith.constant 0 : index
    %c0_29 = arith.constant 0 : index
    %20 = vector.load %arg8[%c0_28, %c0_29] : memref<1x32xf32, #tpu.memory_space<vmem>>, vector<1x32xf32>
    %c0_30 = arith.constant 0 : index
    %c0_31 = arith.constant 0 : index
    %21 = vector.load %arg9[%c0_30, %c0_31] : memref<1x32xf32, #tpu.memory_space<vmem>>, vector<1x32xf32>
    %cst = arith.constant 0.000000e+00 : f32
    %22 = vector.broadcast %cst : f32 to vector<2x6x32xf32>
    %c0_32 = arith.constant 0 : index
    %c0_33 = arith.constant 0 : index
    %c0_34 = arith.constant 0 : index
    %23 = vector.load %arg25[%c0_32, %c0_33, %c0_34] : memref<2x6x32xf32, #tpu.memory_space<vmem>>, vector<2x6x32xf32>
    tpu.vector_store %arg25[%c0_32, %c0_33, %c0_34], %22 {strides = array<i32>} : memref<2x6x32xf32, #tpu.memory_space<vmem>>, vector<2x6x32xf32>,
    %cst_35 = arith.constant 0.000000e+00 : f32
    %24 = vector.broadcast %cst_35 : f32 to vector<2x6x32xf32>
    %c0_36 = arith.constant 0 : index
    %c0_37 = arith.constant 0 : index
    %c0_38 = arith.constant 0 : index
    %25 = vector.load %arg26[%c0_36, %c0_37, %c0_38] : memref<2x6x32xf32, #tpu.memory_space<vmem>>, vector<2x6x32xf32>
    tpu.vector_store %arg26[%c0_36, %c0_37, %c0_38], %24 {strides = array<i32>} : memref<2x6x32xf32, #tpu.memory_space<vmem>>, vector<2x6x32xf32>,
    %c0_39 = arith.constant 0 : index
    %c0_40 = arith.constant 0 : index
    %c0_41 = arith.constant 0 : index
    %c0_42 = arith.constant 0 : index
    %26 = vector.load %arg1[%c0_39, %c0_40, %c0_41, %c0_42] : memref<2x4x5x4xf32, #tpu.memory_space<vmem>>, vector<1x1x5x4xf32>
    %27 = vector.shape_cast %26 : vector<1x1x5x4xf32> to vector<5x4xf32>
    %c0_43 = arith.constant 0 : index
    %c1_44 = arith.constant 1 : index
    %c0_45 = arith.constant 0 : index
    %c0_46 = arith.constant 0 : index
    %28 = vector.load %arg1[%c0_43, %c1_44, %c0_45, %c0_46] : memref<2x4x5x4xf32, #tpu.memory_space<vmem>>, vector<1x1x5x4xf32>
    %29 = vector.shape_cast %28 : vector<1x1x5x4xf32> to vector<5x4xf32>
    %c0_47 = arith.constant 0 : index
    %c2_48 = arith.constant 2 : index
    %c0_49 = arith.constant 0 : index
    %c0_50 = arith.constant 0 : index
    %30 = vector.load %arg1[%c0_47, %c2_48, %c0_49, %c0_50] : memref<2x4x5x4xf32, #tpu.memory_space<vmem>>, vector<1x1x5x4xf32>
    %31 = vector.shape_cast %30 : vector<1x1x5x4xf32> to vector<5x4xf32>
    %c0_51 = arith.constant 0 : index
    %c3_52 = arith.constant 3 : index
    %c0_53 = arith.constant 0 : index
    %c0_54 = arith.constant 0 : index
    %32 = vector.load %arg1[%c0_51, %c3_52, %c0_53, %c0_54] : memref<2x4x5x4xf32, #tpu.memory_space<vmem>>, vector<1x1x5x4xf32>
    %33 = vector.shape_cast %32 : vector<1x1x5x4xf32> to vector<5x4xf32>
    %cst_55 = arith.constant 0.000000e+00 : f32
    %34 = vector.broadcast %cst_55 : f32 to vector<4x32xf32>
    %35 = vector.extract_strided_slice %27 {offsets = [0, 0], sizes = [4, 4], strides = [1, 1]} : vector<5x4xf32> to vector<4x4xf32>
    %cst_56 = arith.constant dense<0.000000e+00> : vector<4x32xf32>
    %36 = tpu.matmul %35, %1, %cst_56 {dimension_numbers = #tpu.dot_dimension_numbers<[1], [0], [0], [1], [0, 0, 1, 1], [], []>} : vector<4x4xf32>, vector<4x32xf32>, vector<4x32xf32> -> vector<4x32xf32>
    %37 = arith.addf %34, %36 : vector<4x32xf32>
    %38 = vector.extract_strided_slice %29 {offsets = [0, 0], sizes = [4, 4], strides = [1, 1]} : vector<5x4xf32> to vector<4x4xf32>
    %cst_57 = arith.constant dense<0.000000e+00> : vector<4x32xf32>
    %39 = tpu.matmul %38, %3, %cst_57 {dimension_numbers = #tpu.dot_dimension_numbers<[1], [0], [0], [1], [0, 0, 1, 1], [], []>} : vector<4x4xf32>, vector<4x32xf32>, vector<4x32xf32> -> vector<4x32xf32>
    %40 = arith.addf %37, %39 : vector<4x32xf32>
    %41 = vector.extract_strided_slice %31 {offsets = [0, 0], sizes = [4, 4], strides = [1, 1]} : vector<5x4xf32> to vector<4x4xf32>
    %cst_58 = arith.constant dense<0.000000e+00> : vector<4x32xf32>
    %42 = tpu.matmul %41, %5, %cst_58 {dimension_numbers = #tpu.dot_dimension_numbers<[1], [0], [0], [1], [0, 0, 1, 1], [], []>} : vector<4x4xf32>, vector<4x32xf32>, vector<4x32xf32> -> vector<4x32xf32>
    %43 = arith.addf %40, %42 : vector<4x32xf32>
    %44 = vector.extract_strided_slice %33 {offsets = [0, 0], sizes = [4, 4], strides = [1, 1]} : vector<5x4xf32> to vector<4x4xf32>
    %cst_59 = arith.constant dense<0.000000e+00> : vector<4x32xf32>
    %45 = tpu.matmul %44, %7, %cst_59 {dimension_numbers = #tpu.dot_dimension_numbers<[1], [0], [0], [1], [0, 0, 1, 1], [], []>} : vector<4x4xf32>, vector<4x32xf32>, vector<4x32xf32> -> vector<4x32xf32>
    %46 = arith.addf %43, %45 : vector<4x32xf32>
    %cst_60 = arith.constant 0.000000e+00 : f32
    %47 = vector.broadcast %cst_60 : f32 to vector<4x32xf32>
    %48 = vector.extract_strided_slice %29 {offsets = [0, 0], sizes = [4, 4], strides = [1, 1]} : vector<5x4xf32> to vector<4x4xf32>
    %cst_61 = arith.constant dense<0.000000e+00> : vector<4x32xf32>
    %49 = tpu.matmul %48, %1, %cst_61 {dimension_numbers = #tpu.dot_dimension_numbers<[1], [0], [0], [1], [0, 0, 1, 1], [], []>} : vector<4x4xf32>, vector<4x32xf32>, vector<4x32xf32> -> vector<4x32xf32>
    %50 = arith.addf %47, %49 : vector<4x32xf32>
    %51 = vector.extract_strided_slice %31 {offsets = [0, 0], sizes = [4, 4], strides = [1, 1]} : vector<5x4xf32> to vector<4x4xf32>
    %cst_62 = arith.constant dense<0.000000e+00> : vector<4x32xf32>
    %52 = tpu.matmul %51, %3, %cst_62 {dimension_numbers = #tpu.dot_dimension_numbers<[1], [0], [0], [1], [0, 0, 1, 1], [], []>} : vector<4x4xf32>, vector<4x32xf32>, vector<4x32xf32> -> vector<4x32xf32>
    %53 = arith.addf %50, %52 : vector<4x32xf32>
    %54 = vector.extract_strided_slice %33 {offsets = [0, 0], sizes = [4, 4], strides = [1, 1]} : vector<5x4xf32> to vector<4x4xf32>
    %cst_63 = arith.constant dense<0.000000e+00> : vector<4x32xf32>
    %55 = tpu.matmul %54, %5, %cst_63 {dimension_numbers = #tpu.dot_dimension_numbers<[1], [0], [0], [1], [0, 0, 1, 1], [], []>} : vector<4x4xf32>, vector<4x32xf32>, vector<4x32xf32> -> vector<4x32xf32>
    %56 = arith.addf %53, %55 : vector<4x32xf32>
    %57 = vector.extract_strided_slice %27 {offsets = [1, 0], sizes = [4, 4], strides = [1, 1]} : vector<5x4xf32> to vector<4x4xf32>
    %cst_64 = arith.constant dense<0.000000e+00> : vector<4x32xf32>
    %58 = tpu.matmul %57, %7, %cst_64 {dimension_numbers = #tpu.dot_dimension_numbers<[1], [0], [0], [1], [0, 0, 1, 1], [], []>} : vector<4x4xf32>, vector<4x32xf32>, vector<4x32xf32> -> vector<4x32xf32>
    %59 = arith.addf %56, %58 : vector<4x32xf32>
    %cst_65 = arith.constant 0.000000e+00 : f32
    %60 = vector.broadcast %cst_65 : f32 to vector<4x32xf32>
    %61 = vector.extract_strided_slice %31 {offsets = [0, 0], sizes = [4, 4], strides = [1, 1]} : vector<5x4xf32> to vector<4x4xf32>
    %cst_66 = arith.constant dense<0.000000e+00> : vector<4x32xf32>
    %62 = tpu.matmul %61, %1, %cst_66 {dimension_numbers = #tpu.dot_dimension_numbers<[1], [0], [0], [1], [0, 0, 1, 1], [], []>} : vector<4x4xf32>, vector<4x32xf32>, vector<4x32xf32> -> vector<4x32xf32>
    %63 = arith.addf %60, %62 : vector<4x32xf32>
    %64 = vector.extract_strided_slice %33 {offsets = [0, 0], sizes = [4, 4], strides = [1, 1]} : vector<5x4xf32> to vector<4x4xf32>
    %cst_67 = arith.constant dense<0.000000e+00> : vector<4x32xf32>
    %65 = tpu.matmul %64, %3, %cst_67 {dimension_numbers = #tpu.dot_dimension_numbers<[1], [0], [0], [1], [0, 0, 1, 1], [], []>} : vector<4x4xf32>, vector<4x32xf32>, vector<4x32xf32> -> vector<4x32xf32>
    %66 = arith.addf %63, %65 : vector<4x32xf32>
    %67 = vector.extract_strided_slice %27 {offsets = [1, 0], sizes = [4, 4], strides = [1, 1]} : vector<5x4xf32> to vector<4x4xf32>
    %cst_68 = arith.constant dense<0.000000e+00> : vector<4x32xf32>
    %68 = tpu.matmul %67, %5, %cst_68 {dimension_numbers = #tpu.dot_dimension_numbers<[1], [0], [0], [1], [0, 0, 1, 1], [], []>} : vector<4x4xf32>, vector<4x32xf32>, vector<4x32xf32> -> vector<4x32xf32>
    %69 = arith.addf %66, %68 : vector<4x32xf32>
    %70 = vector.extract_strided_slice %29 {offsets = [1, 0], sizes = [4, 4], strides = [1, 1]} : vector<5x4xf32> to vector<4x4xf32>
    %cst_69 = arith.constant dense<0.000000e+00> : vector<4x32xf32>
    %71 = tpu.matmul %70, %7, %cst_69 {dimension_numbers = #tpu.dot_dimension_numbers<[1], [0], [0], [1], [0, 0, 1, 1], [], []>} : vector<4x4xf32>, vector<4x32xf32>, vector<4x32xf32> -> vector<4x32xf32>
    %72 = arith.addf %69, %71 : vector<4x32xf32>
    %cst_70 = arith.constant 0.000000e+00 : f32
    %73 = vector.broadcast %cst_70 : f32 to vector<4x32xf32>
    %74 = vector.extract_strided_slice %33 {offsets = [0, 0], sizes = [4, 4], strides = [1, 1]} : vector<5x4xf32> to vector<4x4xf32>
    %cst_71 = arith.constant dense<0.000000e+00> : vector<4x32xf32>
    %75 = tpu.matmul %74, %1, %cst_71 {dimension_numbers = #tpu.dot_dimension_numbers<[1], [0], [0], [1], [0, 0, 1, 1], [], []>} : vector<4x4xf32>, vector<4x32xf32>, vector<4x32xf32> -> vector<4x32xf32>
    %76 = arith.addf %73, %75 : vector<4x32xf32>
    %77 = vector.extract_strided_slice %27 {offsets = [1, 0], sizes = [4, 4], strides = [1, 1]} : vector<5x4xf32> to vector<4x4xf32>
    %cst_72 = arith.constant dense<0.000000e+00> : vector<4x32xf32>
    %78 = tpu.matmul %77, %3, %cst_72 {dimension_numbers = #tpu.dot_dimension_numbers<[1], [0], [0], [1], [0, 0, 1, 1], [], []>} : vector<4x4xf32>, vector<4x32xf32>, vector<4x32xf32> -> vector<4x32xf32>
    %79 = arith.addf %76, %78 : vector<4x32xf32>
    %80 = vector.extract_strided_slice %29 {offsets = [1, 0], sizes = [4, 4], strides = [1, 1]} : vector<5x4xf32> to vector<4x4xf32>
    %cst_73 = arith.constant dense<0.000000e+00> : vector<4x32xf32>
    %81 = tpu.matmul %80, %5, %cst_73 {dimension_numbers = #tpu.dot_dimension_numbers<[1], [0], [0], [1], [0, 0, 1, 1], [], []>} : vector<4x4xf32>, vector<4x32xf32>, vector<4x32xf32> -> vector<4x32xf32>
    %82 = arith.addf %79, %81 : vector<4x32xf32>
    %83 = vector.extract_strided_slice %31 {offsets = [1, 0], sizes = [4, 4], strides = [1, 1]} : vector<5x4xf32> to vector<4x4xf32>
    %cst_74 = arith.constant dense<0.000000e+00> : vector<4x32xf32>
    %84 = tpu.matmul %83, %7, %cst_74 {dimension_numbers = #tpu.dot_dimension_numbers<[1], [0], [0], [1], [0, 0, 1, 1], [], []>} : vector<4x4xf32>, vector<4x32xf32>, vector<4x32xf32> -> vector<4x32xf32>
    %85 = arith.addf %82, %84 : vector<4x32xf32>
    %86 = arith.maximumf %46, %59 : vector<4x32xf32>
    %87 = vector.broadcast %16 : vector<1x32xf32> to vector<4x32xf32>
    %88 = arith.addf %86, %87 : vector<4x32xf32>
    %cst_75 = arith.constant 0.000000e+00 : f32
    %89 = vector.broadcast %cst_75 : f32 to vector<4x32xf32>
    %90 = arith.maximumf %88, %89 : vector<4x32xf32>
    %91 = vector.broadcast %17 : vector<1x32xf32> to vector<4x32xf32>
    %92 = arith.mulf %90, %91 : vector<4x32xf32>
    %93 = vector.broadcast %18 : vector<1x32xf32> to vector<4x32xf32>
    %94 = arith.addf %92, %93 : vector<4x32xf32>
    %95 = arith.maximumf %72, %85 : vector<4x32xf32>
    %96 = vector.broadcast %16 : vector<1x32xf32> to vector<4x32xf32>
    %97 = arith.addf %95, %96 : vector<4x32xf32>
    %cst_76 = arith.constant 0.000000e+00 : f32
    %98 = vector.broadcast %cst_76 : f32 to vector<4x32xf32>
    %99 = arith.maximumf %97, %98 : vector<4x32xf32>
    %100 = vector.broadcast %17 : vector<1x32xf32> to vector<4x32xf32>
    %101 = arith.mulf %99, %100 : vector<4x32xf32>
    %102 = vector.broadcast %18 : vector<1x32xf32> to vector<4x32xf32>
    %103 = arith.addf %101, %102 : vector<4x32xf32>
    %c0_77 = arith.constant 0 : index
    %c1_78 = arith.constant 1 : index
    %c0_79 = arith.constant 0 : index
    %104 = vector.load %arg25[%c0_77, %c1_78, %c0_79] : memref<2x6x32xf32, #tpu.memory_space<vmem>>, vector<1x4x32xf32>
    %105 = vector.shape_cast %104 : vector<1x4x32xf32> to vector<4x32xf32>
    %106 = vector.shape_cast %103 : vector<4x32xf32> to vector<1x4x32xf32>
    tpu.vector_store %arg25[%c0_77, %c1_78, %c0_79], %106 {strides = array<i32>} : memref<2x6x32xf32, #tpu.memory_space<vmem>>, vector<1x4x32xf32>,
    %c0_80 = arith.constant 0 : index
    %c0_81 = arith.constant 0 : index
    %c0_82 = arith.constant 0 : index
    %107 = vector.load %arg26[%c0_80, %c0_81, %c0_82] : memref<2x6x32xf32, #tpu.memory_space<vmem>>, vector<1x4x32xf32>
    %108 = vector.shape_cast %107 : vector<1x4x32xf32> to vector<4x32xf32>
    %109 = vector.shape_cast %94 : vector<4x32xf32> to vector<1x4x32xf32>
    tpu.vector_store %arg26[%c0_80, %c0_81, %c0_82], %109 {strides = array<i32>} : memref<2x6x32xf32, #tpu.memory_space<vmem>>, vector<1x4x32xf32>,
    %c0_83 = arith.constant 0 : index
    %c0_84 = arith.constant 0 : index
    %c0_85 = arith.constant 0 : index
    %110 = vector.load %arg25[%c0_83, %c0_84, %c0_85] : memref<2x6x32xf32, #tpu.memory_space<vmem>>, vector<1x6x32xf32>
    %111 = vector.shape_cast %110 : vector<1x6x32xf32> to vector<6x32xf32>
    %c0_86 = arith.constant 0 : index
    %c0_87 = arith.constant 0 : index
    %c0_88 = arith.constant 0 : index
    %112 = vector.load %arg26[%c0_86, %c0_87, %c0_88] : memref<2x6x32xf32, #tpu.memory_space<vmem>>, vector<1x6x32xf32>
    %113 = vector.shape_cast %112 : vector<1x6x32xf32> to vector<6x32xf32>
    %cst_89 = arith.constant 0.000000e+00 : f32
    %114 = vector.broadcast %cst_89 : f32 to vector<4x32xf32>
    %cst_90 = arith.constant 0.000000e+00 : f32
    %115 = vector.broadcast %cst_90 : f32 to vector<4x32xf32>
    %116 = vector.extract_strided_slice %111 {offsets = [0, 0], sizes = [4, 32], strides = [1, 1]} : vector<6x32xf32> to vector<4x32xf32>
    %cst_91 = arith.constant dense<0.000000e+00> : vector<4x32xf32>
    %117 = tpu.matmul %116, %9, %cst_91 {dimension_numbers = #tpu.dot_dimension_numbers<[1], [0], [0], [1], [0, 0, 1, 1], [], []>} : vector<4x32xf32>, vector<32x32xf32>, vector<4x32xf32> -> vector<4x32xf32>
    %118 = arith.addf %114, %117 : vector<4x32xf32>
    %119 = vector.extract_strided_slice %113 {offsets = [0, 0], sizes = [4, 32], strides = [1, 1]} : vector<6x32xf32> to vector<4x32xf32>
    %cst_92 = arith.constant dense<0.000000e+00> : vector<4x32xf32>
    %120 = tpu.matmul %119, %9, %cst_92 {dimension_numbers = #tpu.dot_dimension_numbers<[1], [0], [0], [1], [0, 0, 1, 1], [], []>} : vector<4x32xf32>, vector<32x32xf32>, vector<4x32xf32> -> vector<4x32xf32>
    %121 = arith.addf %115, %120 : vector<4x32xf32>
    %122 = vector.extract_strided_slice %113 {offsets = [0, 0], sizes = [4, 32], strides = [1, 1]} : vector<6x32xf32> to vector<4x32xf32>
    %cst_93 = arith.constant dense<0.000000e+00> : vector<4x32xf32>
    %123 = tpu.matmul %122, %11, %cst_93 {dimension_numbers = #tpu.dot_dimension_numbers<[1], [0], [0], [1], [0, 0, 1, 1], [], []>} : vector<4x32xf32>, vector<32x32xf32>, vector<4x32xf32> -> vector<4x32xf32>
    %124 = arith.addf %118, %123 : vector<4x32xf32>
    %125 = vector.extract_strided_slice %111 {offsets = [1, 0], sizes = [4, 32], strides = [1, 1]} : vector<6x32xf32> to vector<4x32xf32>
    %cst_94 = arith.constant dense<0.000000e+00> : vector<4x32xf32>
    %126 = tpu.matmul %125, %11, %cst_94 {dimension_numbers = #tpu.dot_dimension_numbers<[1], [0], [0], [1], [0, 0, 1, 1], [], []>} : vector<4x32xf32>, vector<32x32xf32>, vector<4x32xf32> -> vector<4x32xf32>
    %127 = arith.addf %121, %126 : vector<4x32xf32>
    %128 = vector.extract_strided_slice %111 {offsets = [1, 0], sizes = [4, 32], strides = [1, 1]} : vector<6x32xf32> to vector<4x32xf32>
    %cst_95 = arith.constant dense<0.000000e+00> : vector<4x32xf32>
    %129 = tpu.matmul %128, %13, %cst_95 {dimension_numbers = #tpu.dot_dimension_numbers<[1], [0], [0], [1], [0, 0, 1, 1], [], []>} : vector<4x32xf32>, vector<32x32xf32>, vector<4x32xf32> -> vector<4x32xf32>
    %130 = arith.addf %124, %129 : vector<4x32xf32>
    %131 = vector.extract_strided_slice %113 {offsets = [1, 0], sizes = [4, 32], strides = [1, 1]} : vector<6x32xf32> to vector<4x32xf32>
    %cst_96 = arith.constant dense<0.000000e+00> : vector<4x32xf32>
    %132 = tpu.matmul %131, %13, %cst_96 {dimension_numbers = #tpu.dot_dimension_numbers<[1], [0], [0], [1], [0, 0, 1, 1], [], []>} : vector<4x32xf32>, vector<32x32xf32>, vector<4x32xf32> -> vector<4x32xf32>
    %133 = arith.addf %127, %132 : vector<4x32xf32>
    %134 = vector.extract_strided_slice %113 {offsets = [1, 0], sizes = [4, 32], strides = [1, 1]} : vector<6x32xf32> to vector<4x32xf32>
    %cst_97 = arith.constant dense<0.000000e+00> : vector<4x32xf32>
    %135 = tpu.matmul %134, %15, %cst_97 {dimension_numbers = #tpu.dot_dimension_numbers<[1], [0], [0], [1], [0, 0, 1, 1], [], []>} : vector<4x32xf32>, vector<32x32xf32>, vector<4x32xf32> -> vector<4x32xf32>
    %136 = arith.addf %130, %135 : vector<4x32xf32>
    %137 = vector.extract_strided_slice %111 {offsets = [2, 0], sizes = [4, 32], strides = [1, 1]} : vector<6x32xf32> to vector<4x32xf32>
    %cst_98 = arith.constant dense<0.000000e+00> : vector<4x32xf32>
    %138 = tpu.matmul %137, %15, %cst_98 {dimension_numbers = #tpu.dot_dimension_numbers<[1], [0], [0], [1], [0, 0, 1, 1], [], []>} : vector<4x32xf32>, vector<32x32xf32>, vector<4x32xf32> -> vector<4x32xf32>
    %139 = arith.addf %133, %138 : vector<4x32xf32>
    %140 = arith.maximumf %136, %139 : vector<4x32xf32>
    %141 = vector.broadcast %19 : vector<1x32xf32> to vector<4x32xf32>
    %142 = arith.addf %140, %141 : vector<4x32xf32>
    %cst_99 = arith.constant 0.000000e+00 : f32
    %143 = vector.broadcast %cst_99 : f32 to vector<4x32xf32>
    %144 = arith.maximumf %142, %143 : vector<4x32xf32>
    %145 = vector.broadcast %20 : vector<1x32xf32> to vector<4x32xf32>
    %146 = arith.mulf %144, %145 : vector<4x32xf32>
    %147 = vector.broadcast %21 : vector<1x32xf32> to vector<4x32xf32>
    %148 = arith.addf %146, %147 : vector<4x32xf32>
    %c1_100 = arith.constant 1 : index
    %c0_101 = arith.constant 0 : index
    %c0_102 = arith.constant 0 : index
    %c0_103 = arith.constant 0 : index
    %149 = vector.load %arg1[%c1_100, %c0_101, %c0_102, %c0_103] : memref<2x4x5x4xf32, #tpu.memory_space<vmem>>, vector<1x1x5x4xf32>
    %150 = vector.shape_cast %149 : vector<1x1x5x4xf32> to vector<5x4xf32>
    %c1_104 = arith.constant 1 : index
    %c1_105 = arith.constant 1 : index
    %c0_106 = arith.constant 0 : index
    %c0_107 = arith.constant 0 : index
    %151 = vector.load %arg1[%c1_104, %c1_105, %c0_106, %c0_107] : memref<2x4x5x4xf32, #tpu.memory_space<vmem>>, vector<1x1x5x4xf32>
    %152 = vector.shape_cast %151 : vector<1x1x5x4xf32> to vector<5x4xf32>
    %c1_108 = arith.constant 1 : index
    %c2_109 = arith.constant 2 : index
    %c0_110 = arith.constant 0 : index
    %c0_111 = arith.constant 0 : index
    %153 = vector.load %arg1[%c1_108, %c2_109, %c0_110, %c0_111] : memref<2x4x5x4xf32, #tpu.memory_space<vmem>>, vector<1x1x5x4xf32>
    %154 = vector.shape_cast %153 : vector<1x1x5x4xf32> to vector<5x4xf32>
    %c1_112 = arith.constant 1 : index
    %c3_113 = arith.constant 3 : index
    %c0_114 = arith.constant 0 : index
    %c0_115 = arith.constant 0 : index
    %155 = vector.load %arg1[%c1_112, %c3_113, %c0_114, %c0_115] : memref<2x4x5x4xf32, #tpu.memory_space<vmem>>, vector<1x1x5x4xf32>
    %156 = vector.shape_cast %155 : vector<1x1x5x4xf32> to vector<5x4xf32>
    %cst_116 = arith.constant 0.000000e+00 : f32
    %157 = vector.broadcast %cst_116 : f32 to vector<4x32xf32>
    %158 = vector.extract_strided_slice %150 {offsets = [0, 0], sizes = [4, 4], strides = [1, 1]} : vector<5x4xf32> to vector<4x4xf32>
    %cst_117 = arith.constant dense<0.000000e+00> : vector<4x32xf32>
    %159 = tpu.matmul %158, %1, %cst_117 {dimension_numbers = #tpu.dot_dimension_numbers<[1], [0], [0], [1], [0, 0, 1, 1], [], []>} : vector<4x4xf32>, vector<4x32xf32>, vector<4x32xf32> -> vector<4x32xf32>
    %160 = arith.addf %157, %159 : vector<4x32xf32>
    %161 = vector.extract_strided_slice %152 {offsets = [0, 0], sizes = [4, 4], strides = [1, 1]} : vector<5x4xf32> to vector<4x4xf32>
    %cst_118 = arith.constant dense<0.000000e+00> : vector<4x32xf32>
    %162 = tpu.matmul %161, %3, %cst_118 {dimension_numbers = #tpu.dot_dimension_numbers<[1], [0], [0], [1], [0, 0, 1, 1], [], []>} : vector<4x4xf32>, vector<4x32xf32>, vector<4x32xf32> -> vector<4x32xf32>
    %163 = arith.addf %160, %162 : vector<4x32xf32>
    %164 = vector.extract_strided_slice %154 {offsets = [0, 0], sizes = [4, 4], strides = [1, 1]} : vector<5x4xf32> to vector<4x4xf32>
    %cst_119 = arith.constant dense<0.000000e+00> : vector<4x32xf32>
    %165 = tpu.matmul %164, %5, %cst_119 {dimension_numbers = #tpu.dot_dimension_numbers<[1], [0], [0], [1], [0, 0, 1, 1], [], []>} : vector<4x4xf32>, vector<4x32xf32>, vector<4x32xf32> -> vector<4x32xf32>
    %166 = arith.addf %163, %165 : vector<4x32xf32>
    %167 = vector.extract_strided_slice %156 {offsets = [0, 0], sizes = [4, 4], strides = [1, 1]} : vector<5x4xf32> to vector<4x4xf32>
    %cst_120 = arith.constant dense<0.000000e+00> : vector<4x32xf32>
    %168 = tpu.matmul %167, %7, %cst_120 {dimension_numbers = #tpu.dot_dimension_numbers<[1], [0], [0], [1], [0, 0, 1, 1], [], []>} : vector<4x4xf32>, vector<4x32xf32>, vector<4x32xf32> -> vector<4x32xf32>
    %169 = arith.addf %166, %168 : vector<4x32xf32>
    %cst_121 = arith.constant 0.000000e+00 : f32
    %170 = vector.broadcast %cst_121 : f32 to vector<4x32xf32>
    %171 = vector.extract_strided_slice %152 {offsets = [0, 0], sizes = [4, 4], strides = [1, 1]} : vector<5x4xf32> to vector<4x4xf32>
    %cst_122 = arith.constant dense<0.000000e+00> : vector<4x32xf32>
    %172 = tpu.matmul %171, %1, %cst_122 {dimension_numbers = #tpu.dot_dimension_numbers<[1], [0], [0], [1], [0, 0, 1, 1], [], []>} : vector<4x4xf32>, vector<4x32xf32>, vector<4x32xf32> -> vector<4x32xf32>
    %173 = arith.addf %170, %172 : vector<4x32xf32>
    %174 = vector.extract_strided_slice %154 {offsets = [0, 0], sizes = [4, 4], strides = [1, 1]} : vector<5x4xf32> to vector<4x4xf32>
    %cst_123 = arith.constant dense<0.000000e+00> : vector<4x32xf32>
    %175 = tpu.matmul %174, %3, %cst_123 {dimension_numbers = #tpu.dot_dimension_numbers<[1], [0], [0], [1], [0, 0, 1, 1], [], []>} : vector<4x4xf32>, vector<4x32xf32>, vector<4x32xf32> -> vector<4x32xf32>
    %176 = arith.addf %173, %175 : vector<4x32xf32>
    %177 = vector.extract_strided_slice %156 {offsets = [0, 0], sizes = [4, 4], strides = [1, 1]} : vector<5x4xf32> to vector<4x4xf32>
    %cst_124 = arith.constant dense<0.000000e+00> : vector<4x32xf32>
    %178 = tpu.matmul %177, %5, %cst_124 {dimension_numbers = #tpu.dot_dimension_numbers<[1], [0], [0], [1], [0, 0, 1, 1], [], []>} : vector<4x4xf32>, vector<4x32xf32>, vector<4x32xf32> -> vector<4x32xf32>
    %179 = arith.addf %176, %178 : vector<4x32xf32>
    %180 = vector.extract_strided_slice %150 {offsets = [1, 0], sizes = [4, 4], strides = [1, 1]} : vector<5x4xf32> to vector<4x4xf32>
    %cst_125 = arith.constant dense<0.000000e+00> : vector<4x32xf32>
    %181 = tpu.matmul %180, %7, %cst_125 {dimension_numbers = #tpu.dot_dimension_numbers<[1], [0], [0], [1], [0, 0, 1, 1], [], []>} : vector<4x4xf32>, vector<4x32xf32>, vector<4x32xf32> -> vector<4x32xf32>
    %182 = arith.addf %179, %181 : vector<4x32xf32>
    %cst_126 = arith.constant 0.000000e+00 : f32
    %183 = vector.broadcast %cst_126 : f32 to vector<4x32xf32>
    %184 = vector.extract_strided_slice %154 {offsets = [0, 0], sizes = [4, 4], strides = [1, 1]} : vector<5x4xf32> to vector<4x4xf32>
    %cst_127 = arith.constant dense<0.000000e+00> : vector<4x32xf32>
    %185 = tpu.matmul %184, %1, %cst_127 {dimension_numbers = #tpu.dot_dimension_numbers<[1], [0], [0], [1], [0, 0, 1, 1], [], []>} : vector<4x4xf32>, vector<4x32xf32>, vector<4x32xf32> -> vector<4x32xf32>
    %186 = arith.addf %183, %185 : vector<4x32xf32>
    %187 = vector.extract_strided_slice %156 {offsets = [0, 0], sizes = [4, 4], strides = [1, 1]} : vector<5x4xf32> to vector<4x4xf32>
    %cst_128 = arith.constant dense<0.000000e+00> : vector<4x32xf32>
    %188 = tpu.matmul %187, %3, %cst_128 {dimension_numbers = #tpu.dot_dimension_numbers<[1], [0], [0], [1], [0, 0, 1, 1], [], []>} : vector<4x4xf32>, vector<4x32xf32>, vector<4x32xf32> -> vector<4x32xf32>
    %189 = arith.addf %186, %188 : vector<4x32xf32>
    %190 = vector.extract_strided_slice %150 {offsets = [1, 0], sizes = [4, 4], strides = [1, 1]} : vector<5x4xf32> to vector<4x4xf32>
    %cst_129 = arith.constant dense<0.000000e+00> : vector<4x32xf32>
    %191 = tpu.matmul %190, %5, %cst_129 {dimension_numbers = #tpu.dot_dimension_numbers<[1], [0], [0], [1], [0, 0, 1, 1], [], []>} : vector<4x4xf32>, vector<4x32xf32>, vector<4x32xf32> -> vector<4x32xf32>
    %192 = arith.addf %189, %191 : vector<4x32xf32>
    %193 = vector.extract_strided_slice %152 {offsets = [1, 0], sizes = [4, 4], strides = [1, 1]} : vector<5x4xf32> to vector<4x4xf32>
    %cst_130 = arith.constant dense<0.000000e+00> : vector<4x32xf32>
    %194 = tpu.matmul %193, %7, %cst_130 {dimension_numbers = #tpu.dot_dimension_numbers<[1], [0], [0], [1], [0, 0, 1, 1], [], []>} : vector<4x4xf32>, vector<4x32xf32>, vector<4x32xf32> -> vector<4x32xf32>
    %195 = arith.addf %192, %194 : vector<4x32xf32>
    %cst_131 = arith.constant 0.000000e+00 : f32
    %196 = vector.broadcast %cst_131 : f32 to vector<4x32xf32>
    %197 = vector.extract_strided_slice %156 {offsets = [0, 0], sizes = [4, 4], strides = [1, 1]} : vector<5x4xf32> to vector<4x4xf32>
    %cst_132 = arith.constant dense<0.000000e+00> : vector<4x32xf32>
    %198 = tpu.matmul %197, %1, %cst_132 {dimension_numbers = #tpu.dot_dimension_numbers<[1], [0], [0], [1], [0, 0, 1, 1], [], []>} : vector<4x4xf32>, vector<4x32xf32>, vector<4x32xf32> -> vector<4x32xf32>
    %199 = arith.addf %196, %198 : vector<4x32xf32>
    %200 = vector.extract_strided_slice %150 {offsets = [1, 0], sizes = [4, 4], strides = [1, 1]} : vector<5x4xf32> to vector<4x4xf32>
    %cst_133 = arith.constant dense<0.000000e+00> : vector<4x32xf32>
    %201 = tpu.matmul %200, %3, %cst_133 {dimension_numbers = #tpu.dot_dimension_numbers<[1], [0], [0], [1], [0, 0, 1, 1], [], []>} : vector<4x4xf32>, vector<4x32xf32>, vector<4x32xf32> -> vector<4x32xf32>
    %202 = arith.addf %199, %201 : vector<4x32xf32>
    %203 = vector.extract_strided_slice %152 {offsets = [1, 0], sizes = [4, 4], strides = [1, 1]} : vector<5x4xf32> to vector<4x4xf32>
    %cst_134 = arith.constant dense<0.000000e+00> : vector<4x32xf32>
    %204 = tpu.matmul %203, %5, %cst_134 {dimension_numbers = #tpu.dot_dimension_numbers<[1], [0], [0], [1], [0, 0, 1, 1], [], []>} : vector<4x4xf32>, vector<4x32xf32>, vector<4x32xf32> -> vector<4x32xf32>
    %205 = arith.addf %202, %204 : vector<4x32xf32>
    %206 = vector.extract_strided_slice %154 {offsets = [1, 0], sizes = [4, 4], strides = [1, 1]} : vector<5x4xf32> to vector<4x4xf32>
    %cst_135 = arith.constant dense<0.000000e+00> : vector<4x32xf32>
    %207 = tpu.matmul %206, %7, %cst_135 {dimension_numbers = #tpu.dot_dimension_numbers<[1], [0], [0], [1], [0, 0, 1, 1], [], []>} : vector<4x4xf32>, vector<4x32xf32>, vector<4x32xf32> -> vector<4x32xf32>
    %208 = arith.addf %205, %207 : vector<4x32xf32>
    %209 = arith.maximumf %169, %182 : vector<4x32xf32>
    %210 = vector.broadcast %16 : vector<1x32xf32> to vector<4x32xf32>
    %211 = arith.addf %209, %210 : vector<4x32xf32>
    %cst_136 = arith.constant 0.000000e+00 : f32
    %212 = vector.broadcast %cst_136 : f32 to vector<4x32xf32>
    %213 = arith.maximumf %211, %212 : vector<4x32xf32>
    %214 = vector.broadcast %17 : vector<1x32xf32> to vector<4x32xf32>
    %215 = arith.mulf %213, %214 : vector<4x32xf32>
    %216 = vector.broadcast %18 : vector<1x32xf32> to vector<4x32xf32>
    %217 = arith.addf %215, %216 : vector<4x32xf32>
    %218 = arith.maximumf %195, %208 : vector<4x32xf32>
    %219 = vector.broadcast %16 : vector<1x32xf32> to vector<4x32xf32>
    %220 = arith.addf %218, %219 : vector<4x32xf32>
    %cst_137 = arith.constant 0.000000e+00 : f32
    %221 = vector.broadcast %cst_137 : f32 to vector<4x32xf32>
    %222 = arith.maximumf %220, %221 : vector<4x32xf32>
    %223 = vector.broadcast %17 : vector<1x32xf32> to vector<4x32xf32>
    %224 = arith.mulf %222, %223 : vector<4x32xf32>
    %225 = vector.broadcast %18 : vector<1x32xf32> to vector<4x32xf32>
    %226 = arith.addf %224, %225 : vector<4x32xf32>
    %c1_138 = arith.constant 1 : index
    %c1_139 = arith.constant 1 : index
    %c0_140 = arith.constant 0 : index
    %227 = vector.load %arg25[%c1_138, %c1_139, %c0_140] : memref<2x6x32xf32, #tpu.memory_space<vmem>>, vector<1x4x32xf32>
    %228 = vector.shape_cast %227 : vector<1x4x32xf32> to vector<4x32xf32>
    %229 = vector.shape_cast %226 : vector<4x32xf32> to vector<1x4x32xf32>
    tpu.vector_store %arg25[%c1_138, %c1_139, %c0_140], %229 {strides = array<i32>} : memref<2x6x32xf32, #tpu.memory_space<vmem>>, vector<1x4x32xf32>,
    %c1_141 = arith.constant 1 : index
    %c0_142 = arith.constant 0 : index
    %c0_143 = arith.constant 0 : index
    %230 = vector.load %arg26[%c1_141, %c0_142, %c0_143] : memref<2x6x32xf32, #tpu.memory_space<vmem>>, vector<1x4x32xf32>
    %231 = vector.shape_cast %230 : vector<1x4x32xf32> to vector<4x32xf32>
    %232 = vector.shape_cast %217 : vector<4x32xf32> to vector<1x4x32xf32>
    tpu.vector_store %arg26[%c1_141, %c0_142, %c0_143], %232 {strides = array<i32>} : memref<2x6x32xf32, #tpu.memory_space<vmem>>, vector<1x4x32xf32>,
    %c1_144 = arith.constant 1 : index
    %c0_145 = arith.constant 0 : index
    %c0_146 = arith.constant 0 : index
    %233 = vector.load %arg25[%c1_144, %c0_145, %c0_146] : memref<2x6x32xf32, #tpu.memory_space<vmem>>, vector<1x6x32xf32>
    %234 = vector.shape_cast %233 : vector<1x6x32xf32> to vector<6x32xf32>
    %c1_147 = arith.constant 1 : index
    %c0_148 = arith.constant 0 : index
    %c0_149 = arith.constant 0 : index
    %235 = vector.load %arg26[%c1_147, %c0_148, %c0_149] : memref<2x6x32xf32, #tpu.memory_space<vmem>>, vector<1x6x32xf32>
    %236 = vector.shape_cast %235 : vector<1x6x32xf32> to vector<6x32xf32>
    %cst_150 = arith.constant 0.000000e+00 : f32
    %237 = vector.broadcast %cst_150 : f32 to vector<4x32xf32>
    %cst_151 = arith.constant 0.000000e+00 : f32
    %238 = vector.broadcast %cst_151 : f32 to vector<4x32xf32>
    %239 = vector.extract_strided_slice %234 {offsets = [0, 0], sizes = [4, 32], strides = [1, 1]} : vector<6x32xf32> to vector<4x32xf32>
    %cst_152 = arith.constant dense<0.000000e+00> : vector<4x32xf32>
    %240 = tpu.matmul %239, %9, %cst_152 {dimension_numbers = #tpu.dot_dimension_numbers<[1], [0], [0], [1], [0, 0, 1, 1], [], []>} : vector<4x32xf32>, vector<32x32xf32>, vector<4x32xf32> -> vector<4x32xf32>
    %241 = arith.addf %237, %240 : vector<4x32xf32>
    %242 = vector.extract_strided_slice %236 {offsets = [0, 0], sizes = [4, 32], strides = [1, 1]} : vector<6x32xf32> to vector<4x32xf32>
    %cst_153 = arith.constant dense<0.000000e+00> : vector<4x32xf32>
    %243 = tpu.matmul %242, %9, %cst_153 {dimension_numbers = #tpu.dot_dimension_numbers<[1], [0], [0], [1], [0, 0, 1, 1], [], []>} : vector<4x32xf32>, vector<32x32xf32>, vector<4x32xf32> -> vector<4x32xf32>
    %244 = arith.addf %238, %243 : vector<4x32xf32>
    %245 = vector.extract_strided_slice %236 {offsets = [0, 0], sizes = [4, 32], strides = [1, 1]} : vector<6x32xf32> to vector<4x32xf32>
    %cst_154 = arith.constant dense<0.000000e+00> : vector<4x32xf32>
    %246 = tpu.matmul %245, %11, %cst_154 {dimension_numbers = #tpu.dot_dimension_numbers<[1], [0], [0], [1], [0, 0, 1, 1], [], []>} : vector<4x32xf32>, vector<32x32xf32>, vector<4x32xf32> -> vector<4x32xf32>
    %247 = arith.addf %241, %246 : vector<4x32xf32>
    %248 = vector.extract_strided_slice %234 {offsets = [1, 0], sizes = [4, 32], strides = [1, 1]} : vector<6x32xf32> to vector<4x32xf32>
    %cst_155 = arith.constant dense<0.000000e+00> : vector<4x32xf32>
    %249 = tpu.matmul %248, %11, %cst_155 {dimension_numbers = #tpu.dot_dimension_numbers<[1], [0], [0], [1], [0, 0, 1, 1], [], []>} : vector<4x32xf32>, vector<32x32xf32>, vector<4x32xf32> -> vector<4x32xf32>
    %250 = arith.addf %244, %249 : vector<4x32xf32>
    %251 = vector.extract_strided_slice %234 {offsets = [1, 0], sizes = [4, 32], strides = [1, 1]} : vector<6x32xf32> to vector<4x32xf32>
    %cst_156 = arith.constant dense<0.000000e+00> : vector<4x32xf32>
    %252 = tpu.matmul %251, %13, %cst_156 {dimension_numbers = #tpu.dot_dimension_numbers<[1], [0], [0], [1], [0, 0, 1, 1], [], []>} : vector<4x32xf32>, vector<32x32xf32>, vector<4x32xf32> -> vector<4x32xf32>
    %253 = arith.addf %247, %252 : vector<4x32xf32>
    %254 = vector.extract_strided_slice %236 {offsets = [1, 0], sizes = [4, 32], strides = [1, 1]} : vector<6x32xf32> to vector<4x32xf32>
    %cst_157 = arith.constant dense<0.000000e+00> : vector<4x32xf32>
    %255 = tpu.matmul %254, %13, %cst_157 {dimension_numbers = #tpu.dot_dimension_numbers<[1], [0], [0], [1], [0, 0, 1, 1], [], []>} : vector<4x32xf32>, vector<32x32xf32>, vector<4x32xf32> -> vector<4x32xf32>
    %256 = arith.addf %250, %255 : vector<4x32xf32>
    %257 = vector.extract_strided_slice %236 {offsets = [1, 0], sizes = [4, 32], strides = [1, 1]} : vector<6x32xf32> to vector<4x32xf32>
    %cst_158 = arith.constant dense<0.000000e+00> : vector<4x32xf32>
    %258 = tpu.matmul %257, %15, %cst_158 {dimension_numbers = #tpu.dot_dimension_numbers<[1], [0], [0], [1], [0, 0, 1, 1], [], []>} : vector<4x32xf32>, vector<32x32xf32>, vector<4x32xf32> -> vector<4x32xf32>
    %259 = arith.addf %253, %258 : vector<4x32xf32>
    %260 = vector.extract_strided_slice %234 {offsets = [2, 0], sizes = [4, 32], strides = [1, 1]} : vector<6x32xf32> to vector<4x32xf32>
    %cst_159 = arith.constant dense<0.000000e+00> : vector<4x32xf32>
    %261 = tpu.matmul %260, %15, %cst_159 {dimension_numbers = #tpu.dot_dimension_numbers<[1], [0], [0], [1], [0, 0, 1, 1], [], []>} : vector<4x32xf32>, vector<32x32xf32>, vector<4x32xf32> -> vector<4x32xf32>
    %262 = arith.addf %256, %261 : vector<4x32xf32>
    %263 = arith.maximumf %259, %262 : vector<4x32xf32>
    %264 = vector.broadcast %19 : vector<1x32xf32> to vector<4x32xf32>
    %265 = arith.addf %263, %264 : vector<4x32xf32>
    %cst_160 = arith.constant 0.000000e+00 : f32
    %266 = vector.broadcast %cst_160 : f32 to vector<4x32xf32>
    %267 = arith.maximumf %265, %266 : vector<4x32xf32>
    %268 = vector.broadcast %20 : vector<1x32xf32> to vector<4x32xf32>
    %269 = arith.mulf %267, %268 : vector<4x32xf32>
    %270 = vector.broadcast %21 : vector<1x32xf32> to vector<4x32xf32>
    %271 = arith.addf %269, %270 : vector<4x32xf32>
    %c0_161 = arith.constant 0 : index
    %c0_162 = arith.constant 0 : index
    %272 = vector.load %arg10[%c0_161, %c0_162] : memref<32x64xf32, #tpu.memory_space<vmem>>, vector<32x64xf32>
    %c0_163 = arith.constant 0 : index
    %c0_164 = arith.constant 0 : index
    %273 = vector.load %arg11[%c0_163, %c0_164] : memref<16x64xf32, #tpu.memory_space<vmem>>, vector<16x64xf32>
    %c0_165 = arith.constant 0 : index
    %c0_166 = arith.constant 0 : index
    %274 = vector.load %arg12[%c0_165, %c0_166] : memref<1x64xf32, #tpu.memory_space<vmem>>, vector<1x64xf32>
    %cst_167 = arith.constant 0.000000e+00 : f32
    %275 = vector.broadcast %cst_167 : f32 to vector<4x16xf32>
    %cst_168 = arith.constant 0.000000e+00 : f32
    %276 = vector.broadcast %cst_168 : f32 to vector<4x16xf32>
    %cst_169 = arith.constant dense<0.000000e+00> : vector<4x64xf32>
    %277 = tpu.matmul %148, %272, %cst_169 {dimension_numbers = #tpu.dot_dimension_numbers<[1], [0], [0], [1], [0, 0, 1, 1], [], []>} : vector<4x32xf32>, vector<32x64xf32>, vector<4x64xf32> -> vector<4x64xf32>
    %cst_170 = arith.constant dense<0.000000e+00> : vector<4x64xf32>
    %278 = tpu.matmul %275, %273, %cst_170 {dimension_numbers = #tpu.dot_dimension_numbers<[1], [0], [0], [1], [0, 0, 1, 1], [], []>} : vector<4x16xf32>, vector<16x64xf32>, vector<4x64xf32> -> vector<4x64xf32>
    %279 = arith.addf %277, %278 : vector<4x64xf32>
    %280 = vector.broadcast %274 : vector<1x64xf32> to vector<4x64xf32>
    %281 = arith.addf %279, %280 : vector<4x64xf32>
    %282 = vector.extract_strided_slice %281 {offsets = [0, 0], sizes = [4, 16], strides = [1, 1]} : vector<4x64xf32> to vector<4x16xf32>
    %283 = arith.negf %282 : vector<4x16xf32>
    %284 = math.exp %283 : vector<4x16xf32>
    %cst_171 = arith.constant 1.000000e+00 : f32
    %285 = vector.broadcast %cst_171 : f32 to vector<4x16xf32>
    %286 = arith.addf %285, %284 : vector<4x16xf32>
    %287 = arith.divf %285, %286 : vector<4x16xf32>
    %288 = vector.extract_strided_slice %281 {offsets = [0, 16], sizes = [4, 16], strides = [1, 1]} : vector<4x64xf32> to vector<4x16xf32>
    %289 = arith.negf %288 : vector<4x16xf32>
    %290 = math.exp %289 : vector<4x16xf32>
    %cst_172 = arith.constant 1.000000e+00 : f32
    %291 = vector.broadcast %cst_172 : f32 to vector<4x16xf32>
    %292 = arith.addf %291, %290 : vector<4x16xf32>
    %293 = arith.divf %291, %292 : vector<4x16xf32>
    %294 = vector.extract_strided_slice %281 {offsets = [0, 32], sizes = [4, 16], strides = [1, 1]} : vector<4x64xf32> to vector<4x16xf32>
    %295 = math.tanh %294 : vector<4x16xf32>
    %296 = vector.extract_strided_slice %281 {offsets = [0, 48], sizes = [4, 16], strides = [1, 1]} : vector<4x64xf32> to vector<4x16xf32>
    %297 = arith.negf %296 : vector<4x16xf32>
    %298 = math.exp %297 : vector<4x16xf32>
    %cst_173 = arith.constant 1.000000e+00 : f32
    %299 = vector.broadcast %cst_173 : f32 to vector<4x16xf32>
    %300 = arith.addf %299, %298 : vector<4x16xf32>
    %301 = arith.divf %299, %300 : vector<4x16xf32>
    %302 = arith.mulf %293, %276 : vector<4x16xf32>
    %303 = arith.mulf %287, %295 : vector<4x16xf32>
    %304 = arith.addf %302, %303 : vector<4x16xf32>
    %305 = math.tanh %304 : vector<4x16xf32>
    %306 = arith.mulf %301, %305 : vector<4x16xf32>
    %307 = math.tanh %306 : vector<4x16xf32>
    %cst_174 = arith.constant dense<0.000000e+00> : vector<4x64xf32>
    %308 = tpu.matmul %271, %272, %cst_174 {dimension_numbers = #tpu.dot_dimension_numbers<[1], [0], [0], [1], [0, 0, 1, 1], [], []>} : vector<4x32xf32>, vector<32x64xf32>, vector<4x64xf32> -> vector<4x64xf32>
    %cst_175 = arith.constant dense<0.000000e+00> : vector<4x64xf32>
    %309 = tpu.matmul %306, %273, %cst_175 {dimension_numbers = #tpu.dot_dimension_numbers<[1], [0], [0], [1], [0, 0, 1, 1], [], []>} : vector<4x16xf32>, vector<16x64xf32>, vector<4x64xf32> -> vector<4x64xf32>
    %310 = arith.addf %308, %309 : vector<4x64xf32>
    %311 = vector.broadcast %274 : vector<1x64xf32> to vector<4x64xf32>
    %312 = arith.addf %310, %311 : vector<4x64xf32>
    %313 = vector.extract_strided_slice %312 {offsets = [0, 0], sizes = [4, 16], strides = [1, 1]} : vector<4x64xf32> to vector<4x16xf32>
    %314 = arith.negf %313 : vector<4x16xf32>
    %315 = math.exp %314 : vector<4x16xf32>
    %cst_176 = arith.constant 1.000000e+00 : f32
    %316 = vector.broadcast %cst_176 : f32 to vector<4x16xf32>
    %317 = arith.addf %316, %315 : vector<4x16xf32>
    %318 = arith.divf %316, %317 : vector<4x16xf32>
    %319 = vector.extract_strided_slice %312 {offsets = [0, 16], sizes = [4, 16], strides = [1, 1]} : vector<4x64xf32> to vector<4x16xf32>
    %320 = arith.negf %319 : vector<4x16xf32>
    %321 = math.exp %320 : vector<4x16xf32>
    %cst_177 = arith.constant 1.000000e+00 : f32
    %322 = vector.broadcast %cst_177 : f32 to vector<4x16xf32>
    %323 = arith.addf %322, %321 : vector<4x16xf32>
    %324 = arith.divf %322, %323 : vector<4x16xf32>
    %325 = vector.extract_strided_slice %312 {offsets = [0, 32], sizes = [4, 16], strides = [1, 1]} : vector<4x64xf32> to vector<4x16xf32>
    %326 = math.tanh %325 : vector<4x16xf32>
    %327 = vector.extract_strided_slice %312 {offsets = [0, 48], sizes = [4, 16], strides = [1, 1]} : vector<4x64xf32> to vector<4x16xf32>
    %328 = arith.negf %327 : vector<4x16xf32>
    %329 = math.exp %328 : vector<4x16xf32>
    %cst_178 = arith.constant 1.000000e+00 : f32
    %330 = vector.broadcast %cst_178 : f32 to vector<4x16xf32>
    %331 = arith.addf %330, %329 : vector<4x16xf32>
    %332 = arith.divf %330, %331 : vector<4x16xf32>
    %333 = arith.mulf %324, %304 : vector<4x16xf32>
    %334 = arith.mulf %318, %326 : vector<4x16xf32>
    %335 = arith.addf %333, %334 : vector<4x16xf32>
    %336 = math.tanh %335 : vector<4x16xf32>
    %337 = arith.mulf %332, %336 : vector<4x16xf32>
    %338 = math.tanh %337 : vector<4x16xf32>
    %c0_179 = arith.constant 0 : index
    %c0_180 = arith.constant 0 : index
    %339 = vector.load %arg13[%c0_179, %c0_180] : memref<32x64xf32, #tpu.memory_space<vmem>>, vector<32x64xf32>
    %c0_181 = arith.constant 0 : index
    %c0_182 = arith.constant 0 : index
    %340 = vector.load %arg14[%c0_181, %c0_182] : memref<16x64xf32, #tpu.memory_space<vmem>>, vector<16x64xf32>
    %c0_183 = arith.constant 0 : index
    %c0_184 = arith.constant 0 : index
    %341 = vector.load %arg15[%c0_183, %c0_184] : memref<1x64xf32, #tpu.memory_space<vmem>>, vector<1x64xf32>
    %cst_185 = arith.constant 0.000000e+00 : f32
    %342 = vector.broadcast %cst_185 : f32 to vector<4x16xf32>
    %cst_186 = arith.constant 0.000000e+00 : f32
    %343 = vector.broadcast %cst_186 : f32 to vector<4x16xf32>
    %cst_187 = arith.constant dense<0.000000e+00> : vector<4x64xf32>
    %344 = tpu.matmul %271, %339, %cst_187 {dimension_numbers = #tpu.dot_dimension_numbers<[1], [0], [0], [1], [0, 0, 1, 1], [], []>} : vector<4x32xf32>, vector<32x64xf32>, vector<4x64xf32> -> vector<4x64xf32>
    %cst_188 = arith.constant dense<0.000000e+00> : vector<4x64xf32>
    %345 = tpu.matmul %342, %340, %cst_188 {dimension_numbers = #tpu.dot_dimension_numbers<[1], [0], [0], [1], [0, 0, 1, 1], [], []>} : vector<4x16xf32>, vector<16x64xf32>, vector<4x64xf32> -> vector<4x64xf32>
    %346 = arith.addf %344, %345 : vector<4x64xf32>
    %347 = vector.broadcast %341 : vector<1x64xf32> to vector<4x64xf32>
    %348 = arith.addf %346, %347 : vector<4x64xf32>
    %349 = vector.extract_strided_slice %348 {offsets = [0, 0], sizes = [4, 16], strides = [1, 1]} : vector<4x64xf32> to vector<4x16xf32>
    %350 = arith.negf %349 : vector<4x16xf32>
    %351 = math.exp %350 : vector<4x16xf32>
    %cst_189 = arith.constant 1.000000e+00 : f32
    %352 = vector.broadcast %cst_189 : f32 to vector<4x16xf32>
    %353 = arith.addf %352, %351 : vector<4x16xf32>
    %354 = arith.divf %352, %353 : vector<4x16xf32>
    %355 = vector.extract_strided_slice %348 {offsets = [0, 16], sizes = [4, 16], strides = [1, 1]} : vector<4x64xf32> to vector<4x16xf32>
    %356 = arith.negf %355 : vector<4x16xf32>
    %357 = math.exp %356 : vector<4x16xf32>
    %cst_190 = arith.constant 1.000000e+00 : f32
    %358 = vector.broadcast %cst_190 : f32 to vector<4x16xf32>
    %359 = arith.addf %358, %357 : vector<4x16xf32>
    %360 = arith.divf %358, %359 : vector<4x16xf32>
    %361 = vector.extract_strided_slice %348 {offsets = [0, 32], sizes = [4, 16], strides = [1, 1]} : vector<4x64xf32> to vector<4x16xf32>
    %362 = math.tanh %361 : vector<4x16xf32>
    %363 = vector.extract_strided_slice %348 {offsets = [0, 48], sizes = [4, 16], strides = [1, 1]} : vector<4x64xf32> to vector<4x16xf32>
    %364 = arith.negf %363 : vector<4x16xf32>
    %365 = math.exp %364 : vector<4x16xf32>
    %cst_191 = arith.constant 1.000000e+00 : f32
    %366 = vector.broadcast %cst_191 : f32 to vector<4x16xf32>
    %367 = arith.addf %366, %365 : vector<4x16xf32>
    %368 = arith.divf %366, %367 : vector<4x16xf32>
    %369 = arith.mulf %360, %343 : vector<4x16xf32>
    %370 = arith.mulf %354, %362 : vector<4x16xf32>
    %371 = arith.addf %369, %370 : vector<4x16xf32>
    %372 = math.tanh %371 : vector<4x16xf32>
    %373 = arith.mulf %368, %372 : vector<4x16xf32>
    %374 = math.tanh %373 : vector<4x16xf32>
    %cst_192 = arith.constant dense<0.000000e+00> : vector<4x64xf32>
    %375 = tpu.matmul %148, %339, %cst_192 {dimension_numbers = #tpu.dot_dimension_numbers<[1], [0], [0], [1], [0, 0, 1, 1], [], []>} : vector<4x32xf32>, vector<32x64xf32>, vector<4x64xf32> -> vector<4x64xf32>
    %cst_193 = arith.constant dense<0.000000e+00> : vector<4x64xf32>
    %376 = tpu.matmul %373, %340, %cst_193 {dimension_numbers = #tpu.dot_dimension_numbers<[1], [0], [0], [1], [0, 0, 1, 1], [], []>} : vector<4x16xf32>, vector<16x64xf32>, vector<4x64xf32> -> vector<4x64xf32>
    %377 = arith.addf %375, %376 : vector<4x64xf32>
    %378 = vector.broadcast %341 : vector<1x64xf32> to vector<4x64xf32>
    %379 = arith.addf %377, %378 : vector<4x64xf32>
    %380 = vector.extract_strided_slice %379 {offsets = [0, 0], sizes = [4, 16], strides = [1, 1]} : vector<4x64xf32> to vector<4x16xf32>
    %381 = arith.negf %380 : vector<4x16xf32>
    %382 = math.exp %381 : vector<4x16xf32>
    %cst_194 = arith.constant 1.000000e+00 : f32
    %383 = vector.broadcast %cst_194 : f32 to vector<4x16xf32>
    %384 = arith.addf %383, %382 : vector<4x16xf32>
    %385 = arith.divf %383, %384 : vector<4x16xf32>
    %386 = vector.extract_strided_slice %379 {offsets = [0, 16], sizes = [4, 16], strides = [1, 1]} : vector<4x64xf32> to vector<4x16xf32>
    %387 = arith.negf %386 : vector<4x16xf32>
    %388 = math.exp %387 : vector<4x16xf32>
    %cst_195 = arith.constant 1.000000e+00 : f32
    %389 = vector.broadcast %cst_195 : f32 to vector<4x16xf32>
    %390 = arith.addf %389, %388 : vector<4x16xf32>
    %391 = arith.divf %389, %390 : vector<4x16xf32>
    %392 = vector.extract_strided_slice %379 {offsets = [0, 32], sizes = [4, 16], strides = [1, 1]} : vector<4x64xf32> to vector<4x16xf32>
    %393 = math.tanh %392 : vector<4x16xf32>
    %394 = vector.extract_strided_slice %379 {offsets = [0, 48], sizes = [4, 16], strides = [1, 1]} : vector<4x64xf32> to vector<4x16xf32>
    %395 = arith.negf %394 : vector<4x16xf32>
    %396 = math.exp %395 : vector<4x16xf32>
    %cst_196 = arith.constant 1.000000e+00 : f32
    %397 = vector.broadcast %cst_196 : f32 to vector<4x16xf32>
    %398 = arith.addf %397, %396 : vector<4x16xf32>
    %399 = arith.divf %397, %398 : vector<4x16xf32>
    %400 = arith.mulf %391, %371 : vector<4x16xf32>
    %401 = arith.mulf %385, %393 : vector<4x16xf32>
    %402 = arith.addf %400, %401 : vector<4x16xf32>
    %403 = math.tanh %402 : vector<4x16xf32>
    %404 = arith.mulf %399, %403 : vector<4x16xf32>
    %405 = math.tanh %404 : vector<4x16xf32>
    %406 = vector.extract_strided_slice %307 {offsets = [0, 0], sizes = [1, 16], strides = [1, 1]} : vector<4x16xf32> to vector<1x16xf32>
    %c0_197 = arith.constant 0 : index
    %c0_198 = arith.constant 0 : index
    %407 = vector.load %arg27[%c0_197, %c0_198] : memref<2x128xf32, #tpu.memory_space<vmem>>, vector<1x16xf32>
    tpu.vector_store %arg27[%c0_197, %c0_198], %406 {strides = array<i32>} : memref<2x128xf32, #tpu.memory_space<vmem>>, vector<1x16xf32>,
    %408 = vector.extract_strided_slice %405 {offsets = [0, 0], sizes = [1, 16], strides = [1, 1]} : vector<4x16xf32> to vector<1x16xf32>
    %c0_199 = arith.constant 0 : index
    %c16 = arith.constant 16 : index
    %409 = vector.load %arg27[%c0_199, %c16] : memref<2x128xf32, #tpu.memory_space<vmem>>, vector<1x16xf32>
    tpu.vector_store %arg27[%c0_199, %c16], %408 {strides = array<i32>} : memref<2x128xf32, #tpu.memory_space<vmem>>, vector<1x16xf32>,
    %410 = vector.extract_strided_slice %307 {offsets = [1, 0], sizes = [1, 16], strides = [1, 1]} : vector<4x16xf32> to vector<1x16xf32>
    %c0_200 = arith.constant 0 : index
    %c32 = arith.constant 32 : index
    %411 = vector.load %arg27[%c0_200, %c32] : memref<2x128xf32, #tpu.memory_space<vmem>>, vector<1x16xf32>
    tpu.vector_store %arg27[%c0_200, %c32], %410 {strides = array<i32>} : memref<2x128xf32, #tpu.memory_space<vmem>>, vector<1x16xf32>,
    %412 = vector.extract_strided_slice %405 {offsets = [1, 0], sizes = [1, 16], strides = [1, 1]} : vector<4x16xf32> to vector<1x16xf32>
    %c0_201 = arith.constant 0 : index
    %c48 = arith.constant 48 : index
    %413 = vector.load %arg27[%c0_201, %c48] : memref<2x128xf32, #tpu.memory_space<vmem>>, vector<1x16xf32>
    tpu.vector_store %arg27[%c0_201, %c48], %412 {strides = array<i32>} : memref<2x128xf32, #tpu.memory_space<vmem>>, vector<1x16xf32>,
    %414 = vector.extract_strided_slice %307 {offsets = [2, 0], sizes = [1, 16], strides = [1, 1]} : vector<4x16xf32> to vector<1x16xf32>
    %c0_202 = arith.constant 0 : index
    %c64 = arith.constant 64 : index
    %415 = vector.load %arg27[%c0_202, %c64] : memref<2x128xf32, #tpu.memory_space<vmem>>, vector<1x16xf32>
    tpu.vector_store %arg27[%c0_202, %c64], %414 {strides = array<i32>} : memref<2x128xf32, #tpu.memory_space<vmem>>, vector<1x16xf32>,
    %416 = vector.extract_strided_slice %405 {offsets = [2, 0], sizes = [1, 16], strides = [1, 1]} : vector<4x16xf32> to vector<1x16xf32>
    %c0_203 = arith.constant 0 : index
    %c80 = arith.constant 80 : index
    %417 = vector.load %arg27[%c0_203, %c80] : memref<2x128xf32, #tpu.memory_space<vmem>>, vector<1x16xf32>
    tpu.vector_store %arg27[%c0_203, %c80], %416 {strides = array<i32>} : memref<2x128xf32, #tpu.memory_space<vmem>>, vector<1x16xf32>,
    %418 = vector.extract_strided_slice %307 {offsets = [3, 0], sizes = [1, 16], strides = [1, 1]} : vector<4x16xf32> to vector<1x16xf32>
    %c0_204 = arith.constant 0 : index
    %c96 = arith.constant 96 : index
    %419 = vector.load %arg27[%c0_204, %c96] : memref<2x128xf32, #tpu.memory_space<vmem>>, vector<1x16xf32>
    tpu.vector_store %arg27[%c0_204, %c96], %418 {strides = array<i32>} : memref<2x128xf32, #tpu.memory_space<vmem>>, vector<1x16xf32>,
    %420 = vector.extract_strided_slice %405 {offsets = [3, 0], sizes = [1, 16], strides = [1, 1]} : vector<4x16xf32> to vector<1x16xf32>
    %c0_205 = arith.constant 0 : index
    %c112 = arith.constant 112 : index
    %421 = vector.load %arg27[%c0_205, %c112] : memref<2x128xf32, #tpu.memory_space<vmem>>, vector<1x16xf32>
    tpu.vector_store %arg27[%c0_205, %c112], %420 {strides = array<i32>} : memref<2x128xf32, #tpu.memory_space<vmem>>, vector<1x16xf32>,
    %422 = vector.extract_strided_slice %338 {offsets = [0, 0], sizes = [1, 16], strides = [1, 1]} : vector<4x16xf32> to vector<1x16xf32>
    %c1_206 = arith.constant 1 : index
    %c0_207 = arith.constant 0 : index
    %423 = vector.load %arg27[%c1_206, %c0_207] : memref<2x128xf32, #tpu.memory_space<vmem>>, vector<1x16xf32>
    tpu.vector_store %arg27[%c1_206, %c0_207], %422 {strides = array<i32>} : memref<2x128xf32, #tpu.memory_space<vmem>>, vector<1x16xf32>,
    %424 = vector.extract_strided_slice %374 {offsets = [0, 0], sizes = [1, 16], strides = [1, 1]} : vector<4x16xf32> to vector<1x16xf32>
    %c1_208 = arith.constant 1 : index
    %c16_209 = arith.constant 16 : index
    %425 = vector.load %arg27[%c1_208, %c16_209] : memref<2x128xf32, #tpu.memory_space<vmem>>, vector<1x16xf32>
    tpu.vector_store %arg27[%c1_208, %c16_209], %424 {strides = array<i32>} : memref<2x128xf32, #tpu.memory_space<vmem>>, vector<1x16xf32>,
    %426 = vector.extract_strided_slice %338 {offsets = [1, 0], sizes = [1, 16], strides = [1, 1]} : vector<4x16xf32> to vector<1x16xf32>
    %c1_210 = arith.constant 1 : index
    %c32_211 = arith.constant 32 : index
    %427 = vector.load %arg27[%c1_210, %c32_211] : memref<2x128xf32, #tpu.memory_space<vmem>>, vector<1x16xf32>
    tpu.vector_store %arg27[%c1_210, %c32_211], %426 {strides = array<i32>} : memref<2x128xf32, #tpu.memory_space<vmem>>, vector<1x16xf32>,
    %428 = vector.extract_strided_slice %374 {offsets = [1, 0], sizes = [1, 16], strides = [1, 1]} : vector<4x16xf32> to vector<1x16xf32>
    %c1_212 = arith.constant 1 : index
    %c48_213 = arith.constant 48 : index
    %429 = vector.load %arg27[%c1_212, %c48_213] : memref<2x128xf32, #tpu.memory_space<vmem>>, vector<1x16xf32>
    tpu.vector_store %arg27[%c1_212, %c48_213], %428 {strides = array<i32>} : memref<2x128xf32, #tpu.memory_space<vmem>>, vector<1x16xf32>,
    %430 = vector.extract_strided_slice %338 {offsets = [2, 0], sizes = [1, 16], strides = [1, 1]} : vector<4x16xf32> to vector<1x16xf32>
    %c1_214 = arith.constant 1 : index
    %c64_215 = arith.constant 64 : index
    %431 = vector.load %arg27[%c1_214, %c64_215] : memref<2x128xf32, #tpu.memory_space<vmem>>, vector<1x16xf32>
    tpu.vector_store %arg27[%c1_214, %c64_215], %430 {strides = array<i32>} : memref<2x128xf32, #tpu.memory_space<vmem>>, vector<1x16xf32>,
    %432 = vector.extract_strided_slice %374 {offsets = [2, 0], sizes = [1, 16], strides = [1, 1]} : vector<4x16xf32> to vector<1x16xf32>
    %c1_216 = arith.constant 1 : index
    %c80_217 = arith.constant 80 : index
    %433 = vector.load %arg27[%c1_216, %c80_217] : memref<2x128xf32, #tpu.memory_space<vmem>>, vector<1x16xf32>
    tpu.vector_store %arg27[%c1_216, %c80_217], %432 {strides = array<i32>} : memref<2x128xf32, #tpu.memory_space<vmem>>, vector<1x16xf32>,
    %434 = vector.extract_strided_slice %338 {offsets = [3, 0], sizes = [1, 16], strides = [1, 1]} : vector<4x16xf32> to vector<1x16xf32>
    %c1_218 = arith.constant 1 : index
    %c96_219 = arith.constant 96 : index
    %435 = vector.load %arg27[%c1_218, %c96_219] : memref<2x128xf32, #tpu.memory_space<vmem>>, vector<1x16xf32>
    tpu.vector_store %arg27[%c1_218, %c96_219], %434 {strides = array<i32>} : memref<2x128xf32, #tpu.memory_space<vmem>>, vector<1x16xf32>,
    %436 = vector.extract_strided_slice %374 {offsets = [3, 0], sizes = [1, 16], strides = [1, 1]} : vector<4x16xf32> to vector<1x16xf32>
    %c1_220 = arith.constant 1 : index
    %c112_221 = arith.constant 112 : index
    %437 = vector.load %arg27[%c1_220, %c112_221] : memref<2x128xf32, #tpu.memory_space<vmem>>, vector<1x16xf32>
    tpu.vector_store %arg27[%c1_220, %c112_221], %436 {strides = array<i32>} : memref<2x128xf32, #tpu.memory_space<vmem>>, vector<1x16xf32>,
    %c0_222 = arith.constant 0 : index
    %c0_223 = arith.constant 0 : index
    %438 = vector.load %arg27[%c0_222, %c0_223] : memref<2x128xf32, #tpu.memory_space<vmem>>, vector<2x128xf32>
    %c0_224 = arith.constant 0 : index
    %c0_225 = arith.constant 0 : index
    %439 = vector.load %arg16[%c0_224, %c0_225] : memref<128x128xf32, #tpu.memory_space<vmem>>, vector<128x128xf32>
    %cst_226 = arith.constant dense<0.000000e+00> : vector<2x128xf32>
    %440 = tpu.matmul %438, %439, %cst_226 {dimension_numbers = #tpu.dot_dimension_numbers<[1], [0], [0], [1], [0, 0, 1, 1], [], []>} : vector<2x128xf32>, vector<128x128xf32>, vector<2x128xf32> -> vector<2x128xf32>
    %c0_227 = arith.constant 0 : index
    %c0_228 = arith.constant 0 : index
    %441 = vector.load %arg17[%c0_227, %c0_228] : memref<1x128xf32, #tpu.memory_space<vmem>>, vector<1x128xf32>
    %442 = vector.broadcast %441 : vector<1x128xf32> to vector<2x128xf32>
    %443 = arith.addf %440, %442 : vector<2x128xf32>
    %c0_229 = arith.constant 0 : index
    %c0_230 = arith.constant 0 : index
    %444 = vector.load %arg18[%c0_229, %c0_230] : memref<1x128xf32, #tpu.memory_space<vmem>>, vector<1x128xf32>
    %445 = vector.broadcast %444 : vector<1x128xf32> to vector<2x128xf32>
    %446 = arith.mulf %443, %445 : vector<2x128xf32>
    %c0_231 = arith.constant 0 : index
    %c0_232 = arith.constant 0 : index
    %447 = vector.load %arg19[%c0_231, %c0_232] : memref<1x128xf32, #tpu.memory_space<vmem>>, vector<1x128xf32>
    %448 = vector.broadcast %447 : vector<1x128xf32> to vector<2x128xf32>
    %449 = arith.addf %446, %448 : vector<2x128xf32>
    %c0_233 = arith.constant 0 : index
    %c0_234 = arith.constant 0 : index
    %450 = vector.load %arg20[%c0_233, %c0_234] : memref<128x256xf32, #tpu.memory_space<vmem>>, vector<128x256xf32>
    %cst_235 = arith.constant dense<0.000000e+00> : vector<2x256xf32>
    %451 = tpu.matmul %449, %450, %cst_235 {dimension_numbers = #tpu.dot_dimension_numbers<[1], [0], [0], [1], [0, 0, 1, 1], [], []>} : vector<2x128xf32>, vector<128x256xf32>, vector<2x256xf32> -> vector<2x256xf32>
    %c0_236 = arith.constant 0 : index
    %c0_237 = arith.constant 0 : index
    %452 = vector.load %arg21[%c0_236, %c0_237] : memref<1x256xf32, #tpu.memory_space<vmem>>, vector<1x256xf32>
    %453 = vector.broadcast %452 : vector<1x256xf32> to vector<2x256xf32>
    %454 = arith.addf %451, %453 : vector<2x256xf32>
    %c0_238 = arith.constant 0 : index
    %c0_239 = arith.constant 0 : index
    %455 = vector.load %arg22[%c0_238, %c0_239] : memref<256x5xf32, #tpu.memory_space<vmem>>, vector<256x5xf32>
    %cst_240 = arith.constant dense<0.000000e+00> : vector<2x5xf32>
    %456 = tpu.matmul %454, %455, %cst_240 {dimension_numbers = #tpu.dot_dimension_numbers<[1], [0], [0], [1], [0, 0, 1, 1], [], []>} : vector<2x256xf32>, vector<256x5xf32>, vector<2x5xf32> -> vector<2x5xf32>
    %c0_241 = arith.constant 0 : index
    %c0_242 = arith.constant 0 : index
    %457 = vector.load %arg23[%c0_241, %c0_242] : memref<1x5xf32, #tpu.memory_space<vmem>>, vector<1x5xf32>
    %458 = vector.broadcast %457 : vector<1x5xf32> to vector<2x5xf32>
    %459 = arith.addf %456, %458 : vector<2x5xf32>
    %c0_243 = arith.constant 0 : index
    %c0_244 = arith.constant 0 : index
    %460 = vector.load %arg24[%c0_243, %c0_244] : memref<2x5xf32, #tpu.memory_space<vmem>>, vector<2x5xf32>
    tpu.vector_store %arg24[%c0_243, %c0_244], %459 {strides = array<i32>} : memref<2x5xf32, #tpu.memory_space<vmem>>, vector<2x5xf32>,
    return
  }
  func.func @transform_0(%arg0: i32) -> (i32, i32, i32, i32) {
    %c0_i32 = arith.constant 0 : i32
    %c0_i32_0 = arith.constant 0 : i32
    %c0_i32_1 = arith.constant 0 : i32
    %c0_i32_2 = arith.constant 0 : i32
    %c0_i32_3 = arith.constant 0 : i32
    return %c0_i32, %c0_i32_0, %c0_i32_1, %c0_i32_2 : i32, i32, i32, i32
  }
  func.func @transform_1(%arg0: i32) -> (i32, i32, i32) {
    %c0_i32 = arith.constant 0 : i32
    %c0_i32_0 = arith.constant 0 : i32
    %c0_i32_1 = arith.constant 0 : i32
    %c0_i32_2 = arith.constant 0 : i32
    return %c0_i32, %c0_i32_0, %c0_i32_1 : i32, i32, i32
  }
  func.func @transform_2(%arg0: i32) -> (i32, i32) {
    %c0_i32 = arith.constant 0 : i32
    %c0_i32_0 = arith.constant 0 : i32
    %c0_i32_1 = arith.constant 0 : i32
    return %c0_i32, %c0_i32_0 : i32, i32
  }
  func.func @transform_3(%arg0: i32) -> (i32, i32) {
    %c0_i32 = arith.constant 0 : i32
    %c0_i32_0 = arith.constant 0 : i32
    %c0_i32_1 = arith.constant 0 : i32
    return %c0_i32, %c0_i32_0 : i32, i32
  }
  func.func @transform_4(%arg0: i32) -> (i32, i32) {
    %c0_i32 = arith.constant 0 : i32
    %c0_i32_0 = arith.constant 0 : i32
    %c0_i32_1 = arith.constant 0 : i32
    return %c0_i32, %c0_i32_0 : i32, i32
  }
  func.func @transform_5(%arg0: i32) -> (i32, i32, i32) {
    %c0_i32 = arith.constant 0 : i32
    %c0_i32_0 = arith.constant 0 : i32
    %c0_i32_1 = arith.constant 0 : i32
    %c0_i32_2 = arith.constant 0 : i32
    return %c0_i32, %c0_i32_0, %c0_i32_1 : i32, i32, i32
  }
  func.func @transform_6(%arg0: i32) -> (i32, i32) {
    %c0_i32 = arith.constant 0 : i32
    %c0_i32_0 = arith.constant 0 : i32
    %c0_i32_1 = arith.constant 0 : i32
    return %c0_i32, %c0_i32_0 : i32, i32
  }
  func.func @transform_7(%arg0: i32) -> (i32, i32) {
    %c0_i32 = arith.constant 0 : i32
    %c0_i32_0 = arith.constant 0 : i32
    %c0_i32_1 = arith.constant 0 : i32
    return %c0_i32, %c0_i32_0 : i32, i32
  }
  func.func @transform_8(%arg0: i32) -> (i32, i32) {
    %c0_i32 = arith.constant 0 : i32
    %c0_i32_0 = arith.constant 0 : i32
    %c0_i32_1 = arith.constant 0 : i32
    return %c0_i32, %c0_i32_0 : i32, i32
  }
  func.func @transform_9(%arg0: i32) -> (i32, i32) {
    %c0_i32 = arith.constant 0 : i32
    %c0_i32_0 = arith.constant 0 : i32
    %c0_i32_1 = arith.constant 0 : i32
    return %c0_i32, %c0_i32_0 : i32, i32
  }
  func.func @transform_10(%arg0: i32) -> (i32, i32) {
    %c0_i32 = arith.constant 0 : i32
    %c0_i32_0 = arith.constant 0 : i32
    %c0_i32_1 = arith.constant 0 : i32
    return %c0_i32, %c0_i32_0 : i32, i32
  }
  func.func @transform_11(%arg0: i32) -> (i32, i32) {
    %c0_i32 = arith.constant 0 : i32
    %c0_i32_0 = arith.constant 0 : i32
    %c0_i32_1 = arith.constant 0 : i32
    return %c0_i32, %c0_i32_0 : i32, i32
  }
  func.func @transform_12(%arg0: i32) -> (i32, i32) {
    %c0_i32 = arith.constant 0 : i32
    %c0_i32_0 = arith.constant 0 : i32
    %c0_i32_1 = arith.constant 0 : i32
    return %c0_i32, %c0_i32_0 : i32, i32
  }
  func.func @transform_13(%arg0: i32) -> (i32, i32) {
    %c0_i32 = arith.constant 0 : i32
    %c0_i32_0 = arith.constant 0 : i32
    %c0_i32_1 = arith.constant 0 : i32
    return %c0_i32, %c0_i32_0 : i32, i32
  }
  func.func @transform_14(%arg0: i32) -> (i32, i32) {
    %c0_i32 = arith.constant 0 : i32
    %c0_i32_0 = arith.constant 0 : i32
    %c0_i32_1 = arith.constant 0 : i32
    return %c0_i32, %c0_i32_0 : i32, i32
  }
  func.func @transform_15(%arg0: i32) -> (i32, i32) {
    %c0_i32 = arith.constant 0 : i32
    %c0_i32_0 = arith.constant 0 : i32
    %c0_i32_1 = arith.constant 0 : i32
    return %c0_i32, %c0_i32_0 : i32, i32
  }
  func.func @transform_16(%arg0: i32) -> (i32, i32) {
    %c0_i32 = arith.constant 0 : i32
    %c0_i32_0 = arith.constant 0 : i32
    %c0_i32_1 = arith.constant 0 : i32
    return %c0_i32, %c0_i32_0 : i32, i32
  }
  func.func @transform_17(%arg0: i32) -> (i32, i32) {
    %c0_i32 = arith.constant 0 : i32
    %c0_i32_0 = arith.constant 0 : i32
    %c0_i32_1 = arith.constant 0 : i32
    return %c0_i32, %c0_i32_0 : i32, i32
  }
  func.func @transform_18(%arg0: i32) -> (i32, i32) {
    %c0_i32 = arith.constant 0 : i32
    %c0_i32_0 = arith.constant 0 : i32
    %c0_i32_1 = arith.constant 0 : i32
    return %c0_i32, %c0_i32_0 : i32, i32
  }
  func.func @transform_19(%arg0: i32) -> (i32, i32) {
    %c0_i32 = arith.constant 0 : i32
    %c0_i32_0 = arith.constant 0 : i32
    %c0_i32_1 = arith.constant 0 : i32
    return %c0_i32, %c0_i32_0 : i32, i32
  }
  func.func @transform_20(%arg0: i32) -> (i32, i32) {
    %c0_i32 = arith.constant 0 : i32
    %c0_i32_0 = arith.constant 0 : i32
    %c0_i32_1 = arith.constant 0 : i32
    return %c0_i32, %c0_i32_0 : i32, i32
  }
  func.func @transform_21(%arg0: i32) -> (i32, i32) {
    %c0_i32 = arith.constant 0 : i32
    %c0_i32_0 = arith.constant 0 : i32
    %c0_i32_1 = arith.constant 0 : i32
    return %c0_i32, %c0_i32_0 : i32, i32
  }
  func.func @transform_22(%arg0: i32) -> (i32, i32) {
    %c0_i32 = arith.constant 0 : i32
    %c0_i32_0 = arith.constant 0 : i32
    %c0_i32_1 = arith.constant 0 : i32
    return %c0_i32, %c0_i32_0 : i32, i32
  }
  func.func @transform_23(%arg0: i32) -> (i32, i32) {
    %c0_i32 = arith.constant 0 : i32
    %c0_i32_0 = arith.constant 0 : i32
    %c0_i32_1 = arith.constant 0 : i32
    return %c0_i32, %c0_i32_0 : i32, i32
  }
}

</mosaic_0001>

<bundles_post_ra>
// kernel: cnn_lstm_forward.1
= control target key start
LH: loop header
LB: loop body
LE: loop exit
PB: predicated region body
PF: predicated region fallthrough
CT: control target
= control target key end

     0   :  { %s7786_s0 = inlined_call_operand.vmem [shape: f32[2,4,5,4], index: 0, kind: input, shape index: {}]   ;;  %s7787_s1 = inlined_call_operand.hbm [shape: f32[4,4,32], index: 1, kind: input, shape index: {}]   ;;  %s7788_s2 = inlined_call_operand.hbm [shape: f32[1,32], index: 2, kind: input, shape index: {}]   ;;  %s7789_s3 = inlined_call_operand.hbm [shape: f32[1,32], index: 3, kind: input, shape index: {}]   ;;  %s7790_s4 = inlined_call_operand.hbm [shape: f32[1,32], index: 4, kind: input, shape index: {}]   ;;  %s7791_s5 = inlined_call_operand.vmem [shape: f32[4,32,32], index: 5, kind: input, shape index: {}]   ;;  %s7792_s6 = inlined_call_operand.hbm [shape: f32[1,32], index: 6, kind: input, shape index: {}]   ;;  %s7793_s7 = inlined_call_operand.hbm [shape: f32[1,32], index: 7, kind: input, shape index: {}]   ;;  %s7794_s8 = inlined_call_operand.hbm [shape: f32[1,32], index: 8, kind: input, shape index: {}]   ;;  %s7795_s9 = inlined_call_operand.vmem [shape: f32[32,64], index: 9, kind: input, shape index: {}]   ;;  %s7796_s10 = inlined_call_operand.hbm [shape: f32[16,64], index: 10, kind: input, shape index: {}]   ;;  %s7797_s11 = inlined_call_operand.hbm [shape: f32[1,64], index: 11, kind: input, shape index: {}]   ;;  %s7798_s12 = inlined_call_operand.vmem [shape: f32[32,64], index: 12, kind: input, shape index: {}]   ;;  %s7799_s13 = inlined_call_operand.hbm [shape: f32[16,64], index: 13, kind: input, shape index: {}]   ;;  %s7800_s14 = inlined_call_operand.hbm [shape: f32[1,64], index: 14, kind: input, shape index: {}]   ;;  %s7801_s15 = inlined_call_operand.vmem [shape: f32[128,128], index: 15, kind: input, shape index: {}]   ;;  %s7802_s16 = inlined_call_operand.hbm [shape: f32[1,128], index: 16, kind: input, shape index: {}]   ;;  %s7803_s17 = inlined_call_operand.hbm [shape: f32[1,128], index: 17, kind: input, shape index: {}]   ;;  %s7804_s18 = inlined_call_operand.hbm [shape: f32[1,128], index: 18, kind: input, shape index: {}]   ;;  %s7805_s19 = inlined_call_operand.vmem [shape: f32[128,256], index: 19, kind: input, shape index: {}]   ;;  %s7806_s20 = inlined_call_operand.hbm [shape: f32[1,256], index: 20, kind: input, shape index: {}]   ;;  %s7807_s21 = inlined_call_operand.vmem [shape: f32[256,5], index: 21, kind: input, shape index: {}]   ;;  %s7808_s22 = inlined_call_operand.hbm [shape: f32[1,5], index: 22, kind: input, shape index: {}]   ;;  %s7809_s23 = inlined_call_operand.hbm [shape: f32[2,5], index: 23, kind: output, shape index: {}]  }
   0x1   :  { %7819 = sst [smem:[#allocation42_spill]] %s7786_s0 }
   0x2   :  { %7820 = sst [smem:[#allocation43_spill]] %s7787_s1 }
   0x3   :  { %7821 = sst [smem:[#allocation44_spill]] %s7788_s2 }
   0x4   :  { %7822 = sst [smem:[#allocation45_spill]] %s7789_s3 }
   0x5   :  { %7823 = sst [smem:[#allocation46_spill]] %s7790_s4 }
   0x6   :  { %7824 = sst [smem:[#allocation47_spill]] %s7791_s5 }
   0x7   :  { %7825 = sst [smem:[#allocation48_spill]] %s7792_s6 }
   0x8   :  { %7826 = sst [smem:[#allocation49_spill]] %s7793_s7 }
   0x9   :  { %7827 = sst [smem:[#allocation50_spill]] %s7809_s23 }
   0xa   :  { %28 = vsyncpa [#allocation6], 0 }
   0xb   :  { %29 = vsyncpa [#allocation9], 0 }
   0xc   :  { %30 = vsyncpa [#allocation12], 0 }
   0xd   :  { %31 = vsyncpa [#allocation15], 0 }
   0xe   :  { %32 = vsyncpa [#allocation18], 0 }
   0xf   :  { %33 = vsyncpa [#allocation21], 0 }
  0x10   :  { %34 = vsyncpa [#allocation24], 0 }
  0x11   :  { %35 = vsyncpa [#allocation27], 0 }
  0x12   :  { %36 = vsyncpa [#allocation30], 0 }
  0x13   :  { %37 = vsyncpa [#allocation7], 0  ;;  %s6551_s4 = smov [#allocation8]   ;;  %s6552_s24 = smov [#allocation11]  }
  0x14   :  { %s58_s30 = sshll.u32 %s6551_s4, 4  ;;  %s78_s25 = sshll.u32 %s6552_s24, 4  ;;  %s59_s30 = int_to_ptr.vmem [resolvable:$true] %s58_s30  ;;  %s79_s25 = int_to_ptr.vmem [resolvable:$true] %s78_s25 }
  0x15   :  { %s7828_s26 = sld [smem:[#allocation44_spill]] }
  0x1b   :  { %s6157_s2 = scalar_lea.hbm %s7828_s26, 16 }
  0x1c   :  { %p6158_p0 = scmp.ne.s32.totalorder %s7828_s26, %s6157_s2  ;;  %p6161_p1 = scmp.lt.u32.totalorder %s6157_s2, %s7828_s26 }
  0x1e   :  { %p6163_p2 = pnand %p6161_p1, %p6158_p0 }
  0x20   :  { %6166 = shalt.err (!%p6163_p2)
}
  0x21   :  { %s6167_s29 = scalar_lea.vmem %s59_s30, 16  ;;  %s6171_s3 = scalar_lea.vmem %s59_s30, 32 }
  0x22   :  { %p6168_p3 = scmp.ne.s32.totalorder %s59_s30, %s6167_s29  ;;  %p6172_p4 = scmp.lt.s32.totalorder %s59_s30, %s59_s30 }
  0x23   :  { %p6173_p5 = scmp.lt.s32.totalorder %s6171_s3, %s6167_s29 }
  0x25   :  { %p6174_p6 = por %p6173_p5, %p6172_p4 }
  0x27   :  { %p6175_p7 = pnand %p6174_p6, %p6168_p3 }
  0x29   :  { %6178 = shalt.err (!%p6175_p7)
}
  0x2a   :  { %61 = dma.hbm_to_vmem [thread:$0]  %s7828_s26, 16, %s59_s30, [#allocation9]  }
  0x2b   :  { %s7829_s1 = sld [smem:[#allocation46_spill]] }
  0x31   :  { %s6179_s6 = scalar_lea.hbm %s7829_s1, 16 }
  0x32   :  { %p6180_p8 = scmp.ne.s32.totalorder %s7829_s1, %s6179_s6  ;;  %p6183_p9 = scmp.lt.u32.totalorder %s6179_s6, %s7829_s1 }
  0x34   :  { %p6185_p10 = pnand %p6183_p9, %p6180_p8 }
  0x36   :  { %6188 = shalt.err (!%p6185_p10)
}
  0x37   :  { %s6189_s29 = scalar_lea.vmem %s79_s25, 16  ;;  %s6193_s3 = scalar_lea.vmem %s79_s25, 32 }
  0x38   :  { %p6190_p11 = scmp.ne.s32.totalorder %s79_s25, %s6189_s29  ;;  %p6194_p12 = scmp.lt.s32.totalorder %s79_s25, %s79_s25 }
  0x39   :  { %p6195_p13 = scmp.lt.s32.totalorder %s6193_s3, %s6189_s29 }
  0x3b   :  { %p6196_p0 = por %p6195_p13, %p6194_p12 }
  0x3d   :  { %p6197_p1 = pnand %p6196_p0, %p6190_p11 }
  0x3f   :  { %6200 = shalt.err (!%p6197_p1)
}
  0x40   :  { %81 = dma.hbm_to_vmem [thread:$0]  %s7829_s1, 16, %s79_s25, [#allocation12]  }
  0x41   :  { %s6553_s0 = smov [#allocation14]   ;;  %s6554_s24 = smov [#allocation17]  }
  0x42   :  { %s100_s4 = sshll.u32 %s6553_s0, 4  ;;  %s121_s5 = sshll.u32 %s6554_s24, 4  ;;  %s101_s4 = int_to_ptr.vmem [resolvable:$true] %s100_s4  ;;  %s6725_s5 = int_to_ptr.vmem [resolvable:$true] %s121_s5 }
  0x43   :  { %s7830_s2 = sld [smem:[#allocation49_spill]] }
  0x49   :  { %s6201_s7 = scalar_lea.hbm %s7830_s2, 16 }
  0x4a   :  { %p6202_p2 = scmp.ne.s32.totalorder %s7830_s2, %s6201_s7  ;;  %p6205_p3 = scmp.lt.u32.totalorder %s6201_s7, %s7830_s2 }
  0x4c   :  { %p6207_p4 = pnand %p6205_p3, %p6202_p2 }
  0x4e   :  { %6210 = shalt.err (!%p6207_p4)
}
  0x4f   :  { %s6211_s25 = scalar_lea.vmem %s101_s4, 16  ;;  %s6215_s1 = scalar_lea.vmem %s101_s4, 32 }
  0x50   :  { %p6212_p5 = scmp.ne.s32.totalorder %s101_s4, %s6211_s25  ;;  %p6216_p6 = scmp.lt.s32.totalorder %s101_s4, %s101_s4 }
  0x51   :  { %p6217_p7 = scmp.lt.s32.totalorder %s6215_s1, %s6211_s25 }
  0x53   :  { %p6218_p8 = por %p6217_p7, %p6216_p6 }
  0x55   :  { %p6219_p9 = pnand %p6218_p8, %p6212_p5 }
  0x57   :  { %6222 = shalt.err (!%p6219_p9)
}
  0x58   :  { %103 = dma.hbm_to_vmem [thread:$0]  %s7830_s2, 16, %s101_s4, [#allocation15]  }
  0x59   :  { %s6223_s6 = scalar_lea.hbm %s7796_s10, 256 }
  0x5a   :  { %p6224_p10 = scmp.ne.s32.totalorder %s7796_s10, %s6223_s6  ;;  %p6227_p11 = scmp.lt.u32.totalorder %s6223_s6, %s7796_s10 }
  0x5c   :  { %p6229_p12 = pnand %p6227_p11, %p6224_p10 }
  0x5e   :  { %6232 = shalt.err (!%p6229_p12)
}
  0x5f   :  { %s6233_s29 = scalar_lea.vmem %s6725_s5, 256  ;;  %p6238_p0 = scmp.lt.s32.totalorder %s6725_s5, %s6725_s5 }
  0x60   :  { %p6234_p13 = scmp.ne.s32.totalorder %s6725_s5, %s6233_s29  ;;  %p6239_p1 = scmp.lt.s32.totalorder %s6233_s29, %s6233_s29 }
  0x62   :  { %p6240_p2 = por %p6239_p1, %p6238_p0 }
  0x64   :  { %p6241_p3 = pnand %p6240_p2, %p6234_p13 }
  0x66   :  { %6244 = shalt.err (!%p6241_p3)
}
  0x67   :  { %s6555_s4 = smov 128   ;;  %s6556_s2 = smov 8  }
  0x68   :  { %127 = dma.hbm_to_vmem [thread:$0]  %s7796_s10, 256, %s6725_s5, [#allocation18], %s6555_s4, %s6555_s4, %s6556_s2  }
  0x69   :  { %s6557_s1 = smov [#allocation20]   ;;  %s6558_s26 = smov [#allocation23]  }
  0x6a   :  { %s145_s30 = sshll.u32 %s6557_s1, 4  ;;  %s170_s0 = sshll.u32 %s6558_s26, 4  ;;  %s146_s30 = int_to_ptr.vmem [resolvable:$true] %s145_s30  ;;  %s171_s0 = int_to_ptr.vmem [resolvable:$true] %s170_s0 }
  0x6b   :  { %s6245_s23 = scalar_lea.hbm %s7799_s13, 256 }
  0x6c   :  { %p6246_p4 = scmp.ne.s32.totalorder %s7799_s13, %s6245_s23  ;;  %p6249_p5 = scmp.lt.u32.totalorder %s6245_s23, %s7799_s13 }
  0x6e   :  { %p6251_p6 = pnand %p6249_p5, %p6246_p4 }
  0x70   :  { %6254 = shalt.err (!%p6251_p6)
}
  0x71   :  { %s6255_s10 = scalar_lea.vmem %s146_s30, 256  ;;  %p6260_p8 = scmp.lt.s32.totalorder %s146_s30, %s146_s30 }
  0x72   :  { %p6256_p7 = scmp.ne.s32.totalorder %s146_s30, %s6255_s10  ;;  %p6261_p9 = scmp.lt.s32.totalorder %s6255_s10, %s6255_s10 }
  0x74   :  { %p6262_p10 = por %p6261_p9, %p6260_p8 }
  0x76   :  { %p6263_p11 = pnand %p6262_p10, %p6256_p7 }
  0x78   :  { %6266 = shalt.err (!%p6263_p11)
}
  0x79   :  { %151 = dma.hbm_to_vmem [thread:$0]  %s7799_s13, 256, %s146_s30, [#allocation21], %s6555_s4, %s6555_s4, %s6556_s2  }
  0x7a   :  { %s6267_s26 = scalar_lea.hbm %s7802_s16, 16 }
  0x7b   :  { %p6268_p12 = scmp.ne.s32.totalorder %s7802_s16, %s6267_s26  ;;  %p6271_p13 = scmp.lt.u32.totalorder %s6267_s26, %s7802_s16 }
  0x7d   :  { %p6273_p0 = pnand %p6271_p13, %p6268_p12 }
  0x7f   :  { %6276 = shalt.err (!%p6273_p0)
}
  0x80   :  { %s6277_s7 = scalar_lea.vmem %s171_s0, 16  ;;  %s6281_s28 = scalar_lea.vmem %s171_s0, 32 }
  0x81   :  { %p6278_p1 = scmp.ne.s32.totalorder %s171_s0, %s6277_s7  ;;  %p6282_p2 = scmp.lt.s32.totalorder %s171_s0, %s171_s0 }
  0x82   :  { %p6283_p3 = scmp.lt.s32.totalorder %s6281_s28, %s6277_s7 }
  0x84   :  { %p6284_p4 = por %p6283_p3, %p6282_p2 }
  0x86   :  { %p6285_p5 = pnand %p6284_p4, %p6278_p1 }
  0x88   :  { %6288 = shalt.err (!%p6285_p5)
}
  0x89   :  { %173 = dma.hbm_to_vmem [thread:$0]  %s7802_s16, 16, %s171_s0, [#allocation24]  }
  0x8a   :  { %s6559_s2 = smov [#allocation26]   ;;  %s6560_s29 = smov [#allocation5]  }
  0x8b   :  { %s190_s30 = sshll.u32 %s6559_s2, 4  ;;  %s45_s10 = sshll.u32 %s6560_s29, 4  ;;  %s191_s30 = int_to_ptr.vmem [resolvable:$true] %s190_s30  ;;  %s6780_s10 = int_to_ptr.vmem [resolvable:$true] %s45_s10 }
  0x8c   :  { %s6289_s25 = scalar_lea.hbm %s7804_s18, 16 }
  0x8d   :  { %p6290_p6 = scmp.ne.s32.totalorder %s7804_s18, %s6289_s25  ;;  %p6293_p7 = scmp.lt.u32.totalorder %s6289_s25, %s7804_s18 }
  0x8f   :  { %p6295_p8 = pnand %p6293_p7, %p6290_p6 }
  0x91   :  { %6298 = shalt.err (!%p6295_p8)
}
  0x92   :  { %s6299_s16 = scalar_lea.vmem %s191_s30, 16  ;;  %s6303_s0 = scalar_lea.vmem %s191_s30, 32 }
  0x93   :  { %p6300_p9 = scmp.ne.s32.totalorder %s191_s30, %s6299_s16  ;;  %p6304_p10 = scmp.lt.s32.totalorder %s191_s30, %s191_s30 }
  0x94   :  { %p6305_p11 = scmp.lt.s32.totalorder %s6303_s0, %s6299_s16 }
  0x96   :  { %p6306_p12 = por %p6305_p11, %p6304_p10 }
  0x98   :  { %p6307_p13 = pnand %p6306_p12, %p6300_p9 }
  0x9a   :  { %6310 = shalt.err (!%p6307_p13)
}
  0x9b   :  { %193 = dma.hbm_to_vmem [thread:$0]  %s7804_s18, 16, %s191_s30, [#allocation27]  }
  0x9c   :  { %s7831_s13 = sld [smem:[#allocation43_spill]] }
  0xa2   :  { %s6311_s4 = scalar_lea.hbm %s7831_s13, 256 }
  0xa3   :  { %p6312_p0 = scmp.ne.s32.totalorder %s7831_s13, %s6311_s4  ;;  %p6315_p1 = scmp.lt.u32.totalorder %s6311_s4, %s7831_s13 }
  0xa5   :  { %p6317_p2 = pnand %p6315_p1, %p6312_p0 }
  0xa7   :  { %6320 = shalt.err (!%p6317_p2)
}
  0xa8   :  { %s6321_s25 = scalar_lea.vmem %s6780_s10, 256  ;;  %p6326_p4 = scmp.lt.s32.totalorder %s6780_s10, %s6780_s10 }
  0xa9   :  { %p6322_p3 = scmp.ne.s32.totalorder %s6780_s10, %s6321_s25  ;;  %p6327_p5 = scmp.lt.s32.totalorder %s6321_s25, %s6321_s25 }
  0xab   :  { %p6328_p6 = por %p6327_p5, %p6326_p4 }
  0xad   :  { %p6329_p7 = pnand %p6328_p6, %p6322_p3 }
  0xaf   :  { %6332 = shalt.err (!%p6329_p7)
}
  0xb0   :  { %s6561_s18 = smov 64   ;;  %s6562_s30 = smov 4  }
  0xb1   :  { %51 = dma.hbm_to_vmem [thread:$0]  %s7831_s13, 256, %s6780_s10, [#allocation6], %s6561_s18, %s6561_s18, %s6562_s30  }
  0xb2   :  { %s6563_s24 = smov [#allocation10]   ;;  %s6564_s16 = smov [#allocation13]  }
  0xb3   :  { %s68_s6 = sshll.u32 %s6563_s24, 4  ;;  %s90_s0 = sshll.u32 %s6564_s16, 4  ;;  %s69_s6 = int_to_ptr.vmem [resolvable:$true] %s68_s6  ;;  %s91_s0 = int_to_ptr.vmem [resolvable:$true] %s90_s0 }
  0xb4   :  { %s7832_s7 = sld [smem:[#allocation45_spill]] }
  0xba   :  { %s6333_s28 = scalar_lea.hbm %s7832_s7, 16 }
  0xbb   :  { %p6334_p8 = scmp.ne.s32.totalorder %s7832_s7, %s6333_s28  ;;  %p6337_p9 = scmp.lt.u32.totalorder %s6333_s28, %s7832_s7 }
  0xbd   :  { %p6339_p10 = pnand %p6337_p9, %p6334_p8 }
  0xbf   :  { %6342 = shalt.err (!%p6339_p10)
}
  0xc0   :  { %s6343_s10 = scalar_lea.vmem %s69_s6, 16  ;;  %s6347_s13 = scalar_lea.vmem %s69_s6, 32 }
  0xc1   :  { %p6344_p11 = scmp.ne.s32.totalorder %s69_s6, %s6343_s10  ;;  %p6348_p12 = scmp.lt.s32.totalorder %s69_s6, %s69_s6 }
  0xc2   :  { %p6349_p13 = scmp.lt.s32.totalorder %s6347_s13, %s6343_s10 }
  0xc4   :  { %p6350_p0 = por %p6349_p13, %p6348_p12 }
  0xc6   :  { %p6351_p1 = pnand %p6350_p0, %p6344_p11 }
  0xc8   :  { %6354 = shalt.err (!%p6351_p1)
}
  0xc9   :  { %71 = dma.hbm_to_vmem [thread:$0]  %s7832_s7, 16, %s69_s6, [#allocation9]  }
  0xca   :  { %s7833_s26 = sld [smem:[#allocation48_spill]] }
  0xd0   :  { %s6355_s24 = scalar_lea.hbm %s7833_s26, 16 }
  0xd1   :  { %p6356_p2 = scmp.ne.s32.totalorder %s7833_s26, %s6355_s24  ;;  %p6359_p3 = scmp.lt.u32.totalorder %s6355_s24, %s7833_s26 }
  0xd3   :  { %p6361_p4 = pnand %p6359_p3, %p6356_p2 }
  0xd5   :  { %6364 = shalt.err (!%p6361_p4)
}
  0xd6   :  { %s6365_s4 = scalar_lea.vmem %s91_s0, 16  ;;  %s6369_s2 = scalar_lea.vmem %s91_s0, 32 }
  0xd7   :  { %p6366_p5 = scmp.ne.s32.totalorder %s91_s0, %s6365_s4  ;;  %p6370_p6 = scmp.lt.s32.totalorder %s91_s0, %s91_s0 }
  0xd8   :  { %p6371_p7 = scmp.lt.s32.totalorder %s6369_s2, %s6365_s4 }
  0xda   :  { %p6372_p8 = por %p6371_p7, %p6370_p6 }
  0xdc   :  { %p6373_p9 = pnand %p6372_p8, %p6366_p5 }
  0xde   :  { %6376 = shalt.err (!%p6373_p9)
}
  0xdf   :  { %93 = dma.hbm_to_vmem [thread:$0]  %s7833_s26, 16, %s91_s0, [#allocation12]  }
  0xe0   :  { %s6565_s29 = smov [#allocation16]   ;;  %s6566_s10 = smov [#allocation19]  }
  0xe1   :  { %s110_s5 = sshll.u32 %s6565_s29, 4  ;;  %s134_s13 = sshll.u32 %s6566_s10, 4  ;;  %s111_s5 = int_to_ptr.vmem [resolvable:$true] %s110_s5  ;;  %s135_s13 = int_to_ptr.vmem [resolvable:$true] %s134_s13 }
  0xe2   :  { %s6377_s30 = scalar_lea.hbm %s7794_s8, 16 }
  0xe3   :  { %p6378_p10 = scmp.ne.s32.totalorder %s7794_s8, %s6377_s30  ;;  %p6381_p11 = scmp.lt.u32.totalorder %s6377_s30, %s7794_s8 }
  0xe5   :  { %p6383_p12 = pnand %p6381_p11, %p6378_p10 }
  0xe7   :  { %6386 = shalt.err (!%p6383_p12)
}
  0xe8   :  { %s6387_s0 = scalar_lea.vmem %s111_s5, 16  ;;  %s6391_s26 = scalar_lea.vmem %s111_s5, 32 }
  0xe9   :  { %p6388_p13 = scmp.ne.s32.totalorder %s111_s5, %s6387_s0  ;;  %p6392_p0 = scmp.lt.s32.totalorder %s111_s5, %s111_s5 }
  0xea   :  { %p6393_p1 = scmp.lt.s32.totalorder %s6391_s26, %s6387_s0 }
  0xec   :  { %p6394_p2 = por %p6393_p1, %p6392_p0 }
  0xee   :  { %p6395_p3 = pnand %p6394_p2, %p6388_p13 }
  0xf0   :  { %6398 = shalt.err (!%p6395_p3)
}
  0xf1   :  { %113 = dma.hbm_to_vmem [thread:$0]  %s7794_s8, 16, %s111_s5, [#allocation15]  }
  0xf2   :  { %s6399_s6 = scalar_lea.hbm %s7797_s11, 16 }
  0xf3   :  { %p6400_p4 = scmp.ne.s32.totalorder %s7797_s11, %s6399_s6  ;;  %p6403_p5 = scmp.lt.u32.totalorder %s6399_s6, %s7797_s11 }
  0xf5   :  { %p6405_p6 = pnand %p6403_p5, %p6400_p4 }
  0xf7   :  { %6408 = shalt.err (!%p6405_p6)
}
  0xf8   :  { %s6409_s25 = scalar_lea.vmem %s135_s13, 16  ;;  %s6413_s30 = scalar_lea.vmem %s135_s13, 32 }
  0xf9   :  { %p6410_p7 = scmp.ne.s32.totalorder %s135_s13, %s6409_s25  ;;  %p6414_p8 = scmp.lt.s32.totalorder %s135_s13, %s135_s13 }
  0xfa   :  { %p6415_p9 = scmp.lt.s32.totalorder %s6413_s30, %s6409_s25 }
  0xfc   :  { %p6416_p10 = por %p6415_p9, %p6414_p8 }
  0xfe   :  { %p6417_p11 = pnand %p6416_p10, %p6410_p7 }
 0x100   :  { %6420 = shalt.err (!%p6417_p11)
}
 0x101   :  { %137 = dma.hbm_to_vmem [thread:$0]  %s7797_s11, 16, %s135_s13, [#allocation18]  }
 0x102   :  { %s6567_s1 = smov [#allocation22]   ;;  %s6568_s16 = smov [#allocation25]  }
 0x103   :  { %s158_s24 = sshll.u32 %s6567_s1, 4  ;;  %s180_s23 = sshll.u32 %s6568_s16, 4  ;;  %s159_s24 = int_to_ptr.vmem [resolvable:$true] %s158_s24  ;;  %s181_s23 = int_to_ptr.vmem [resolvable:$true] %s180_s23 }
 0x104   :  { %s6421_s27 = scalar_lea.hbm %s7800_s14, 16 }
 0x105   :  { %p6422_p12 = scmp.ne.s32.totalorder %s7800_s14, %s6421_s27  ;;  %p6425_p13 = scmp.lt.u32.totalorder %s6421_s27, %s7800_s14 }
 0x107   :  { %p6427_p0 = pnand %p6425_p13, %p6422_p12 }
 0x109   :  { %6430 = shalt.err (!%p6427_p0)
}
 0x10a   :  { %s6431_s11 = scalar_lea.vmem %s159_s24, 16  ;;  %s6435_s13 = scalar_lea.vmem %s159_s24, 32 }
 0x10b   :  { %p6432_p1 = scmp.ne.s32.totalorder %s159_s24, %s6431_s11  ;;  %p6436_p2 = scmp.lt.s32.totalorder %s159_s24, %s159_s24 }
 0x10c   :  { %p6437_p3 = scmp.lt.s32.totalorder %s6435_s13, %s6431_s11 }
 0x10e   :  { %p6438_p4 = por %p6437_p3, %p6436_p2 }
 0x110   :  { %p6439_p5 = pnand %p6438_p4, %p6432_p1 }
 0x112   :  { %6442 = shalt.err (!%p6439_p5)
}
 0x113   :  { %161 = dma.hbm_to_vmem [thread:$0]  %s7800_s14, 16, %s159_s24, [#allocation21]  }
 0x114   :  { %s6443_s25 = scalar_lea.hbm %s7803_s17, 16 }
 0x115   :  { %p6444_p6 = scmp.ne.s32.totalorder %s7803_s17, %s6443_s25  ;;  %p6447_p7 = scmp.lt.u32.totalorder %s6443_s25, %s7803_s17 }
 0x117   :  { %p6449_p8 = pnand %p6447_p7, %p6444_p6 }
 0x119   :  { %6452 = shalt.err (!%p6449_p8)
}
 0x11a   :  { %s6453_s16 = scalar_lea.vmem %s181_s23, 16  ;;  %s6457_s0 = scalar_lea.vmem %s181_s23, 32 }
 0x11b   :  { %p6454_p9 = scmp.ne.s32.totalorder %s181_s23, %s6453_s16  ;;  %p6458_p10 = scmp.lt.s32.totalorder %s181_s23, %s181_s23 }
 0x11c   :  { %p6459_p11 = scmp.lt.s32.totalorder %s6457_s0, %s6453_s16 }
 0x11e   :  { %p6460_p12 = por %p6459_p11, %p6458_p10 }
 0x120   :  { %p6461_p13 = pnand %p6460_p12, %p6454_p9 }
 0x122   :  { %6464 = shalt.err (!%p6461_p13)
}
 0x123   :  { %183 = dma.hbm_to_vmem [thread:$0]  %s7803_s17, 16, %s181_s23, [#allocation24]  }
 0x124   :  { %s6569_s26 = smov [#allocation28]   ;;  %s6570_s28 = smov [#allocation29]  }
 0x125   :  { %s202_s27 = sshll.u32 %s6569_s26, 4  ;;  %s214_s4 = sshll.u32 %s6570_s28, 4  ;;  %s203_s27 = int_to_ptr.vmem [resolvable:$true] %s202_s27  ;;  %s215_s4 = int_to_ptr.vmem [resolvable:$true] %s214_s4 }
 0x126   :  { %s6465_s11 = scalar_lea.hbm %s7806_s20, 32 }
 0x127   :  { %p6466_p0 = scmp.ne.s32.totalorder %s7806_s20, %s6465_s11  ;;  %p6469_p1 = scmp.lt.u32.totalorder %s6465_s11, %s7806_s20 }
 0x129   :  { %p6471_p2 = pnand %p6469_p1, %p6466_p0 }
 0x12b   :  { %6474 = shalt.err (!%p6471_p2)
}
 0x12c   :  { %s6475_s17 = scalar_lea.vmem %s203_s27, 32  ;;  %p6480_p4 = scmp.lt.s32.totalorder %s203_s27, %s203_s27 }
 0x12d   :  { %p6476_p3 = scmp.ne.s32.totalorder %s203_s27, %s6475_s17  ;;  %p6481_p5 = scmp.lt.s32.totalorder %s6475_s17, %s6475_s17 }
 0x12f   :  { %p6482_p6 = por %p6481_p5, %p6480_p4 }
 0x131   :  { %p6483_p7 = pnand %p6482_p6, %p6476_p3 }
 0x133   :  { %6486 = shalt.err (!%p6483_p7)
}
 0x134   :  { %205 = dma.hbm_to_vmem [thread:$0]  %s7806_s20, 32, %s203_s27, [#allocation27]  }
 0x135   :  { %s6487_s8 = scalar_lea.hbm %s7808_s22, 16 }
 0x136   :  { %p6488_p8 = scmp.ne.s32.totalorder %s7808_s22, %s6487_s8  ;;  %p6491_p9 = scmp.lt.u32.totalorder %s6487_s8, %s7808_s22 }
 0x138   :  { %p6493_p10 = pnand %p6491_p9, %p6488_p8 }
 0x13a   :  { %6496 = shalt.err (!%p6493_p10)
}
 0x13b   :  { %s6497_s14 = scalar_lea.vmem %s215_s4, 16  ;;  %s6501_s24 = scalar_lea.vmem %s215_s4, 32 }
 0x13c   :  { %p6498_p11 = scmp.ne.s32.totalorder %s215_s4, %s6497_s14  ;;  %p6502_p12 = scmp.lt.s32.totalorder %s215_s4, %s215_s4 }
 0x13d   :  { %p6503_p13 = scmp.lt.s32.totalorder %s6501_s24, %s6497_s14 }
 0x13f   :  { %p6504_p0 = por %p6503_p13, %p6502_p12 }
 0x141   :  { %p6505_p1 = pnand %p6504_p0, %p6498_p11 }
 0x143   :  { %6508 = shalt.err (!%p6505_p1)
}
 0x144   :  { %217 = dma.hbm_to_vmem [thread:$0]  %s7808_s22, 16, %s215_s4, [#allocation30]  }
 0x145   :  { %6531 = dma.done.wait [#allocation6], 256  }
 0x146   :  { %6532 = vsyncadd [#allocation6], 4294967040 }
 0x147   :  { %6533 = dma.done.wait [#allocation9], 32  }
 0x148   :  { %6534 = vsyncadd [#allocation9], 4294967264 }
 0x149   :  { %6535 = dma.done.wait [#allocation12], 32  }
 0x14a   :  { %6536 = vsyncadd [#allocation12], 4294967264 }
 0x14b   :  { %6537 = dma.done.wait [#allocation15], 32  }
 0x14c   :  { %6538 = vsyncadd [#allocation15], 4294967264 }
 0x14d   :  { %6539 = dma.done.wait [#allocation18], 272  }
 0x14e   :  { %6540 = vsyncadd [#allocation18], 4294967024 }
 0x14f   :  { %6541 = dma.done.wait [#allocation21], 272  }
 0x150   :  { %6542 = vsyncadd [#allocation21], 4294967024 }
 0x151   :  { %6543 = dma.done.wait [#allocation24], 32  }
 0x152   :  { %6544 = vsyncadd [#allocation24], 4294967264 }
 0x153   :  { %6545 = dma.done.wait [#allocation27], 48  }
 0x154   :  { %6546 = vsyncadd [#allocation27], 4294967248 }
 0x155   :  { %6547 = dma.done.wait [#allocation30], 16  }
 0x156   :  { %6548 = vsyncadd [#allocation30], 4294967280  ;;  %v6571_v0 = vmov 0.0   ;;  %vm6572_vm0 = vmmov 0   ;;  %vm314_vm1 = vcmask 1043456   ;;  %vm310_vm2 = vcmask 31744  }
 0x157   :  { %5354 = vmatprep.subr.mxu0 %v6571_v0  ;;  %5379 = vmatprep.subr.mxu1 %v6571_v0  ;;  %v6915_v1 = vld [vmem:[#allocation5 + $0x4] sm:$0xf]  ;;  %v6917_v2 = vld [vmem:[#allocation5] sm:$0xf]  ;;  %s7834_s28 = sld [smem:[#allocation42_spill]]  ;;  %vm298_vm3 = vcmask 259072  }
 0x158   :  { %5356 = vmatprep.mubr.msk.f32.mxu0 %vm6572_vm0, %v6571_v0  ;;  %5381 = vmatprep.mubr.msk.f32.mxu1 %vm6572_vm0, %v6571_v0  ;;  %v6931_v4 = vld [vmem:[#allocation5 + $0x8] sm:$0xf]  ;;  %v6952_v7 = vld [vmem:[#allocation5 + $0xc] sm:$0xf]  ;;  %301 = vst.msk [vmem:[#allocation3] sm:$0x3f] %vm298_vm3, %v6571_v0 }
 0x159   :  { %5355 = vmatpush3.msk.msra.mxu0 %vm314_vm1, %v6915_v1  ;;  %5380 = vmatpush3.msk.msra.mxu1 %vm314_vm1, %v6917_v2  ;;  %299 = vst.msk [vmem:[#allocation2] sm:$0x3f] %vm298_vm3, %v6571_v0  ;;  %300 = vst.msk [vmem:[#allocation2 + $0x8] sm:$0x3f] %vm298_vm3, %v6571_v0  ;;  %s7835_s17 = sld [smem:[#allocation47_spill]]  ;;  %v6573_v17 = vmov 0.0|0.0  }
 0x15a   :  { %5359 = vmatprep.subr.mxu0 %v6571_v0  ;;  %5384 = vmatprep.subr.mxu1 %v6571_v0  ;;  %302 = vst.msk [vmem:[#allocation3 + $0x8] sm:$0x3f] %vm298_vm3, %v6571_v0  ;;  %v7080_v32 = vld [vmem:[#allocation8] ss:$0 sm:$0xff]  ;;  %v7083_v35 = vld [vmem:[#allocation10] ss:$0 sm:$0xff] }
 0x15b   :  { %v7085_v37 = vld [vmem:[#allocation11] ss:$0 sm:$0xff]  ;;  %vm1501_vm4 = vcmask 257024   ;;  %vm1506_vm5 = vcmask 261120   ;;  %s6575_s5 = smov 16   ;;  %s6576_s1 = smov 32  }
 0x15c   :  { %vm3873_vm6 = vcmask 130048   ;;  %s6578_s16 = smov 112   ;;  %s6579_s0 = smov 48   ;;  %vm4580_vm7 = vcmask 122880   ;;  %vm4586_vm8 = vcmask 254080   ;;  %vm4591_vm9 = vcmask 386305  }
 0x15d   :  { %v6922_v3 = vld [vmem:[%s7834_s28 + $0x8] sm:$0x1f]  ;;  %v303_v5 = vld [vmem:[%s7834_s28] sm:$0x1f]  ;;  %v5019_v6 = vld [vmem:[%s7834_s28 + $0x18] sm:$0x1f] }
 0x15e   :  { %5357 = vmatmul.mubr.msk.f32.vlgmr.msra.gmra.mrb[0].mxu0 %vm310_vm2, %v6922_v3  ;;  %5382 = vmatmul.mubr.msk.f32.vlgmr.msra.gmra.mrb[0].mxu1 %vm310_vm2, %v6922_v3  ;;  %v829_v8 = vrot.slane %v303_v5, 1  ;;  %v5018_v9 = vld [vmem:[%s7834_s28 + $0x10] sm:$0x1f]  ;;  %v1114_v10 = vrot.slane %v6922_v3, 1  ;;  %vm4593_vm10 = vcmask 517505   ;;  %vm4598_vm11 = vcmask 649730  }
 0x15f   :  { %5360 = vmatpush3.msk.msra.mxu0 %vm314_vm1, %v6917_v2  ;;  %5361 = vmatprep.mubr.msk.f32.mxu0 %vm6572_vm0, %v6571_v0  ;;  %v1399_v11 = vrot.slane %v5018_v9, 1  ;;  %v5005_v12 = vld [vmem:[%s7835_s17 + $0x20] sm:$0xff]  ;;  %v5006_v13 = vld [vmem:[%s7835_s17 + $0x28] sm:$0xff]  ;;  %v5007_v19 = vld [vmem:[%s7835_s17 + $0x30] sm:$0xff]  ;;  %vm4603_vm12 = vcmask 780930   ;;  %vm4608_vm13 = vcmask 913155  }
 0x160   :  { %5385 = vmatpush3.msk.msra.mxu1 %vm314_vm1, %v6931_v4  ;;  %5386 = vmatprep.mubr.msk.f32.mxu1 %vm6572_vm0, %v6571_v0  ;;  %v273_v14 = vld [vmem:[%s7835_s17] sm:$0xff]  ;;  %v7047_v15 = vpack.c.bf16 %v5006_v13, %v5005_v12  ;;  %v274_v16 = vld [vmem:[%s7835_s17 + $0x8] sm:$0xff]  ;;  %v5008_v20 = vld [vmem:[%s7835_s17 + $0x38] sm:$0xff]  ;;  %vm4613_vm14 = vcmask 1044355   ;;  %vm4980_vm15 = vcmask 33792  }
 0x161   :  { %5364 = vmatprep.subr.mxu0 %v6571_v0  ;;  %5389 = vmatprep.subr.mxu1 %v6571_v0  ;;  %v7054_v18 = vpack.c.bf16 %v274_v16, %v273_v14  ;;  %v275_v21 = vld [vmem:[%s7835_s17 + $0x10] sm:$0xff]  ;;  %v7069_v22 = vpack.c.bf16 %v5008_v20, %v5007_v19  ;;  %v276_v23 = vld [vmem:[%s7835_s17 + $0x18] sm:$0xff]  ;;  %v5009_v40 = vld [vmem:[%s7835_s17 + $0x40] sm:$0xff] }
 0x162   :  { %v7074_v24 = vpack.c.bf16 %v276_v23, %v275_v21  ;;  %v5010_v41 = vld [vmem:[%s7835_s17 + $0x48] sm:$0xff]  ;;  %v5011_v45 = vld [vmem:[%s7835_s17 + $0x50] sm:$0xff]  ;;  %v5012_v46 = vld [vmem:[%s7835_s17 + $0x58] sm:$0xff] }
 0x163   :  { %v7096_v44 = vpack.c.bf16 %v5010_v41, %v5009_v40  ;;  %v7111_v48 = vpack.c.bf16 %v5012_v46, %v5011_v45  ;;  %v5013_v49 = vld [vmem:[%s7835_s17 + $0x60] sm:$0xff]  ;;  %v5014_v50 = vld [vmem:[%s7835_s17 + $0x68] sm:$0xff]  ;;  %v5015_v53 = vld [vmem:[%s7835_s17 + $0x70] sm:$0xff] }
 0x164   :  { %v7127_v51 = vpack.c.bf16 %v5014_v50, %v5013_v49  ;;  %v5016_v54 = vld [vmem:[%s7835_s17 + $0x78] sm:$0xff]  ;;  %v3866_v46 = vld [vmem:[%s7795_s9] sm:$0xff]  ;;  %s6577_s17 = smov 80  }
 0x165   :  { %v7141_v58 = vpack.c.bf16 %v5016_v54, %v5015_v53  ;;  %v5064_v53 = vld [vmem:[#allocation14] ss:$0 sm:$0xff] }
 0x166   :  { %5362 = vmatmul.mubr.msk.f32.vlgmr.msra.gmra.mrb[0].mxu0 %vm310_vm2, %v303_v5  ;;  %5387 = vmatmul.mubr.msk.f32.vlgmr.msra.gmra.mrb[0].mxu1 %vm310_vm2, %v5019_v6  ;;  %v7165_v5 = vld [vmem:[%s7834_s28 + $0x30] sm:$0x1f] }
 0x167   :  { %5365 = vmatpush3.msk.msra.mxu0 %vm314_vm1, %v6931_v4  ;;  %5366 = vmatprep.mubr.msk.f32.mxu0 %vm6572_vm0, %v6571_v0  ;;  %v3192_v13 = vrot.slane %v7165_v5, 1 }
 0x168   :  { %5390 = vmatpush3.msk.msra.mxu1 %vm314_vm1, %v6952_v7  ;;  %5391 = vmatprep.mubr.msk.f32.mxu1 %vm6572_vm0, %v6571_v0 }
 0x169   :  { %5369 = vmatprep.subr.mxu0 %v6571_v0  ;;  %5414 = vmatprep.subr.mxu1 %v6571_v0 }
 0x16e   :  { %5367 = vmatmul.mubr.msk.f32.vlgmr.msra.gmra.mrb[0].mxu0 %vm310_vm2, %v5018_v9  ;;  %5392 = vmatmul.mubr.msk.f32.vlgmr.msra.gmra.mrb[0].mxu1 %vm310_vm2, %v829_v8 }
 0x16f   :  { %5370 = vmatpush3.msk.msra.mxu0 %vm314_vm1, %v6952_v7  ;;  %5415 = vmatpush3.msk.msra.mxu1 %vm314_vm1, %v6915_v1 }
 0x170   :  { %5416 = vmatprep.mubr.msk.f32.mxu1 %vm6572_vm0, %v6571_v0  ;;  %5371 = vmatprep.mubr.msk.f32.mxu0 %vm6572_vm0, %v6571_v0 }
 0x171   :  { %5374 = vmatprep.subr.mxu0 %v6571_v0  ;;  %5419 = vmatprep.subr.mxu1 %v6571_v0 }
 0x172   :  { %5417 = vmatmul.mubr.msk.f32.vlgmr.msra.gmra.mrb[2].mxu1 %vm310_vm2, %v829_v8 }
 0x173   :  { %5420 = vmatpush3.msk.msra.mxu1 %vm314_vm1, %v6917_v2  ;;  %5421 = vmatprep.mubr.msk.f32.mxu1 %vm6572_vm0, %v6571_v0 }
 0x174   :  { %5424 = vmatprep.subr.mxu1 %v6571_v0 }
 0x176   :  { %5372 = vmatmul.mubr.msk.f32.vlgmr.msra.gmra.mrb[0].mxu0 %vm310_vm2, %v5019_v6 }
 0x177   :  { %5375 = vmatpush3.msk.msra.mxu0 %vm314_vm1, %v6915_v1  ;;  %5376 = vmatprep.mubr.msk.f32.mxu0 %vm6572_vm0, %v6571_v0 }
 0x178   :  { %5394 = vmatprep.subr.mxu0 %v6571_v0 }
 0x17a   :  { %5377 = vmatmul.mubr.msk.f32.vlgmr.msra.gmra.mrb[2].mxu0 %vm310_vm2, %v5018_v9  ;;  %5422 = vmatmul.mubr.msk.f32.vlgmr.msra.gmra.mrb[2].mxu1 %vm310_vm2, %v5019_v6 }
 0x17b   :  { %5395 = vmatpush3.msk.msra.mxu0 %vm314_vm1, %v6915_v1  ;;  %5396 = vmatprep.mubr.msk.f32.mxu0 %vm6572_vm0, %v6571_v0 }
 0x17c   :  { %5399 = vmatprep.subr.mxu0 %v6571_v0  ;;  %5425 = vmatpush3.msk.msra.mxu1 %vm314_vm1, %v6931_v4 }
 0x17d   :  { %5426 = vmatprep.mubr.msk.f32.mxu1 %vm6572_vm0, %v6571_v0  ;;  %5429 = vmatprep.subr.mxu1 %v6571_v0 }
 0x17e   :  { %5397 = vmatmul.mubr.msk.f32.vlgmr.msra.gmra.mrb[4].mxu0 %vm310_vm2, %v5019_v6 }
 0x17f   :  { %5400 = vmatpush3.msk.msra.mxu0 %vm314_vm1, %v6917_v2  ;;  %5401 = vmatprep.mubr.msk.f32.mxu0 %vm6572_vm0, %v6571_v0 }
 0x180   :  { %5404 = vmatprep.subr.mxu0 %v6571_v0 }
 0x182   :  { %5427 = vmatmul.mubr.msk.f32.vlgmr.msra.gmra.mrb[2].mxu1 %vm310_vm2, %v1114_v10 }
 0x183   :  { %5430 = vmatpush3.msk.msra.mxu1 %vm314_vm1, %v6952_v7  ;;  %5431 = vmatprep.mubr.msk.f32.mxu1 %vm6572_vm0, %v6571_v0 }
 0x184   :  { %5815 = vmatprep.subr.bf16.mxu1 %v6573_v17 }
 0x186   :  { %5402 = vmatmul.mubr.msk.f32.vlgmr.msra.gmra.mrb[4].mxu0 %vm310_vm2, %v5018_v9  ;;  %v5069_v9 = vld [vmem:[%s7834_s28 + $0x38] sm:$0x1f] }
 0x187   :  { %5405 = vmatpush3.msk.msra.mxu0 %vm314_vm1, %v6931_v4  ;;  %5406 = vmatprep.mubr.msk.f32.mxu0 %vm6572_vm0, %v6571_v0 }
 0x188   :  { %5409 = vmatprep.subr.mxu0 %v6571_v0 }
 0x18a   :  { %5432 = vmatmul.mubr.msk.f32.vlgmr.msra.gmra.mrb[2].mxu1 %vm310_vm2, %v1399_v11 }
 0x18b   :  { %5475 = vmatprep.mubr.msk.f32.mxu1 %vm6572_vm0, %v6571_v0  ;;  %5817 = vmatpush3.bf16.msra.mxu1 %v7054_v18 }
 0x18c   :  { %5818 = vmatprep.subr.bf16.mxu1 %v6573_v17 }
 0x18e   :  { %5407 = vmatmul.mubr.msk.f32.vlgmr.msra.gmra.mrb[4].mxu0 %vm310_vm2, %v829_v8  ;;  %v7185_v8 = vld [vmem:[%s7834_s28 + $0x28] sm:$0x1f] }
 0x18f   :  { %5410 = vmatpush3.msk.msra.mxu0 %vm314_vm1, %v6952_v7  ;;  %5411 = vmatprep.mubr.msk.f32.mxu0 %vm6572_vm0, %v6571_v0  ;;  %v2907_v12 = vrot.slane %v7185_v8, 1 }
 0x190   :  { %5797 = vmatprep.subr.bf16.mxu0 %v6573_v17  ;;  %5820 = vmatpush3.bf16.msra.mxu1 %v7074_v24 }
 0x191   :  { %5827 = vmatprep.subr.bf16.mxu1 %v6573_v17 }
 0x196   :  { %5412 = vmatmul.mubr.msk.f32.vlgmr.msra.gmra.mrb[4].mxu0 %vm310_vm2, %v1114_v10  ;;  %v5066_v10 = vld [vmem:[%s7834_s28 + $0x20] sm:$0x1f] }
 0x197   :  { %5442 = vmatprep.mubr.msk.f32.mxu0 %vm6572_vm0, %v6571_v0  ;;  %5799 = vmatpush3.bf16.msra.mxu0 %v7047_v15  ;;  %v2622_v11 = vrot.slane %v5066_v10, 1 }
 0x198   :  { %5800 = vmatprep.subr.bf16.mxu0 %v6573_v17 }
 0x19b   :  { %5802 = vmatpush3.bf16.msra.mxu0 %v7069_v22 }
 0x19c   :  { %5803 = vmatprep.subr.bf16.mxu0 %v6573_v17 }
 0x241   :  { %v898_v25 = vpop.f32.mrb[0].mxu1 }
 0x242   :  { %v5393_v26 = vpop.f32.mrb[1].mxu1 }
 0x249   :  { %v613_v27 = vpop.f32.mrb[0].mxu0 }
 0x24a   :  { %v5373_v28 = vpop.f32.mrb[1].mxu0 }
 0x24d   :  { %v684_v29 = vpop.f32.mrb[2].mxu0 }
 0x24e   :  { %v6017_v30 = vadd.f32 %v898_v25, %v684_v29  ;;  %v5378_v31 = vpop.f32.mrb[3].mxu0 }
 0x250   :  { %v1473_v33 = vmax.f32 %v613_v27, %v6017_v30 }
 0x252   :  { %v1480_v34 = vadd.f32 %v7080_v32, %v1473_v33 }
 0x254   :  { %v1481_v36 = vmax.f32 %v1480_v34, 0.0 }
 0x256   :  { %v1488_v38 = vmul.f32 %v7083_v35, %v1481_v36 }
 0x258   :  { %v1495_v39 = vadd.f32 %v7085_v37, %v1488_v38 }
 0x25a   :  { %1503 = vst.msk [vmem:[#allocation3] sm:$0xf] %vm1501_vm4, %v1495_v39 }
 0x25d   :  { %v1468_v42 = vpop.f32.mrb[2].mxu1 }
 0x25e   :  { %v5433_v43 = vpop.f32.mrb[3].mxu1 }
 0x261   :  { %v7104_v47 = vld [vmem:[#allocation3] sm:$0x3f] }
 0x262   :  { %5443 = vmatmul.mubr.msk.f32.vlgmr.msra.gmra.mrb[6].mxu0 %vm1506_vm5, %v7104_v47  ;;  %5476 = vmatmul.mubr.msk.f32.vlgmr.msra.gmra.mrb[4].mxu1 %vm1506_vm5, %v7104_v47  ;;  %v1867_v52 = vrot.slane %v7104_v47, 1  ;;  %v3867_v47 = vld [vmem:[%s7795_s9 + $0x8] sm:$0xff] }
 0x263   :  { %5829 = vmatpush3.bf16.msra.mxu1 %v7096_v44  ;;  %5497 = vmatprep.mubr.msk.f32.mxu1 %vm6572_vm0, %v6571_v0 }
 0x264   :  { %5830 = vmatprep.subr.bf16.mxu1 %v6573_v17  ;;  %5805 = vmatpush3.bf16.msra.mxu0 %v7054_v18 }
 0x265   :  { %5806 = vmatprep.subr.bf16.mxu0 %v6573_v17  ;;  %5453 = vmatprep.mubr.msk.f32.mxu0 %vm6572_vm0, %v6571_v0 }
 0x267   :  { %5832 = vmatpush3.bf16.msra.mxu1 %v7111_v48 }
 0x268   :  { %5839 = vmatprep.subr.bf16.mxu1 %v6573_v17  ;;  %5808 = vmatpush3.bf16.msra.mxu0 %v7074_v24 }
 0x269   :  { %v1183_v55 = vpop.f32.mrb[4].mxu0  ;;  %5809 = vmatprep.subr.bf16.mxu0 %v6573_v17 }
 0x26a   :  { %v1496_v56 = vmax.f32 %v1183_v55, %v1468_v42  ;;  %v5413_v57 = vpop.f32.mrb[5].mxu0  ;;  %5498 = vmatmul.mubr.msk.f32.vlgmr.msra.gmra.mrb[4].mxu1 %vm1506_vm5, %v1867_v52 }
 0x26b   :  { %5841 = vmatpush3.bf16.msra.mxu1 %v7127_v51  ;;  %5519 = vmatprep.mubr.msk.f32.mxu1 %vm6572_vm0, %v6571_v0 }
 0x26c   :  { %v1497_v59 = vadd.f32 %v7080_v32, %v1496_v56  ;;  %5842 = vmatprep.subr.bf16.mxu1 %v6573_v17  ;;  %v5065_v56 = vld [vmem:[#allocation16] ss:$0 sm:$0xff] }
 0x26e   :  { %v1498_v60 = vmax.f32 %v1497_v59, 0.0  ;;  %v4231_v59 = vld [vmem:[#allocation20 + $0x8] sm:$0xff] }
 0x26f   :  { %5844 = vmatpush3.bf16.msra.mxu1 %v7141_v58 }
 0x270   :  { %v1499_v61 = vmul.f32 %v7083_v35, %v1498_v60  ;;  %5542 = vmatprep.subr.mxu1 %v6571_v0 }
 0x272   :  { %v1500_v62 = vadd.f32 %v7085_v37, %v1499_v61  ;;  %v4226_v61 = vld [vmem:[%s7798_s12] sm:$0xff] }
 0x274   :  { %1502 = vst.msk [vmem:[#allocation2 + $0x1] sm:$0xf] %vm1501_vm4, %v1500_v62  ;;  %v4227_v62 = vld [vmem:[%s7798_s12 + $0x8] sm:$0xff] }
 0x27b   :  { %v1504_v63 = vld [vmem:[#allocation2] sm:$0x3f] }
 0x27c   :  { %5454 = vmatmul.mubr.msk.f32.vlgmr.msra.gmra.mrb[6].mxu0 %vm1506_vm5, %v1504_v63  ;;  %v2012_v3 = vrot.slane %v1504_v63, 2  ;;  %v1653_v6 = vrot.slane %v1504_v63, 1  ;;  %v7412_v63 = vpack.c.bf16 %v4227_v62, %v4226_v61 }
 0x27d   :  { %5811 = vmatpush3.bf16.msra.mxu0 %v7047_v15  ;;  %5464 = vmatprep.mubr.msk.f32.mxu0 %vm6572_vm0, %v6571_v0 }
 0x27e   :  { %5520 = vmatmul.mubr.msk.f32.vlgmr.msra.gmra.mrb[4].mxu1 %vm1506_vm5, %v2012_v3  ;;  %5812 = vmatprep.subr.bf16.mxu0 %v6573_v17  ;;  %v4228_v3 = vld [vmem:[%s7798_s12 + $0x10] sm:$0xff] }
 0x27f   :  { %5543 = vmatpush3.msk.msra.mxu1 %vm314_vm1, %v6915_v1  ;;  %5544 = vmatprep.mubr.msk.f32.mxu1 %vm6572_vm0, %v6571_v0 }
 0x280   :  { %5547 = vmatprep.subr.mxu1 %v6571_v0 }
 0x281   :  { %5814 = vmatpush3.bf16.msra.mxu0 %v7069_v22 }
 0x282   :  { %5545 = vmatmul.mubr.msk.f32.vlgmr.msra.gmra.mrb[6].mxu1 %vm310_vm2, %v7165_v5  ;;  %5821 = vmatprep.subr.bf16.mxu0 %v6573_v17 }
 0x283   :  { %5548 = vmatpush3.msk.msra.mxu1 %vm314_vm1, %v6917_v2  ;;  %5549 = vmatprep.mubr.msk.f32.mxu1 %vm6572_vm0, %v6571_v0 }
 0x284   :  { %5465 = vmatmul.mubr.msk.f32.vlgmr.msra.gmra.mrb[8].mxu0 %vm1506_vm5, %v1653_v6  ;;  %5552 = vmatprep.subr.mxu1 %v6571_v0 }
 0x285   :  { %5823 = vmatpush3.bf16.msra.mxu0 %v7096_v44  ;;  %5486 = vmatprep.mubr.msk.f32.mxu0 %vm6572_vm0, %v6571_v0 }
 0x286   :  { %5824 = vmatprep.subr.bf16.mxu0 %v6573_v17 }
 0x289   :  { %5826 = vmatpush3.bf16.msra.mxu0 %v7111_v48 }
 0x28a   :  { %5550 = vmatmul.mubr.msk.f32.vlgmr.msra.gmra.mrb[6].mxu1 %vm310_vm2, %v7185_v8  ;;  %5833 = vmatprep.subr.bf16.mxu0 %v6573_v17 }
 0x28b   :  { %5553 = vmatpush3.msk.msra.mxu1 %vm314_vm1, %v6931_v4  ;;  %5554 = vmatprep.mubr.msk.f32.mxu1 %vm6572_vm0, %v6571_v0 }
 0x28c   :  { %5487 = vmatmul.mubr.msk.f32.vlgmr.msra.gmra.mrb[6].mxu0 %vm1506_vm5, %v1653_v6  ;;  %5557 = vmatprep.subr.mxu1 %v6571_v0 }
 0x28d   :  { %5835 = vmatpush3.bf16.msra.mxu0 %v7127_v51  ;;  %5508 = vmatprep.mubr.msk.f32.mxu0 %vm6572_vm0, %v6571_v0 }
 0x28e   :  { %5836 = vmatprep.subr.bf16.mxu0 %v6573_v17 }
 0x291   :  { %5838 = vmatpush3.bf16.msra.mxu0 %v7141_v58 }
 0x292   :  { %5555 = vmatmul.mubr.msk.f32.vlgmr.msra.gmra.mrb[6].mxu1 %vm310_vm2, %v5069_v9  ;;  %5522 = vmatprep.subr.mxu0 %v6571_v0 }
 0x293   :  { %5558 = vmatpush3.msk.msra.mxu1 %vm314_vm1, %v6952_v7  ;;  %5559 = vmatprep.mubr.msk.f32.mxu1 %vm6572_vm0, %v6571_v0 }
 0x294   :  { %5509 = vmatmul.mubr.msk.f32.vlgmr.msra.gmra.mrb[6].mxu0 %vm1506_vm5, %v1867_v52  ;;  %5582 = vmatprep.subr.mxu1 %v6571_v0  ;;  %v3869_v52 = vld [vmem:[%s7795_s9 + $0x18] sm:$0xff] }
 0x295   :  { %5523 = vmatpush3.msk.msra.mxu0 %vm314_vm1, %v6915_v1  ;;  %5524 = vmatprep.mubr.msk.f32.mxu0 %vm6572_vm0, %v6571_v0 }
 0x296   :  { %5527 = vmatprep.subr.mxu0 %v6571_v0 }
 0x298   :  { %5525 = vmatmul.mubr.msk.f32.vlgmr.msra.gmra.mrb[10].mxu0 %vm310_vm2, %v7185_v8 }
 0x299   :  { %5528 = vmatpush3.msk.msra.mxu0 %vm314_vm1, %v6917_v2  ;;  %5529 = vmatprep.mubr.msk.f32.mxu0 %vm6572_vm0, %v6571_v0 }
 0x29a   :  { %5560 = vmatmul.mubr.msk.f32.vlgmr.msra.gmra.mrb[6].mxu1 %vm310_vm2, %v2622_v11  ;;  %5532 = vmatprep.subr.mxu0 %v6571_v0 }
 0x29b   :  { %5583 = vmatpush3.msk.msra.mxu1 %vm314_vm1, %v6915_v1  ;;  %5584 = vmatprep.mubr.msk.f32.mxu1 %vm6572_vm0, %v6571_v0 }
 0x29c   :  { %5587 = vmatprep.subr.mxu1 %v6571_v0 }
 0x29e   :  { %5585 = vmatmul.mubr.msk.f32.vlgmr.msra.gmra.mrb[8].mxu1 %vm310_vm2, %v2622_v11 }
 0x29f   :  { %5588 = vmatpush3.msk.msra.mxu1 %vm314_vm1, %v6917_v2  ;;  %5589 = vmatprep.mubr.msk.f32.mxu1 %vm6572_vm0, %v6571_v0 }
 0x2a0   :  { %5530 = vmatmul.mubr.msk.f32.vlgmr.msra.gmra.mrb[10].mxu0 %vm310_vm2, %v5066_v10  ;;  %5592 = vmatprep.subr.mxu1 %v6571_v0 }
 0x2a1   :  { %5533 = vmatpush3.msk.msra.mxu0 %vm314_vm1, %v6931_v4  ;;  %5534 = vmatprep.mubr.msk.f32.mxu0 %vm6572_vm0, %v6571_v0 }
 0x2a2   :  { %5537 = vmatprep.subr.mxu0 %v6571_v0 }
 0x2a6   :  { %5590 = vmatmul.mubr.msk.f32.vlgmr.msra.gmra.mrb[8].mxu1 %vm310_vm2, %v5069_v9 }
 0x2a7   :  { %5593 = vmatpush3.msk.msra.mxu1 %vm314_vm1, %v6931_v4  ;;  %5594 = vmatprep.mubr.msk.f32.mxu1 %vm6572_vm0, %v6571_v0 }
 0x2a8   :  { %5535 = vmatmul.mubr.msk.f32.vlgmr.msra.gmra.mrb[10].mxu0 %vm310_vm2, %v7165_v5  ;;  %5597 = vmatprep.subr.mxu1 %v6571_v0 }
 0x2a9   :  { %5538 = vmatpush3.msk.msra.mxu0 %vm314_vm1, %v6952_v7  ;;  %5539 = vmatprep.mubr.msk.f32.mxu0 %vm6572_vm0, %v6571_v0 }
 0x2aa   :  { %5562 = vmatprep.subr.mxu0 %v6571_v0 }
 0x2ae   :  { %5595 = vmatmul.mubr.msk.f32.vlgmr.msra.gmra.mrb[8].mxu1 %vm310_vm2, %v2907_v12 }
 0x2af   :  { %5598 = vmatpush3.msk.msra.mxu1 %vm314_vm1, %v6952_v7  ;;  %5599 = vmatprep.mubr.msk.f32.mxu1 %vm6572_vm0, %v6571_v0 }
 0x2b0   :  { %5540 = vmatmul.mubr.msk.f32.vlgmr.msra.gmra.mrb[10].mxu0 %vm310_vm2, %v5069_v9  ;;  %5857 = vmatprep.subr.bf16.mxu1 %v6573_v17 }
 0x2b1   :  { %5563 = vmatpush3.msk.msra.mxu0 %vm314_vm1, %v6915_v1  ;;  %5564 = vmatprep.mubr.msk.f32.mxu0 %vm6572_vm0, %v6571_v0 }
 0x2b2   :  { %5567 = vmatprep.subr.mxu0 %v6571_v0 }
 0x2b4   :  { %5565 = vmatmul.mubr.msk.f32.vlgmr.msra.gmra.mrb[12].mxu0 %vm310_vm2, %v5069_v9 }
 0x2b5   :  { %5568 = vmatpush3.msk.msra.mxu0 %vm314_vm1, %v6917_v2  ;;  %5569 = vmatprep.mubr.msk.f32.mxu0 %vm6572_vm0, %v6571_v0 }
 0x2b6   :  { %5600 = vmatmul.mubr.msk.f32.vlgmr.msra.gmra.mrb[8].mxu1 %vm310_vm2, %v3192_v13  ;;  %5572 = vmatprep.subr.mxu0 %v6571_v0 }
 0x2b7   :  { %5859 = vmatpush3.bf16.msra.mxu1 %v7047_v15  ;;  %5632 = vmatprep.mubr.msk.f32.mxu1 %vm6572_vm0, %v6571_v0 }
 0x2b8   :  { %5860 = vmatprep.subr.bf16.mxu1 %v6573_v17 }
 0x2bb   :  { %5862 = vmatpush3.bf16.msra.mxu1 %v7069_v22 }
 0x2bc   :  { %5570 = vmatmul.mubr.msk.f32.vlgmr.msra.gmra.mrb[12].mxu0 %vm310_vm2, %v7165_v5  ;;  %5863 = vmatprep.subr.bf16.mxu1 %v6573_v17  ;;  %v4229_v5 = vld [vmem:[%s7798_s12 + $0x18] sm:$0xff]  ;;  %s6574_s12 = smov 96  }
 0x2bd   :  { %5573 = vmatpush3.msk.msra.mxu0 %vm314_vm1, %v6931_v4  ;;  %5574 = vmatprep.mubr.msk.f32.mxu0 %vm6572_vm0, %v6571_v0  ;;  %v7425_v6 = vpack.c.bf16 %v4229_v5, %v4228_v3 }
 0x2be   :  { %5577 = vmatprep.subr.mxu0 %v6571_v0 }
 0x2c4   :  { %5575 = vmatmul.mubr.msk.f32.vlgmr.msra.gmra.mrb[12].mxu0 %vm310_vm2, %v2622_v11 }
 0x2c5   :  { %5578 = vmatpush3.msk.msra.mxu0 %vm314_vm1, %v6952_v7  ;;  %5579 = vmatprep.mubr.msk.f32.mxu0 %vm6572_vm0, %v6571_v0 }
 0x2c6   :  { %5845 = vmatprep.subr.bf16.mxu0 %v6573_v17 }
 0x2cc   :  { %5580 = vmatmul.mubr.msk.f32.vlgmr.msra.gmra.mrb[12].mxu0 %vm310_vm2, %v2907_v12 }
 0x2cd   :  { %5847 = vmatpush3.bf16.msra.mxu0 %v7047_v15  ;;  %5610 = vmatprep.mubr.msk.f32.mxu0 %vm6572_vm0, %v6571_v0 }
 0x2ce   :  { %5848 = vmatprep.subr.bf16.mxu0 %v6573_v17 }
 0x2d1   :  { %5850 = vmatpush3.bf16.msra.mxu0 %v7069_v22 }
 0x2d2   :  { %5851 = vmatprep.subr.bf16.mxu0 %v6573_v17 }
 0x351   :  { %v2081_v1 = vpop.f32.mrb[4].mxu1 }
 0x352   :  { %v5521_v2 = vpop.f32.mrb[5].mxu1 }
 0x357   :  { %v1722_v4 = vpop.f32.mrb[8].mxu0 }
 0x358   :  { %v7306_v7 = vadd.f32 %v2081_v1, %v1722_v4  ;;  %v5466_v14 = vpop.f32.mrb[9].mxu0 }
 0x359   :  { %v7429_v14 = vld [vmem:[#allocation19] ss:$0 sm:$0xff] }
 0x367   :  { %v7308_v16 = vpop.f32.mrb[6].mxu0 }
 0x368   :  { %v2086_v15 = vmax.f32 %v7308_v16, %v7306_v7  ;;  %v5510_v19 = vpop.f32.mrb[7].mxu0 }
 0x36d   :  { %v2691_v20 = vpop.f32.mrb[6].mxu1 }
 0x36e   :  { %v5561_v21 = vpop.f32.mrb[7].mxu1 }
 0x383   :  { %v2406_v23 = vpop.f32.mrb[10].mxu0 }
 0x384   :  { %v3266_v25 = vmax.f32 %v2406_v23, %v2691_v20  ;;  %v5541_v26 = vpop.f32.mrb[11].mxu0 }
 0x386   :  { %v3267_v22 = vadd.f32 %v7080_v32, %v3266_v25 }
 0x388   :  { %v3268_v27 = vmax.f32 %v3267_v22, 0.0 }
 0x389   :  { %v3261_v28 = vpop.f32.mrb[8].mxu1 }
 0x38a   :  { %v3269_v29 = vmul.f32 %v7083_v35, %v3268_v27  ;;  %v5601_v30 = vpop.f32.mrb[9].mxu1 }
 0x38c   :  { %v3270_v31 = vadd.f32 %v7085_v37, %v3269_v29 }
 0x38e   :  { %3279 = vst.msk [vmem:[#allocation3 + $0x8] sm:$0xf] %vm1501_vm4, %v3270_v31 }
 0x395   :  { %v3281_v33 = vld [vmem:[#allocation3 + $0x8] sm:$0x3f] }
 0x396   :  { %5611 = vmatmul.mubr.msk.f32.vlgmr.msra.gmra.mrb[14].mxu0 %vm1506_vm5, %v3281_v33 }
 0x397   :  { %5853 = vmatpush3.bf16.msra.mxu0 %v7054_v18  ;;  %5621 = vmatprep.mubr.msk.f32.mxu0 %vm6572_vm0, %v6571_v0 }
 0x398   :  { %5854 = vmatprep.subr.bf16.mxu0 %v6573_v17 }
 0x39b   :  { %5856 = vmatpush3.bf16.msra.mxu0 %v7074_v24 }
 0x39c   :  { %5869 = vmatprep.subr.bf16.mxu0 %v6573_v17 }
 0x39f   :  { %v2976_v34 = vpop.f32.mrb[12].mxu0 }
 0x3a0   :  { %v3271_v36 = vmax.f32 %v2976_v34, %v3261_v28  ;;  %v5581_v38 = vpop.f32.mrb[13].mxu0 }
 0x3a2   :  { %v3272_v39 = vadd.f32 %v7080_v32, %v3271_v36  ;;  %v3871_v32 = vld [vmem:[#allocation17 + $0x8] sm:$0xff] }
 0x3a4   :  { %v3273_v40 = vmax.f32 %v3272_v39, 0.0 }
 0x3a6   :  { %v3274_v41 = vmul.f32 %v7083_v35, %v3273_v40  ;;  %v3642_v35 = vrot.slane %v3281_v33, 1 }
 0x3a8   :  { %v3275_v42 = vadd.f32 %v7085_v37, %v3274_v41  ;;  %v5063_v37 = vld [vmem:[#allocation13] ss:$0 sm:$0xff] }
 0x3aa   :  { %3277 = vst.msk [vmem:[#allocation2 + $0x9] sm:$0xf] %vm1501_vm4, %v3275_v42 }
 0x3b1   :  { %v3280_v43 = vld [vmem:[#allocation2 + $0x8] sm:$0x3f] }
 0x3b2   :  { %5622 = vmatmul.mubr.msk.f32.vlgmr.msra.gmra.mrb[14].mxu0 %vm1506_vm5, %v3280_v43  ;;  %v3428_v45 = vrot.slane %v3280_v43, 1  ;;  %v3787_v50 = vrot.slane %v3280_v43, 2 }
 0x3b3   :  { %5871 = vmatpush3.bf16.msra.mxu0 %v7096_v44  ;;  %5654 = vmatprep.mubr.msk.f32.mxu0 %vm6572_vm0, %v6571_v0 }
 0x3b4   :  { %5633 = vmatmul.mubr.msk.f32.vlgmr.msra.gmra.mrb[10].mxu1 %vm1506_vm5, %v3428_v45  ;;  %5872 = vmatprep.subr.bf16.mxu0 %v6573_v17 }
 0x3b5   :  { %5865 = vmatpush3.bf16.msra.mxu1 %v7054_v18  ;;  %5643 = vmatprep.mubr.msk.f32.mxu1 %vm6572_vm0, %v6571_v0  ;;  %v3870_v18 = vld [vmem:[#allocation17] sm:$0xff] }
 0x3b6   :  { %5866 = vmatprep.subr.bf16.mxu1 %v6573_v17 }
 0x3b7   :  { %5874 = vmatpush3.bf16.msra.mxu0 %v7111_v48 }
 0x3b8   :  { %5881 = vmatprep.subr.bf16.mxu0 %v6573_v17 }
 0x3b9   :  { %5868 = vmatpush3.bf16.msra.mxu1 %v7074_v24  ;;  %v5894_v24 = vpack.c.bf16 %v3871_v32, %v3870_v18 }
 0x3ba   :  { %5655 = vmatmul.mubr.msk.f32.vlgmr.msra.gmra.mrb[14].mxu0 %vm1506_vm5, %v3428_v45  ;;  %5875 = vmatprep.subr.bf16.mxu1 %v6573_v17 }
 0x3bb   :  { %5883 = vmatpush3.bf16.msra.mxu0 %v7127_v51  ;;  %5676 = vmatprep.mubr.msk.f32.mxu0 %vm6572_vm0, %v6571_v0 }
 0x3bc   :  { %5644 = vmatmul.mubr.msk.f32.vlgmr.msra.gmra.mrb[10].mxu1 %vm1506_vm5, %v3281_v33  ;;  %5884 = vmatprep.subr.bf16.mxu0 %v6573_v17  ;;  %v7440_v33 = vld [vmem:[#allocation22] ss:$0 sm:$0xff] }
 0x3bd   :  { %5877 = vmatpush3.bf16.msra.mxu1 %v7096_v44  ;;  %5665 = vmatprep.mubr.msk.f32.mxu1 %vm6572_vm0, %v6571_v0  ;;  %v2093_v44 = vadd.f32 %v5063_v37, %v2086_v15 }
 0x3be   :  { %5878 = vmatprep.subr.bf16.mxu1 %v6573_v17 }
 0x3bf   :  { %5886 = vmatpush3.bf16.msra.mxu0 %v7141_v58  ;;  %v2094_v49 = vmax.f32 %v2093_v44, 0.0 }
 0x3c0   :  { %5893 = vmatprep.subr.bf16.mxu0 %v6573_v17 }
 0x3c1   :  { %5880 = vmatpush3.bf16.msra.mxu1 %v7111_v48  ;;  %v7378_v48 = vpack.c.bf16 %v3867_v47, %v3866_v46  ;;  %v2101_v55 = vmul.f32 %v5064_v53, %v2094_v49 }
 0x3c2   :  { %5677 = vmatmul.mubr.msk.f32.vlgmr.msra.gmra.mrb[14].mxu0 %vm1506_vm5, %v3642_v35  ;;  %5887 = vmatprep.subr.bf16.mxu1 %v6573_v17 }
 0x3c3   :  { %5895 = vmatpush3.bf16.msra.mxu0 %v5894_v24  ;;  %5694 = vmatprep.mubr.msk.f32.mxu0 %vm6572_vm0, %v6571_v0  ;;  %v7395_v57 = vadd.f32 %v5065_v56, %v2101_v55 }
 0x3c4   :  { %5666 = vmatmul.mubr.msk.f32.vlgmr.msra.gmra.mrb[10].mxu1 %vm1506_vm5, %v3642_v35  ;;  %5902 = vmatprep.subr.bf16.mxu0 %v6573_v17 }
 0x3c5   :  { %5889 = vmatpush3.bf16.msra.mxu1 %v7127_v51  ;;  %5687 = vmatprep.mubr.msk.f32.mxu1 %vm6572_vm0, %v6571_v0  ;;  %v3868_v51 = vld [vmem:[%s7795_s9 + $0x10] sm:$0xff] }
 0x3c6   :  { %5890 = vmatprep.subr.bf16.mxu1 %v6573_v17  ;;  %5695 = vmatmul.mubr.f32.vlgmr.msra.gmra.mrb[16].mxu0 %v6571_v0  ;;  %v7389_v54 = vpack.c.bf16 %v3869_v52, %v3868_v51 }
 0x3c7   :  { %5904 = vmatpush3.bf16.msra.mxu0 %v5894_v24  ;;  %5712 = vmatprep.mubr.msk.f32.mxu0 %vm6572_vm0, %v6571_v0 }
 0x3c8   :  { %5905 = vmatprep.subr.bf16.mxu0 %v6573_v17 }
 0x3c9   :  { %5892 = vmatpush3.bf16.msra.mxu1 %v7141_v58  ;;  %v4230_v58 = vld [vmem:[#allocation20] sm:$0xff] }
 0x3ca   :  { %5896 = vmatprep.subr.bf16.mxu1 %v6573_v17  ;;  %v7402_v60 = vpack.c.bf16 %v4231_v59, %v4230_v58 }
 0x3cc   :  { %5688 = vmatmul.mubr.msk.f32.vlgmr.msra.gmra.mrb[10].mxu1 %vm1506_vm5, %v3787_v50 }
 0x3cd   :  { %5898 = vmatpush3.bf16.msra.mxu1 %v7378_v48  ;;  %5705 = vmatprep.mubr.msk.f32.mxu1 %vm6572_vm0, %v6571_v0 }
 0x3ce   :  { %5899 = vmatprep.subr.bf16.mxu1 %v6573_v17 }
 0x3d1   :  { %5901 = vmatpush3.bf16.msra.mxu1 %v7389_v54 }
 0x3d2   :  { %5911 = vmatprep.subr.bf16.mxu1 %v6573_v17 }
 0x3d4   :  { %5706 = vmatmul.mubr.msk.f32.vlgmr.msra.gmra.mrb[12].mxu1 %vm1506_vm5, %v7395_v57 }
 0x3d5   :  { %5730 = vmatprep.mubr.msk.f32.mxu1 %vm6572_vm0, %v6571_v0  ;;  %5913 = vmatpush3.bf16.msra.mxu1 %v7402_v60 }
 0x3d6   :  { %5914 = vmatprep.subr.bf16.mxu1 %v6573_v17 }
 0x3d8   :  { %5731 = vmatmul.mubr.f32.vlgmr.msra.gmra.mrb[14].mxu1 %v6571_v0 }
 0x3d9   :  { %5916 = vmatpush3.bf16.msra.mxu1 %v7412_v63  ;;  %5741 = vmatprep.mubr.msk.f32.mxu1 %vm6572_vm0, %v6571_v0 }
 0x3da   :  { %5917 = vmatprep.subr.bf16.mxu1 %v6573_v17 }
 0x3dd   :  { %5919 = vmatpush3.bf16.msra.mxu1 %v7425_v6 }
 0x3de   :  { %5929 = vmatprep.subr.bf16.mxu1 %v6573_v17 }
 0x495   :  { %v3782_v8 = vpop.f32.mrb[14].mxu0 }
 0x496   :  { %v5678_v9 = vpop.f32.mrb[15].mxu0 }
 0x499   :  { %v3943_v10 = vpop.f32.mrb[16].mxu0 }
 0x49a   :  { %v5696_v11 = vpop.f32.mrb[17].mxu0 }
 0x49f   :  { %v3856_v12 = vpop.f32.mrb[10].mxu1 }
 0x4a0   :  { %v3861_v13 = vmax.f32 %v3782_v8, %v3856_v12  ;;  %v5689_v1 = vpop.f32.mrb[11].mxu1 }
 0x4a2   :  { %v3862_v2 = vadd.f32 %v5063_v37, %v3861_v13 }
 0x4a4   :  { %v3863_v4 = vmax.f32 %v3862_v2, 0.0 }
 0x4a6   :  { %v3864_v7 = vmul.f32 %v5064_v53, %v3863_v4 }
 0x4a7   :  { %v4016_v16 = vpop.f32.mrb[12].mxu1 }
 0x4a8   :  { %v7431_v15 = vadd.f32 %v5065_v56, %v3864_v7  ;;  %v4017_v19 = vadd.f32 %v4016_v16, %v3943_v10  ;;  %v5707_v20 = vpop.f32.mrb[13].mxu1 }
 0x4aa   :  { %v4026_v21 = vadd.f32 %v7429_v14, %v4017_v19  ;;  %5742 = vmatmul.mubr.msk.f32.vlgmr.msra.gmra.mrb[16].mxu1 %vm1506_vm5, %v7431_v15 }
 0x4ab   :  { %5794 = vmatprep.mubr.msk.f32.mxu1 %vm6572_vm0, %v6571_v0  ;;  %v4299_v25 = vpop.f32.mrb[14].mxu1 }
 0x4ac   :  { %6117 = vtanh.f32 %v4026_v21  ;;  %v5732_v26 = vpop.f32.mrb[15].mxu1  ;;  %v5112_v22 = vmul.f32 -1.442695, %v4026_v21 }
 0x4ae   :  { %6119 = vpow2.f32 %v5112_v22 }
 0x4b6   :  { %v6118_v23 = vpop.eup %6117 }
 0x4b7   :  { %4036 = vrot.lane.b32.xlu0 %v6118_v23, %s6574_s12 }
 0x4b8   :  { %v6120_v27 = vpop.eup %6119 }
 0x4b9   :  { %v4030_v28 = vadd.f32 1.0, %v6120_v27 }
 0x4bb   :  { %6121 = vrcp.f32 %v4030_v28 }
 0x4c5   :  { %v6122_v29 = vpop.eup %6121 }
 0x4c6   :  { %v4034_v41 = vmul.f32 0.0, %v6122_v29 }
 0x529   :  { %v4037_v30 = vpop.permute.xlu0 %4036 }
 0x52a   :  { %v4039_v31 = vmul.f32 %v6122_v29, %v4037_v30 }
 0x52c   :  { %4041 = vrot.lane.b32.xlu1 %v4039_v31, %s6575_s5 }
 0x57d   :  { %v4369_v34 = vpop.f32.mrb[16].mxu1 }
 0x57e   :  { %v4370_v36 = vadd.f32 %v4369_v34, %v4299_v25  ;;  %v5743_v38 = vpop.f32.mrb[17].mxu1 }
 0x57f   :  { %v4647_v38 = vld [vmem:[%s7801_s15] sm:$0xff] }
 0x580   :  { %v4379_v39 = vadd.f32 %v7440_v33, %v4370_v36 }
 0x582   :  { %6123 = vtanh.f32 %v4379_v39  ;;  %v5118_v18 = vmul.f32 -1.442695, %v4379_v39  ;;  %v4648_v39 = vld [vmem:[%s7801_s15 + $0x8] sm:$0xff] }
 0x58c   :  { %v6124_v40 = vpop.eup %6123 }
 0x58d   :  { %4389 = vrot.lane.b32.xlu0 %v6124_v40, %s6574_s12  ;;  %v4649_v40 = vld [vmem:[%s7801_s15 + $0x10] sm:$0xff] }
 0x59e   :  { %v4042_v42 = vpop.permute.xlu1 %4041 }
 0x59f   :  { %v7444_v43 = vadd.f32 %v4042_v42, %v4034_v41  ;;  %v5930_v41 = vpack.c.bf16 %v4648_v39, %v4647_v38  ;;  %v4650_v42 = vld [vmem:[%s7801_s15 + $0x18] sm:$0xff] }
 0x5a0   :  { %v4779_v38 = vld [vmem:[%s7805_s19 + $0xb8] sm:$0xff] }
 0x5a1   :  { %6125 = vtanh.f32 %v7444_v43  ;;  %5931 = vmatpush3.bf16.msra.mxu1 %v5930_v41  ;;  %v4776_v41 = vld [vmem:[%s7805_s19 + $0xa0] sm:$0xff] }
 0x5a2   :  { %6127 = vpow2.f32 %v5118_v18  ;;  %5932 = vmatprep.subr.bf16.mxu1 %v6573_v17  ;;  %v4652_v18 = vld [vmem:[%s7801_s15 + $0x28] sm:$0xff] }
 0x5ab   :  { %v6126_v45 = vpop.eup %6125 }
 0x5ac   :  { %4047 = vrot.lane.b32.xlu0 %v6126_v45, %s6576_s1  ;;  %v6128_v32 = vpop.eup %6127  ;;  %v4651_v45 = vld [vmem:[%s7801_s15 + $0x20] sm:$0xff] }
 0x5ad   :  { %v4383_v24 = vadd.f32 1.0, %v6128_v32  ;;  %v5936_v32 = vpack.c.bf16 %v4652_v18, %v4651_v45  ;;  %v4783_v45 = vld [vmem:[%s7805_s19 + $0xd8] sm:$0xff] }
 0x5af   :  { %6129 = vrcp.f32 %v4383_v24  ;;  %v4653_v24 = vld [vmem:[%s7801_s15 + $0x30] sm:$0xff] }
 0x5b9   :  { %v6130_v35 = vpop.eup %6129 }
 0x5ba   :  { %v4387_v49 = vmul.f32 0.0, %v6130_v35 }
 0x5ff   :  { %v4390_v37 = vpop.permute.xlu0 %4389 }
 0x600   :  { %v4392_v44 = vmul.f32 %v6130_v35, %v4390_v37 }
 0x602   :  { %4394 = vrot.lane.b32.xlu1 %v4392_v44, %s6575_s5 }
 0x61e   :  { %v4048_v46 = vpop.permute.xlu0 %4047 }
 0x61f   :  { %v4050_v47 = vmul.f32 %v6122_v29, %v4048_v46  ;;  %v4655_v46 = vld [vmem:[%s7801_s15 + $0x40] sm:$0xff] }
 0x621   :  { %4053 = vrot.lane.b32.xlu0 %v4050_v47, %s6577_s17 }
 0x674   :  { %v4395_v50 = vpop.permute.xlu1 %4394 }
 0x675   :  { %v7450_v51 = vadd.f32 %v4395_v50, %v4387_v49 }
 0x677   :  { %6131 = vtanh.f32 %v7450_v51 }
 0x681   :  { %v6132_v52 = vpop.eup %6131 }
 0x682   :  { %4400 = vrot.lane.b32.xlu1 %v6132_v52, %s6576_s1  ;;  %v4657_v52 = vld [vmem:[%s7801_s15 + $0x50] sm:$0xff] }
 0x693   :  { %v4054_v53 = vpop.permute.xlu0 %4053 }
 0x694   :  { %5713 = vmatmul.mubr.msk.f32.vlgmr.msra.gmra.mrb[18].mxu0 %vm3873_vm6, %v4054_v53  ;;  %v4658_v53 = vld [vmem:[%s7801_s15 + $0x58] sm:$0xff] }
 0x695   :  { %5907 = vmatpush3.bf16.msra.mxu0 %v7378_v48  ;;  %5723 = vmatprep.mubr.msk.f32.mxu0 %vm6572_vm0, %v6571_v0 }
 0x696   :  { %5908 = vmatprep.subr.bf16.mxu0 %v6573_v17 }
 0x699   :  { %5910 = vmatpush3.bf16.msra.mxu0 %v7389_v54 }
 0x69a   :  { %5920 = vmatprep.subr.bf16.mxu0 %v6573_v17 }
 0x69c   :  { %5724 = vmatmul.mubr.msk.f32.vlgmr.msra.gmra.mrb[20].mxu0 %vm1506_vm5, %v7431_v15 }
 0x69d   :  { %5922 = vmatpush3.bf16.msra.mxu0 %v7402_v60  ;;  %5748 = vmatprep.mubr.msk.f32.mxu0 %vm6572_vm0, %v6571_v0 }
 0x69e   :  { %5923 = vmatprep.subr.bf16.mxu0 %v6573_v17 }
 0x6f4   :  { %v4401_v48 = vpop.permute.xlu1 %4400 }
 0x6f5   :  { %v7467_v55 = vmul.f32 %v6130_v35, %v4401_v48  ;;  %v4654_v35 = vld [vmem:[%s7801_s15 + $0x38] sm:$0xff]  ;;  %v5945_v48 = vpack.c.bf16 %v4658_v53, %v4657_v52  ;;  %v4785_v53 = vld [vmem:[%s7805_s19 + $0xe8] sm:$0xff] }
 0x6f6   :  { %v5939_v37 = vpack.c.bf16 %v4654_v35, %v4653_v24 }
 0x6f7   :  { %4406 = vrot.lane.b32.xlu1 %v7467_v55, %s6577_s17 }
 0x767   :  { %v4123_v56 = vpop.f32.mrb[18].mxu0 }
 0x768   :  { %v5714_v54 = vpop.f32.mrb[19].mxu0 }
 0x769   :  { %v4407_v58 = vpop.permute.xlu1 %4406  ;;  %v4660_v54 = vld [vmem:[%s7801_s15 + $0x68] sm:$0xff] }
 0x76a   :  { %5749 = vmatmul.mubr.msk.f32.vlgmr.msra.gmra.mrb[22].mxu0 %vm3873_vm6, %v4407_v58 }
 0x76b   :  { %5925 = vmatpush3.bf16.msra.mxu0 %v7412_v63  ;;  %5759 = vmatprep.mubr.msk.f32.mxu0 %vm6572_vm0, %v6571_v0 }
 0x76c   :  { %5926 = vmatprep.subr.bf16.mxu0 %v6573_v17 }
 0x76f   :  { %v4196_v59 = vpop.f32.mrb[20].mxu0  ;;  %5928 = vmatpush3.bf16.msra.mxu0 %v7425_v6 }
 0x770   :  { %v4197_v60 = vadd.f32 %v4196_v59, %v4123_v56  ;;  %v5725_v61 = vpop.f32.mrb[21].mxu0  ;;  %v4659_v56 = vld [vmem:[%s7801_s15 + $0x60] sm:$0xff]  ;;  %v4661_v59 = vld [vmem:[%s7801_s15 + $0x70] sm:$0xff] }
 0x771   :  { %v5948_v58 = vpack.c.bf16 %v4660_v54, %v4659_v56  ;;  %v4784_v56 = vld [vmem:[%s7805_s19 + $0xe0] sm:$0xff]  ;;  %v4786_v54 = vld [vmem:[%s7805_s19 + $0xf0] sm:$0xff] }
 0x772   :  { %v4200_v62 = vadd.f32 %v7429_v14, %v4197_v60  ;;  %5760 = vmatmul.mubr.msk.f32.vlgmr.msra.gmra.mrb[24].mxu0 %vm1506_vm5, %v7395_v57  ;;  %v4662_v60 = vld [vmem:[%s7801_s15 + $0x78] sm:$0xff] }
 0x773   :  { %4864 = vmatprep.mubr.f32.mxu0 %v6571_v0  ;;  %v5951_v61 = vpack.c.bf16 %v4662_v60, %v4661_v59  ;;  %v4887_v59 = vld [vmem:[%s7807_s21 + $0x80] sm:$0xff]  ;;  %v4888_v60 = vld [vmem:[%s7807_s21 + $0x88] sm:$0xff] }
 0x774   :  { %6133 = vtanh.f32 %v4200_v62  ;;  %v5115_v63 = vmul.f32 -1.442695, %v4200_v62 }
 0x776   :  { %6135 = vpow2.f32 %v5115_v63 }
 0x77e   :  { %v6134_v3 = vpop.eup %6133 }
 0x77f   :  { %4210 = vrot.lane.b32.xlu0 %v6134_v3, %s6574_s12 }
 0x780   :  { %v6136_v5 = vpop.eup %6135 }
 0x781   :  { %v4204_v8 = vadd.f32 1.0, %v6136_v5  ;;  %v4757_v5 = vld [vmem:[%s7805_s19 + $0x8] sm:$0xff] }
 0x783   :  { %6137 = vrcp.f32 %v4204_v8  ;;  %v4756_v8 = vld [vmem:[%s7805_s19] sm:$0xff] }
 0x78d   :  { %v6138_v9 = vpop.eup %6137 }
 0x78e   :  { %v4208_v4 = vmul.f32 %v6138_v9, %v7444_v43  ;;  %v5933_v43 = vpack.c.bf16 %v4650_v42, %v4649_v40  ;;  %v4778_v42 = vld [vmem:[%s7805_s19 + $0xb0] sm:$0xff] }
 0x78f   :  { %v5975_v18 = vpack.c.bf16 %v4778_v42, %v4776_v41  ;;  %v5122_v41 = vld [vmem:[#allocation23] ss:$0 sm:$0xff] }
 0x790   :  { %5934 = vmatpush3.bf16.msra.mxu1 %v5933_v43  ;;  %v4781_v43 = vld [vmem:[%s7805_s19 + $0xc8] sm:$0xff] }
 0x791   :  { %5935 = vmatprep.subr.bf16.mxu1 %v6573_v17 }
 0x794   :  { %5937 = vmatpush3.bf16.msra.mxu1 %v5936_v32  ;;  %v5977_v32 = vpack.c.bf16 %v4783_v45, %v4781_v43  ;;  %v5123_v43 = vld [vmem:[#allocation25] ss:$0 sm:$0xff] }
 0x795   :  { %5938 = vmatprep.subr.bf16.mxu1 %v6573_v17 }
 0x798   :  { %5940 = vmatpush3.bf16.msra.mxu1 %v5939_v37 }
 0x799   :  { %5941 = vmatprep.subr.bf16.mxu1 %v6573_v17 }
 0x7f1   :  { %v4211_v6 = vpop.permute.xlu0 %4210 }
 0x7f2   :  { %v4213_v10 = vmul.f32 %v6138_v9, %v4211_v6  ;;  %v4758_v6 = vld [vmem:[%s7805_s19 + $0x10] sm:$0xff] }
 0x7f4   :  { %4215 = vrot.lane.b32.xlu0 %v4213_v10, %s6575_s5  ;;  %v4761_v10 = vld [vmem:[%s7805_s19 + $0x28] sm:$0xff] }
 0x83d   :  { %v4476_v11 = vpop.f32.mrb[22].mxu0 }
 0x83e   :  { %v5750_v12 = vpop.f32.mrb[23].mxu0 }
 0x83f   :  { %v5955_v12 = vpack.c.bf16 %v4758_v6, %v4756_v8  ;;  %v4874_v6 = vld [vmem:[%s7807_s21 + $0x18] sm:$0xff] }
 0x845   :  { %v4546_v13 = vpop.f32.mrb[24].mxu0 }
 0x846   :  { %v4547_v57 = vadd.f32 %v4546_v13, %v4476_v11  ;;  %v5761_v1 = vpop.f32.mrb[25].mxu0  ;;  %v4763_v11 = vld [vmem:[%s7805_s19 + $0x38] sm:$0xff] }
 0x847   :  { %v5957_v13 = vpack.c.bf16 %v4763_v11, %v4761_v10  ;;  %v4762_v1 = vld [vmem:[%s7805_s19 + $0x30] sm:$0xff]  ;;  %v4891_v10 = vld [vmem:[%s7807_s21 + $0xa0] sm:$0xff]  ;;  %v4892_v11 = vld [vmem:[%s7807_s21 + $0xa8] sm:$0xff] }
 0x848   :  { %v4550_v0 = vadd.f32 %v7440_v33, %v4547_v57  ;;  %v4760_v57 = vld [vmem:[%s7805_s19 + $0x20] sm:$0xff] }
 0x84a   :  { %6139 = vtanh.f32 %v4550_v0  ;;  %v5121_v19 = vmul.f32 -1.442695, %v4550_v0  ;;  %v4765_v0 = vld [vmem:[%s7805_s19 + $0x48] sm:$0xff] }
 0x854   :  { %v6140_v2 = vpop.eup %6139 }
 0x855   :  { %4560 = vrot.lane.b32.xlu1 %v6140_v2, %s6574_s12 }
 0x866   :  { %v4216_v7 = vpop.permute.xlu0 %4215 }
 0x867   :  { %v4218_v14 = vadd.f32 %v4216_v7, %v4208_v4  ;;  %v4767_v4 = vld [vmem:[%s7805_s19 + $0x58] sm:$0xff]  ;;  %v5959_v7 = vpack.c.bf16 %v4762_v1, %v4760_v57  ;;  %v4875_v57 = vld [vmem:[%s7807_s21 + $0x20] sm:$0xff]  ;;  %v4876_v1 = vld [vmem:[%s7807_s21 + $0x28] sm:$0xff] }
 0x869   :  { %6141 = vtanh.f32 %v4218_v14  ;;  %v5961_v14 = vpack.c.bf16 %v4767_v4, %v4765_v0  ;;  %v4893_v0 = vld [vmem:[%s7807_s21 + $0xb0] sm:$0xff]  ;;  %v5995_v4 = vpack.c.bf16 %v4876_v1, %v4875_v57 }
 0x86a   :  { %6143 = vtanh.f32 %v4050_v47  ;;  %v4656_v47 = vld [vmem:[%s7801_s15 + $0x48] sm:$0xff] }
 0x86b   :  { %6145 = vpow2.f32 %v5121_v19  ;;  %v5942_v50 = vpack.c.bf16 %v4656_v47, %v4655_v46  ;;  %v4769_v19 = vld [vmem:[%s7805_s19 + $0x68] sm:$0xff] }
 0x86d   :  { %5943 = vmatpush3.bf16.msra.mxu1 %v5942_v50  ;;  %v4780_v50 = vld [vmem:[%s7805_s19 + $0xc0] sm:$0xff] }
 0x86e   :  { %5944 = vmatprep.subr.bf16.mxu1 %v6573_v17 }
 0x871   :  { %5946 = vmatpush3.bf16.msra.mxu1 %v5945_v48  ;;  %v4787_v48 = vld [vmem:[%s7805_s19 + $0xf8] sm:$0xff] }
 0x872   :  { %5947 = vmatprep.subr.bf16.mxu1 %v6573_v17 }
 0x873   :  { %v6142_v16 = vpop.eup %6141 }
 0x874   :  { %4221 = vrot.lane.b32.xlu0 %v6142_v16, %s6576_s1  ;;  %v6144_v15 = vpop.eup %6143  ;;  %v4764_v16 = vld [vmem:[%s7805_s19 + $0x40] sm:$0xff] }
 0x875   :  { %v6146_v20 = vpop.eup %6145  ;;  %5949 = vmatpush3.bf16.msra.mxu1 %v5948_v58  ;;  %v5983_v58 = vpack.c.bf16 %v4786_v54, %v4784_v56 }
 0x876   :  { %v4554_v21 = vadd.f32 1.0, %v6146_v20  ;;  %5950 = vmatprep.subr.bf16.mxu1 %v6573_v17  ;;  %v4759_v17 = vld [vmem:[%s7805_s19 + $0x18] sm:$0xff] }
 0x877   :  { %v4771_v20 = vld [vmem:[%s7805_s19 + $0x78] sm:$0xff] }
 0x878   :  { %4577 = vrot.lane.b32.xlu0 %v6144_v15, %s6577_s17  ;;  %6147 = vrcp.f32 %v4554_v21 }
 0x879   :  { %5952 = vmatpush3.bf16.msra.mxu1 %v5951_v61  ;;  %v4871_v61 = vld [vmem:[%s7807_s21] sm:$0xff] }
 0x87c   :  { %4588 = vrot.lane.b32.xlu0 %v6144_v15, %s6578_s16 }
 0x880   :  { %4595 = vrot.lane.b32.xlu0 %v6144_v15, %s6575_s5 }
 0x882   :  { %v6148_v23 = vpop.eup %6147 }
 0x883   :  { %v4558_v28 = vmul.f32 %v6148_v23, %v7450_v51 }
 0x884   :  { %4605 = vrot.lane.b32.xlu0 %v6144_v15, %s6579_s0  ;;  %v4766_v15 = vld [vmem:[%s7805_s19 + $0x50] sm:$0xff] }
 0x8c7   :  { %v4561_v25 = vpop.permute.xlu1 %4560 }
 0x8c8   :  { %v4563_v26 = vmul.f32 %v6148_v23, %v4561_v25  ;;  %v5965_v25 = vpack.c.bf16 %v4771_v20, %v4769_v19  ;;  %v4896_v19 = vld [vmem:[%s7807_s21 + $0xc8] sm:$0xff] }
 0x8ca   :  { %4565 = vrot.lane.b32.xlu1 %v4563_v26, %s6575_s5  ;;  %v4768_v26 = vld [vmem:[%s7805_s19 + $0x60] sm:$0xff] }
 0x8e6   :  { %v4222_v22 = vpop.permute.xlu0 %4221 }
 0x8e7   :  { %v4224_v31 = vmul.f32 %v6138_v9, %v4222_v22  ;;  %v5953_v9 = vpack.c.bf16 %v4759_v17, %v4757_v5  ;;  %v4770_v22 = vld [vmem:[%s7805_s19 + $0x70] sm:$0xff]  ;;  %v4890_v5 = vld [vmem:[%s7807_s21 + $0x98] sm:$0xff] }
 0x8e9   :  { %5954 = vmatprep.subr.bf16.mxu0 %v5953_v9  ;;  %v4873_v9 = vld [vmem:[%s7807_s21 + $0x10] sm:$0xff] }
 0x8ea   :  { %v4578_v27 = vpop.permute.xlu0 %4577  ;;  %5956 = vmatpush1.bf16.msra.mxu0 %v5955_v12  ;;  %v5991_v12 = vpack.c.bf16 %v4874_v6, %v4873_v9 }
 0x8eb   :  { %4581 = vst.msk [vmem:[#allocation4] sm:$0x1] %vm4580_vm7, %v4578_v27  ;;  %5958 = vmatprep.subr.bf16.mxu0 %v5957_v13  ;;  %v4773_v27 = vld [vmem:[%s7805_s19 + $0x88] sm:$0xff]  ;;  %v5993_v13 = vpack.c.bf16 %v4892_v11, %v4891_v10 }
 0x8ee   :  { %5960 = vmatpush1.bf16.msra.mxu0 %v5959_v7  ;;  %v4589_v24 = vpop.permute.xlu0 %4588 }
 0x8ef   :  { %5962 = vmatprep.subr.bf16.mxu0 %v5961_v14  ;;  %v4877_v14 = vld [vmem:[%s7807_s21 + $0x30] sm:$0xff] }
 0x8f2   :  { %v4596_v35 = vpop.permute.xlu0 %4595 }
 0x8f6   :  { %v4606_v37 = vpop.permute.xlu0 %4605 }
 0x93c   :  { %v4566_v29 = vpop.permute.xlu1 %4565 }
 0x93d   :  { %v4568_v30 = vadd.f32 %v4566_v29, %v4558_v28  ;;  %v4775_v28 = vld [vmem:[%s7805_s19 + $0x98] sm:$0xff] }
 0x93f   :  { %6149 = vtanh.f32 %v4568_v30  ;;  %v5967_v30 = vpack.c.bf16 %v4770_v22, %v4768_v26  ;;  %v4897_v26 = vld [vmem:[%s7807_s21 + $0xd0] sm:$0xff]  ;;  %v4898_v22 = vld [vmem:[%s7807_s21 + $0xd8] sm:$0xff] }
 0x940   :  { %6151 = vtanh.f32 %v4224_v31  ;;  %v5969_v31 = vpack.c.bf16 %v4775_v28, %v4773_v27  ;;  %v6005_v28 = vpack.c.bf16 %v4898_v22, %v4897_v26 }
 0x941   :  { %6153 = vtanh.f32 %v7467_v55 }
 0x949   :  { %v6150_v33 = vpop.eup %6149 }
 0x94a   :  { %4571 = vrot.lane.b32.xlu1 %v6150_v33, %s6576_s1  ;;  %v6152_v34 = vpop.eup %6151  ;;  %v4772_v33 = vld [vmem:[%s7805_s19 + $0x80] sm:$0xff] }
 0x94b   :  { %v6154_v36 = vpop.eup %6153 }
 0x94e   :  { %4616 = vrot.lane.b32.xlu1 %v6152_v34, %s6577_s17 }
 0x952   :  { %4621 = vrot.lane.b32.xlu1 %v6154_v36, %s6574_s12 }
 0x956   :  { %4625 = vrot.lane.b32.xlu1 %v6152_v34, %s6578_s16 }
 0x95a   :  { %4630 = vrot.lane.b32.xlu1 %v6152_v34, %s6575_s5 }
 0x95e   :  { %4634 = vrot.lane.b32.xlu1 %v6154_v36, %s6576_s1 }
 0x962   :  { %4638 = vrot.lane.b32.xlu1 %v6152_v34, %s6579_s0  ;;  %v4774_v34 = vld [vmem:[%s7805_s19 + $0x90] sm:$0xff] }
 0x963   :  { %v5971_v39 = vpack.c.bf16 %v4774_v34, %v4772_v33  ;;  %v4900_v33 = vld [vmem:[%s7807_s21 + $0xe8] sm:$0xff] }
 0x966   :  { %4642 = vrot.lane.b32.xlu1 %v6154_v36, %s6561_s18 }
 0x9bc   :  { %v4572_v44 = vpop.permute.xlu1 %4571 }
 0x9bd   :  { %v4574_v49 = vmul.f32 %v6148_v23, %v4572_v44  ;;  %v5963_v23 = vpack.c.bf16 %v4766_v15, %v4764_v16  ;;  %v4878_v16 = vld [vmem:[%s7807_s21 + $0x38] sm:$0xff]  ;;  %v4895_v15 = vld [vmem:[%s7807_s21 + $0xc0] sm:$0xff] }
 0x9be   :  { %v5999_v20 = vpack.c.bf16 %v4878_v16, %v4877_v14 }
 0x9bf   :  { %6155 = vtanh.f32 %v4574_v49  ;;  %5964 = vmatpush1.bf16.msra.mxu0 %v5963_v23  ;;  %v4879_v23 = vld [vmem:[%s7807_s21 + $0x40] sm:$0xff] }
 0x9c0   :  { %v4617_v51 = vpop.permute.xlu1 %4616  ;;  %5966 = vmatprep.subr.bf16.mxu0 %v5965_v25  ;;  %v4880_v25 = vld [vmem:[%s7807_s21 + $0x48] sm:$0xff] }
 0x9c1   :  { %4619 = vst.msk [vmem:[#allocation4 + $0x1] sm:$0x1] %vm4580_vm7, %v4617_v51  ;;  %v4782_v51 = vld [vmem:[%s7805_s19 + $0xd0] sm:$0xff]  ;;  %v6003_v27 = vpack.c.bf16 %v4880_v25, %v4879_v23 }
 0x9c2   :  { %v5979_v52 = vpack.c.bf16 %v4782_v51, %v4780_v50  ;;  %v4790_v51 = vlaneseq }
 0x9c3   :  { %5968 = vmatpush1.bf16.msra.mxu0 %v5967_v30  ;;  %v4882_v30 = vld [vmem:[%s7807_s21 + $0x58] sm:$0xff] }
 0x9c4   :  { %v4622_v55 = vpop.permute.xlu1 %4621  ;;  %5970 = vmatprep.subr.bf16.mxu0 %v5969_v31  ;;  %v4899_v31 = vld [vmem:[%s7807_s21 + $0xe0] sm:$0xff] }
 0x9c5   :  { %4624 = vst.msk [vmem:[#allocation4 + $0x1] sm:$0x1] %vm4586_vm8, %v4622_v55  ;;  %v5981_v55 = vpack.c.bf16 %v4787_v48, %v4785_v53  ;;  %v4788_v48 = vld [vmem:[#allocation28] sm:$0x3] }
 0x9c7   :  { %5972 = vmatpush1.bf16.msra.mxu0 %v5971_v39  ;;  %v4884_v39 = vld [vmem:[%s7807_s21 + $0x68] sm:$0xff] }
 0x9c8   :  { %v4626_v62 = vpop.permute.xlu1 %4625 }
 0x9c9   :  { %v7560_v3 = vpop.eup %6155  ;;  %4628 = vst.msk [vmem:[#allocation4] sm:$0x2] %vm4591_vm9, %v4626_v62  ;;  %v5985_v62 = vpack.c.bf16 %v4888_v60, %v4887_v59 }
 0x9ca   :  { %4583 = vrot.lane.b32.xlu0 %v7560_v3, %s6574_s12  ;;  %4629 = vst.msk [vmem:[#allocation4] sm:$0x2] %vm4593_vm10, %v6154_v36  ;;  %v4777_v36 = vld [vmem:[%s7805_s19 + $0xa8] sm:$0xff] }
 0x9cb   :  { %v5973_v40 = vpack.c.bf16 %v4779_v38, %v4777_v36  ;;  %5986 = vmatprep.subr.bf16.mxu1 %v5985_v62  ;;  %v6009_v36 = vpack.c.bf16 %v4900_v33, %v4899_v31  ;;  %v4883_v38 = vld [vmem:[%s7807_s21 + $0x60] sm:$0xff] }
 0x9cc   :  { %v4631_v63 = vpop.permute.xlu1 %4630 }
 0x9cd   :  { %4633 = vst.msk [vmem:[#allocation4 - $0x1] sm:$0x4] %vm4598_vm11, %v4631_v63  ;;  %5974 = vmatprep.subr.bf16.mxu0 %v5973_v40  ;;  %v4889_v63 = vld [vmem:[%s7807_s21 + $0x90] sm:$0xff]  ;;  %v6011_v40 = vpack.c.bf16 %v4884_v39, %v4883_v38 }
 0x9ce   :  { %4600 = vrot.lane.b32.xlu0 %v7560_v3, %s6576_s1  ;;  %5976 = vmatpush1.bf16.msra.mxu0 %v5975_v18  ;;  %v5989_v8 = vpack.c.bf16 %v4890_v5, %v4889_v63 }
 0x9cf   :  { %5978 = vmatprep.subr.bf16.mxu0 %v5977_v32  ;;  %v5124_v32 = vld [vmem:[#allocation26] ss:$0 sm:$0xff] }
 0x9d0   :  { %v4635_v2 = vpop.permute.xlu1 %4634 }
 0x9d1   :  { %4637 = vst.msk [vmem:[#allocation4 - $0x1] sm:$0x4] %vm4603_vm12, %v4635_v2  ;;  %v4894_v2 = vld [vmem:[%s7807_s21 + $0xb8] sm:$0xff] }
 0x9d2   :  { %4610 = vrot.lane.b32.xlu0 %v7560_v3, %s6561_s18  ;;  %5980 = vmatpush1.bf16.msra.mxu0 %v5979_v52  ;;  %v5997_v7 = vpack.c.bf16 %v4894_v2, %v4893_v0  ;;  %v4791_v52 = vshrl.u32 %v4790_v51, 7 }
 0x9d3   :  { %5982 = vmatprep.subr.bf16.mxu0 %v5981_v55 }
 0x9d4   :  { %v4639_v21 = vpop.permute.xlu1 %4638  ;;  %v4796_v53 = vsub.s32 1, %v4791_v52  ;;  %v4792_v55 = vsub.s32 0, %v4791_v52 }
 0x9d5   :  { %4641 = vst.msk [vmem:[#allocation4 - $0x2] sm:$0x8] %vm4608_vm13, %v4639_v21  ;;  %v6001_v21 = vpack.c.bf16 %v4896_v19, %v4895_v15 }
 0x9d6   :  { %5984 = vmatpush1.bf16.msra.mxu0 %v5983_v58  ;;  %v4797_v56 = vrot.slane %v4788_v48, %v4796_v53  ;;  %v4793_v54 = vrot.slane %v4788_v48, %v4792_v55 }
 0x9d8   :  { %v4643_v29 = vpop.permute.xlu1 %4642 }
 0x9d9   :  { %4645 = vst.msk [vmem:[#allocation4 - $0x2] sm:$0x8] %vm4613_vm14, %v4643_v29  ;;  %v4881_v29 = vld [vmem:[%s7807_s21 + $0x50] sm:$0xff] }
 0x9da   :  { %v6007_v34 = vpack.c.bf16 %v4882_v30, %v4881_v29 }
 0xa3c   :  { %v4584_v44 = vpop.permute.xlu0 %4583 }
 0xa3d   :  { %4587 = vst.msk [vmem:[#allocation4] sm:$0x1] %vm4586_vm8, %v4584_v44  ;;  %v4902_v44 = vld [vmem:[%s7807_s21 + $0xf8] sm:$0xff] }
 0xa3e   :  { %4592 = vst.msk [vmem:[#allocation4 - $0x1] sm:$0x2] %vm4591_vm9, %v4589_v24 }
 0xa3f   :  { %4594 = vst.msk [vmem:[#allocation4 - $0x1] sm:$0x2] %vm4593_vm10, %v7560_v3  ;;  %v4872_v3 = vld [vmem:[%s7807_s21 + $0x8] sm:$0xff] }
 0xa40   :  { %4599 = vst.msk [vmem:[#allocation4 - $0x2] sm:$0x4] %vm4598_vm11, %v4596_v35  ;;  %v4601_v46 = vpop.permute.xlu0 %4600  ;;  %v5987_v17 = vpack.c.bf16 %v4872_v3, %v4871_v61  ;;  %v5125_v3 = vld [vmem:[#allocation29] ss:$0 sm:$0xff] }
 0xa41   :  { %4604 = vst.msk [vmem:[#allocation4 - $0x2] sm:$0x4] %vm4603_vm12, %v4601_v46 }
 0xa42   :  { %4609 = vst.msk [vmem:[#allocation4 - $0x3] sm:$0x8] %vm4608_vm13, %v4606_v37  ;;  %v4901_v37 = vld [vmem:[%s7807_s21 + $0xf0] sm:$0xff] }
 0xa43   :  { %v6013_v46 = vpack.c.bf16 %v4902_v44, %v4901_v37 }
 0xa44   :  { %v4611_v47 = vpop.permute.xlu0 %4610 }
 0xa45   :  { %4614 = vst.msk [vmem:[#allocation4 - $0x3] sm:$0x8] %vm4613_vm14, %v4611_v47  ;;  %v4885_v47 = vld [vmem:[%s7807_s21 + $0x70] sm:$0xff] }
 0xa4c   :  { %v4646_v49 = vld [vmem:[#allocation4] sm:$0x3] }
 0xa4d   :  { %5795 = vmatmul.mubr.f32.vlgmr.msra.gmra.mrb[18].mxu1 %v4646_v49  ;;  %v4886_v49 = vld [vmem:[%s7807_s21 + $0x78] sm:$0xff]  ;;  %s6580_s21 = smov [#allocation31]  }
 0xa4e   :  { %5988 = vmatpush3.bf16.msra.mxu1 %v5987_v17  ;;  %v6015_v50 = vpack.c.bf16 %v4886_v49, %v4885_v47  ;;  %s4988_s10 = sshll.u32 %s6580_s21, 4  ;;  %s4989_s10 = int_to_ptr.vmem [resolvable:$true] %s4988_s10 }
 0xa4f   :  { %5990 = vmatprep.subr.bf16.mxu1 %v5989_v8  ;;  %s6509_s23 = scalar_lea.vmem %s4989_s10, 32  ;;  %p6514_p3 = scmp.lt.s32.totalorder %s4989_s10, %s4989_s10 }
 0xa50   :  { %p6510_p2 = scmp.ne.s32.totalorder %s4989_s10, %s6509_s23  ;;  %p6515_p4 = scmp.lt.s32.totalorder %s6509_s23, %s6509_s23 }
 0xa52   :  { %5992 = vmatpush3.bf16.msra.mxu1 %v5991_v12  ;;  %p6516_p5 = por %p6515_p4, %p6514_p3 }
 0xa53   :  { %5994 = vmatprep.subr.bf16.mxu1 %v5993_v13 }
 0xa54   :  { %p6517_p6 = pnand %p6516_p5, %p6510_p2 }
 0xa56   :  { %5996 = vmatpush3.bf16.msra.mxu1 %v5995_v4 }
 0xa57   :  { %5998 = vmatprep.subr.bf16.mxu1 %v5997_v7 }
 0xa5a   :  { %6000 = vmatpush3.bf16.msra.mxu1 %v5999_v20 }
 0xa5b   :  { %6002 = vmatprep.subr.bf16.mxu1 %v6001_v21 }
 0xa5e   :  { %6004 = vmatpush3.bf16.msra.mxu1 %v6003_v27 }
 0xa5f   :  { %6006 = vmatprep.subr.bf16.mxu1 %v6005_v28 }
 0xa62   :  { %6008 = vmatpush3.bf16.msra.mxu1 %v6007_v34 }
 0xa63   :  { %6010 = vmatprep.subr.bf16.mxu1 %v6009_v36 }
 0xa66   :  { %6012 = vmatpush3.bf16.msra.mxu1 %v6011_v40 }
 0xa67   :  { %6014 = vmatprep.subr.bf16.mxu1 %v6013_v46 }
 0xa6a   :  { %6016 = vmatpush3.bf16.msra.mxu1 %v6015_v50 }
 0xb20   :  { %v4736_v42 = vpop.f32.mrb[18].mxu1 }
 0xb21   :  { %v4737_v45 = vadd.f32 %v5122_v41, %v4736_v42  ;;  %v5796_v18 = vpop.f32.mrb[19].mxu1 }
 0xb23   :  { %v4747_v24 = vmul.f32 %v5123_v43, %v4737_v45 }
 0xb25   :  { %v4755_v35 = vadd.f32 %v5124_v32, %v4747_v24 }
 0xb27   :  { %4865 = vmatmul.mubr.f32.vlgmr.msra.gmra.mrb[26].mxu0 %v4755_v35 }
 0xbfa   :  { %v4866_v58 = vpop.f32.mrb[26].mxu0 }
 0xbfb   :  { %v4868_v59 = vpop.f32.mrb[27].mxu0  ;;  %v4867_v61 = vadd.f32 %v4866_v58, %v4793_v54 }
 0xbfc   :  { %v4869_v60 = vadd.f32 %v4868_v59, %v4797_v56 }
 0xbfe   :  { %4974 = vmatprep.mubr.f32.mxu1 %v4869_v60 }
 0xbff   :  { %4975 = vmatmul.mubr.f32.vlgmr.msra.gmra.mrb[20].mxu1 %v4867_v61 }
 0xcd2   :  { %v5351_v62 = vpop.f32.mrb[20].mxu1 }
 0xcd3   :  { %v5352_v63 = vpop.f32.mrb[21].mxu1 }
 0xcd4   :  { %v5353_v5 = vadd.f32 %v5352_v63, %v5351_v62 }
 0xcd6   :  { %v4977_v17 = vadd.f32 %v5353_v5, %v5125_v3 }
 0xcd8   :  { %4981 = vst.msk [vmem:[#allocation31] sm:$0x3] %vm4980_vm15, %v4977_v17 }
 0xcd9   :  { %6520 = shalt.err (!%p6517_p6)
}
 0xcda   :  { %s7836_s19 = sld [smem:[#allocation50_spill]] }
 0xce0   :  { %s6521_s1 = scalar_lea.hbm %s7836_s19, 32 }
 0xce1   :  { %p6522_p7 = scmp.ne.s32.totalorder %s7836_s19, %s6521_s1  ;;  %p6525_p8 = scmp.lt.u32.totalorder %s6521_s1, %s7836_s19 }
 0xce3   :  { %p6527_p9 = pnand %p6525_p8, %p6522_p7 }
 0xce5   :  { %6530 = shalt.err (!%p6527_p9)
}
 0xce6   :  { %4991 = dma.vmem_to_hbm [thread:$0]  %s4989_s10, 32, %s7836_s19, [#allocation7]  }
 0xce7   :  { %6549 = dma.done.wait [#allocation7], 32  }
 0xce8   :  { %6550 = vsyncadd [#allocation7], 4294967264 }
 0xce9   :  { %4995 = vsyncpa [#allocation6], 1 }
 0xcea   :  { %4996 = vsyncpa [#allocation9], 1 }
 0xceb   :  { %4997 = vsyncpa [#allocation12], 1 }
 0xcec   :  { %4998 = vsyncpa [#allocation15], 1 }
 0xced   :  { %4999 = vsyncpa [#allocation18], 1 }
 0xcee   :  { %5000 = vsyncpa [#allocation21], 1 }
 0xcef   :  { %5001 = vsyncpa [#allocation24], 1 }
 0xcf0   :  { %5002 = vsyncpa [#allocation27], 1 }
 0xcf1   :  { %5003 = vsyncpa [#allocation30], 1 }
 0xcf2   :  { %5004 = vsyncpa [#allocation7], 1 }

</bundles_post_ra>
